<compile_context>
chip_gen: v7x
topology: tpu7x:2x2x1
jax: 0.10.0
libtpu: 0.0.40
codegen_flags: <defaults>
</compile_context>

<pallas_src>
import math

import jax
import jax.numpy as jnp
from jax import lax
from jax.experimental import pallas as pl
from jax.experimental.pallas import tpu as pltpu

LN_EPS = 1e-5  # torch nn.LayerNorm default
_INV_SQRT2 = 1.0 / math.sqrt(2.0)


# ----------------------------------------------------------------------------
# in-kernel helpers (pure jnp/lax on values; traced once inside the kernel)
# ----------------------------------------------------------------------------
def _layernorm(x, gamma, beta):
    mu = jnp.mean(x, axis=-1, keepdims=True)
    var = jnp.mean((x - mu) ** 2, axis=-1, keepdims=True)
    return (x - mu) * lax.rsqrt(var + LN_EPS) * gamma + beta


def _mm(x, w):
    """bf16 operands on the MXU, f32 accumulation."""
    return jnp.dot(x.astype(w.dtype), w, preferred_element_type=jnp.float32)


def _softmax(sim):
    sim = sim - jnp.max(sim, axis=-1, keepdims=True)
    p = jnp.exp(sim)
    # reciprocal applied to p (narrow axis), EUP slot, frees the VALU
    return p * pl.reciprocal(jnp.sum(p, axis=-1, keepdims=True), approx=True)


def _attend(q, k, v, wo, *, heads, dh):
    """Per-head accumulation; q:(M,H*dh) k,v:(N,H*dh) bf16, wo:(H*dh,D) bf16."""
    M = q.shape[0]
    D = wo.shape[1]
    out = jnp.zeros((M, D), jnp.float32)
    for h in range(heads):                       # heads static -> unrolled
        lo, hi = h * dh, (h + 1) * dh            # dh=128 -> lane-aligned slices
        sim = lax.dot_general(q[:, lo:hi], k[:, lo:hi],
                              (((1,), (1,)), ((), ())),
                              preferred_element_type=jnp.float32)   # (M, N)
        p = _softmax(sim)                        # scale folded into Wq at init
        oh = jnp.dot(p.astype(jnp.bfloat16), v[:, lo:hi],
                     preferred_element_type=jnp.float32)            # (M, dh)
        out = out + jnp.dot(oh.astype(jnp.bfloat16), wo[lo:hi, :],
                            preferred_element_type=jnp.float32)     # (M, D)
    return out


def _geglu_ff(x, g, b, w1, b1, w2, b2, hidden):
    xn = _layernorm(x, g, b)
    h = _mm(xn, w1) + b1                         # (M, 2*hidden)
    a = h[:, :hidden]
    gate = h[:, hidden:]
    gelu = 0.5 * gate * (1.0 + lax.erf(gate * _INV_SQRT2))   # exact erf GELU
    return _mm(a * gelu, w2) + b2


# ----------------------------------------------------------------------------
# Fused kernel: one batch element per grid step (cross-attn -> FF -> self -> FF)
# ----------------------------------------------------------------------------
def _make_kernel(*, cross_heads, self_heads, dh, hidden):
    ic = cross_heads * dh
    il = self_heads * dh

    def kernel(data_ref, lat_ref,
               ca_wq, ca_wkv, ca_wo,
               cf_w1, cf_w2,
               sa_wqkv, sa_wo,
               sf_w1, sf_w2,
               vd_ref, vc_ref, vh_ref,
               o_ref):
        vd = vd_ref[...]          # (12, D): LN gammas/betas + attn/ff biases
        vc = vc_ref[...]          # (2,  C): cross-attn context LN gamma/beta
        vh = vh_ref[...]          # (2, 2*hidden): FF first-linear biases

        lat = lat_ref[...]        # (M, D) shared initial latents
        data = data_ref[...]      # (N, C) this batch element

        # ---- cross attention: latents attend to data (PreNorm both sides) ----
        xn = _layernorm(lat, vd[0:1, :], vd[1:2, :])
        cn = _layernorm(data, vc[0:1, :], vc[1:2, :])
        q = _mm(xn, ca_wq[...]).astype(jnp.bfloat16)        # (M, ic)
        kv = _mm(cn, ca_wkv[...]).astype(jnp.bfloat16)      # (N, 2*ic)
        lat = lat + _attend(q, kv[:, :ic], kv[:, ic:], ca_wo[...],
                            heads=cross_heads, dh=dh) + vd[2:3, :]

        # ---- cross GEGLU feed-forward ----
        lat = lat + _geglu_ff(lat, vd[3:4, :], vd[4:5, :], cf_w1[...],
                              vh[0:1, :], cf_w2[...], vd[5:6, :], hidden)

        # ---- latent self attention (context == x, tied norm) ----
        xn = _layernorm(lat, vd[6:7, :], vd[7:8, :])
        qkv = _mm(xn, sa_wqkv[...]).astype(jnp.bfloat16)    # (M, 3*il), one matmul
        lat = lat + _attend(qkv[:, :il], qkv[:, il:2 * il], qkv[:, 2 * il:],
                            sa_wo[...], heads=self_heads, dh=dh) + vd[8:9, :]

        # ---- latent GEGLU feed-forward ----
        lat = lat + _geglu_ff(lat, vd[9:10, :], vd[10:11, :], sf_w1[...],
                              vh[1:2, :], sf_w2[...], vd[11:12, :], hidden)

        o_ref[...] = lat                                     # (M, D)

    return kernel


# ----------------------------------------------------------------------------
# Synthetic parameter init (shapes from the module __init__): head padding
# 50 -> 128 (zero-padded, exact), scale folded into Wq, bf16 matmul weights,
# packed small vectors, packed self-attn QKV.
# ----------------------------------------------------------------------------
def init_params(key, *, input_channels, latent_dim, num_latents,
                cross_heads=1, cross_dim_head=50,
                latent_heads=8, latent_dim_head=50, ff_mult=4, dh_pad=128):
    D, C = latent_dim, input_channels
    hidden = D * ff_mult
    keys = iter(jax.random.split(key, 24))

    def u(shape, fan_in):                         # torch nn.Linear-style init
        bound = 1.0 / math.sqrt(fan_in)
        return jax.random.uniform(next(keys), shape, jnp.float32, -bound, bound)

    def pad_cols(w, heads, dh):   # (fi, H*dh) -> (fi, H*dh_pad), zero-padded
        fi = w.shape[0]
        w3 = w.reshape(fi, heads, dh)
        out = jnp.zeros((fi, heads, dh_pad), w.dtype).at[:, :, :dh].set(w3)
        return out.reshape(fi, heads * dh_pad)

    def pad_rows(w, heads, dh):   # (H*dh, fo) -> (H*dh_pad, fo), zero rows
        fo = w.shape[1]
        w3 = w.reshape(heads, dh, fo)
        out = jnp.zeros((heads, dh_pad, fo), w.dtype).at[:, :dh, :].set(w3)
        return out.reshape(heads * dh_pad, fo)

    bf16 = lambda a: a.astype(jnp.bfloat16)

    # ---- cross attention: to_q (no bias), to_kv (no bias), to_out (bias) ----
    ic = cross_heads * cross_dim_head
    ca_wq = pad_cols(u((D, ic), D) * cross_dim_head ** -0.5,
                     cross_heads, cross_dim_head)
    kvw = u((C, 2 * ic), C)
    ca_wkv = jnp.concatenate(
        [pad_cols(kvw[:, :ic], cross_heads, cross_dim_head),
         pad_cols(kvw[:, ic:], cross_heads, cross_dim_head)], axis=1)
    ca_wo = pad_rows(u((ic, D), ic), cross_heads, cross_dim_head)
    ca_bo = u((D,), ic)

    # ---- latent self attention: packed [q | k | v] projection ----
    il = latent_heads * latent_dim_head
    sa_wq = pad_cols(u((D, il), D) * latent_dim_head ** -0.5,
                     latent_heads, latent_dim_head)
    kvw = u((D, 2 * il), D)
    sa_wqkv = jnp.concatenate(
        [sa_wq,
         pad_cols(kvw[:, :il], latent_heads, latent_dim_head),
         pad_cols(kvw[:, il:], latent_heads, latent_dim_head)], axis=1)
    sa_wo = pad_rows(u((il, D), il), latent_heads, latent_dim_head)
    sa_bo = u((D,), il)

    # ---- GEGLU feed-forwards ----
    cf_w1, cf_b1 = u((D, 2 * hidden), D), u((2 * hidden,), D)
    cf_w2, cf_b2 = u((hidden, D), hidden), u((D,), hidden)
    sf_w1, sf_b1 = u((D, 2 * hidden), D), u((2 * hidden,), D)
    sf_w2, sf_b2 = u((hidden, D), hidden), u((D,), hidden)

    ones_d = jnp.ones((D,), jnp.float32)
    zeros_d = jnp.zeros((D,), jnp.float32)
    vec_d = jnp.stack([ones_d, zeros_d, ca_bo,        # cross-attn: ln g/b, out bias
                       ones_d, zeros_d, cf_b2,        # cross-ff:   ln g/b, bias2
                       ones_d, zeros_d, sa_bo,        # self-attn:  ln g/b, out bias
                       ones_d, zeros_d, sf_b2], 0)    # self-ff:    ln g/b, bias2
    vec_c = jnp.stack([jnp.ones((C,), jnp.float32),
                       jnp.zeros((C,), jnp.float32)], 0)
    vec_h = jnp.stack([cf_b1, sf_b1], 0)

    return {
        "latents": jax.random.normal(next(keys), (num_latents, D), jnp.float32),
        "ca_wq": bf16(ca_wq), "ca_wkv": bf16(ca_wkv), "ca_wo": bf16(ca_wo),
        "cf_w1": bf16(cf_w1), "cf_w2": bf16(cf_w2),
        "sa_wqkv": bf16(sa_wqkv), "sa_wo": bf16(sa_wo),
        "sf_w1": bf16(sf_w1), "sf_w2": bf16(sf_w2),
        "vec_d": vec_d, "vec_c": vec_c, "vec_h": vec_h,
        "dims": {"cross_heads": cross_heads, "self_heads": latent_heads,
                 "dh": dh_pad, "hidden": hidden},
    }


# ----------------------------------------------------------------------------
# Forward: one pallas_call, grid over batch, weights resident across steps
# ----------------------------------------------------------------------------
def nft_forward(x, params):
    """x: (batch, seq, input_channels) -> (batch, num_latents, latent_dim)."""
    B, N, C = x.shape
    M, D = params["latents"].shape
    d = params["dims"]
    hc, hs, dh, hidden = d["cross_heads"], d["self_heads"], d["dh"], d["hidden"]

    weights = [params["ca_wq"], params["ca_wkv"], params["ca_wo"],
               params["cf_w1"], params["cf_w2"],
               params["sa_wqkv"], params["sa_wo"],
               params["sf_w1"], params["sf_w2"]]
    vecs = [params["vec_d"], params["vec_c"], params["vec_h"]]

    def full_spec(a):   # whole array resident in VMEM, same block every step
        return pl.BlockSpec(a.shape, lambda b: (0,) * a.ndim)

    in_specs = ([pl.BlockSpec((None, N, C), lambda b: (b, 0, 0)),   # per-batch data
                 full_spec(params["latents"])]
                + [full_spec(w) for w in weights]
                + [full_spec(v) for v in vecs])
    out_specs = pl.BlockSpec((None, M, D), lambda b: (b, 0, 0))

    kernel = _make_kernel(cross_heads=hc, self_heads=hs, dh=dh, hidden=hidden)

    # Advisory cost estimate for XLA scheduling around this custom call.
    ic, il = hc * dh, hs * dh
    flops = 2 * B * (M * D * ic + N * C * 2 * ic
                     + hc * (2 * M * N * dh + M * dh * D)
                     + M * D * 3 * il
                     + hs * (2 * M * M * dh + M * dh * D)
                     + 2 * (M * D * 2 * hidden + M * hidden * D))
    trans = B * (hc * M * N + hs * M * M + 2 * M * hidden)
    all_in = [x, params["latents"]] + weights + vecs
    bytes_acc = sum(int(a.size) * a.dtype.itemsize for a in all_in) + B * M * D * 4

    # NOTE: total resident weights ~0.4 MB -> far under every chip's scoped
    # VMEM default; set vmem_limit_bytes here only if B*N / latent_dim grow.
    return pl.pallas_call(
        kernel,
        grid=(B,),
        in_specs=in_specs,
        out_specs=out_specs,
        out_shape=jax.ShapeDtypeStruct((B, M, D), jnp.float32),
        compiler_params=pltpu.CompilerParams(
            dimension_semantics=("parallel",)),     # v7x: batch across both TCs
        cost_estimate=pl.CostEstimate(flops=int(flops),
                                      transcendentals=int(trans),
                                      bytes_accessed=int(bytes_acc)),
    )(x, params["latents"], *weights, *vecs)


if __name__ == "__main__":
    key = jax.random.PRNGKey(0)
    k_x, k_p = jax.random.split(key)

    B, SEQ, C = 2, 8, 4          # batch, sequence (input_axis=1), input_channels
    LATENT_DIM, NUM_LATENTS = 32, 64

    x = jax.random.normal(k_x, (B, SEQ, C), jnp.float32)
    params = init_params(k_p, input_channels=C, latent_dim=LATENT_DIM,
                         num_latents=NUM_LATENTS)

    out = nft_forward(x, params)
    out = jax.block_until_ready(out)
    assert out.shape == (B, NUM_LATENTS, LATENT_DIM), out.shape
    assert bool(jnp.all(jnp.isfinite(out)))
    print("KERNEL_OK")
</pallas_src>

<mosaic_0001>
module attributes {stable_mosaic.version = 11 : i64} {
  func.func @kernel(%arg0: i32, %arg1: memref<1x8x4xf32, #tpu.memory_space<vmem>>, %arg2: memref<64x32xf32, #tpu.memory_space<vmem>>, %arg3: memref<32x128xbf16, #tpu.memory_space<vmem>>, %arg4: memref<4x256xbf16, #tpu.memory_space<vmem>>, %arg5: memref<128x32xbf16, #tpu.memory_space<vmem>>, %arg6: memref<32x256xbf16, #tpu.memory_space<vmem>>, %arg7: memref<128x32xbf16, #tpu.memory_space<vmem>>, %arg8: memref<32x3072xbf16, #tpu.memory_space<vmem>>, %arg9: memref<1024x32xbf16, #tpu.memory_space<vmem>>, %arg10: memref<32x256xbf16, #tpu.memory_space<vmem>>, %arg11: memref<128x32xbf16, #tpu.memory_space<vmem>>, %arg12: memref<12x32xf32, #tpu.memory_space<vmem>>, %arg13: memref<2x4xf32, #tpu.memory_space<vmem>>, %arg14: memref<2x256xf32, #tpu.memory_space<vmem>>, %arg15: memref<1x64x32xf32, #tpu.memory_space<vmem>>) attributes {dimension_semantics = [#tpu.dimension_semantics<parallel>], iteration_bounds = array<i64: 2>, scalar_prefetch = 0 : i64, scratch_operands = 0 : i64, tpu.core_type = #tpu.core_type<tc>, window_params = [{transform_indices = @transform_0, window_bounds = array<i64: 1, 8, 4>}, {pipeline_mode = #tpu.pipeline_mode<synchronous>, transform_indices = @transform_1, window_bounds = array<i64: 64, 32>}, {pipeline_mode = #tpu.pipeline_mode<synchronous>, transform_indices = @transform_2, window_bounds = array<i64: 32, 128>}, {pipeline_mode = #tpu.pipeline_mode<synchronous>, transform_indices = @transform_3, window_bounds = array<i64: 4, 256>}, {pipeline_mode = #tpu.pipeline_mode<synchronous>, transform_indices = @transform_4, window_bounds = array<i64: 128, 32>}, {pipeline_mode = #tpu.pipeline_mode<synchronous>, transform_indices = @transform_5, window_bounds = array<i64: 32, 256>}, {pipeline_mode = #tpu.pipeline_mode<synchronous>, transform_indices = @transform_6, window_bounds = array<i64: 128, 32>}, {pipeline_mode = #tpu.pipeline_mode<synchronous>, transform_indices = @transform_7, window_bounds = array<i64: 32, 3072>}, {pipeline_mode = #tpu.pipeline_mode<synchronous>, transform_indices = @transform_8, window_bounds = array<i64: 1024, 32>}, {pipeline_mode = #tpu.pipeline_mode<synchronous>, transform_indices = @transform_9, window_bounds = array<i64: 32, 256>}, {pipeline_mode = #tpu.pipeline_mode<synchronous>, transform_indices = @transform_10, window_bounds = array<i64: 128, 32>}, {pipeline_mode = #tpu.pipeline_mode<synchronous>, transform_indices = @transform_11, window_bounds = array<i64: 12, 32>}, {pipeline_mode = #tpu.pipeline_mode<synchronous>, transform_indices = @transform_12, window_bounds = array<i64: 2, 4>}, {pipeline_mode = #tpu.pipeline_mode<synchronous>, transform_indices = @transform_13, window_bounds = array<i64: 2, 256>}, {transform_indices = @transform_14, window_bounds = array<i64: 1, 64, 32>}]} {
    %c0 = arith.constant 0 : index
    %c0_0 = arith.constant 0 : index
    %0 = vector.load %arg12[%c0, %c0_0] : memref<12x32xf32, #tpu.memory_space<vmem>>, vector<12x32xf32>
    %c0_1 = arith.constant 0 : index
    %c0_2 = arith.constant 0 : index
    %1 = vector.load %arg13[%c0_1, %c0_2] : memref<2x4xf32, #tpu.memory_space<vmem>>, vector<2x4xf32>
    %c0_3 = arith.constant 0 : index
    %c0_4 = arith.constant 0 : index
    %2 = vector.load %arg14[%c0_3, %c0_4] : memref<2x256xf32, #tpu.memory_space<vmem>>, vector<2x256xf32>
    %c0_5 = arith.constant 0 : index
    %c0_6 = arith.constant 0 : index
    %3 = vector.load %arg2[%c0_5, %c0_6] : memref<64x32xf32, #tpu.memory_space<vmem>>, vector<64x32xf32>
    %c0_7 = arith.constant 0 : index
    %c0_8 = arith.constant 0 : index
    %c0_9 = arith.constant 0 : index
    %4 = vector.load %arg1[%c0_7, %c0_8, %c0_9] : memref<1x8x4xf32, #tpu.memory_space<vmem>>, vector<1x8x4xf32>
    %5 = vector.shape_cast %4 : vector<1x8x4xf32> to vector<8x4xf32>
    %6 = vector.extract_strided_slice %0 {offsets = [0, 0], sizes = [1, 32], strides = [1, 1]} : vector<12x32xf32> to vector<1x32xf32>
    %7 = vector.extract_strided_slice %0 {offsets = [1, 0], sizes = [1, 32], strides = [1, 1]} : vector<12x32xf32> to vector<1x32xf32>
    %cst = arith.constant dense<0.000000e+00> : vector<64xf32>
    %8 = vector.multi_reduction <add>, %3, %cst [1] : vector<64x32xf32> to vector<64xf32>
    %9 = vector.shape_cast %8 : vector<64xf32> to vector<64x1xf32>
    %cst_10 = arith.constant 3.200000e+01 : f32
    %10 = vector.broadcast %cst_10 : f32 to vector<64x1xf32>
    %11 = arith.divf %9, %10 : vector<64x1xf32>
    %12 = vector.broadcast %11 : vector<64x1xf32> to vector<64x32xf32>
    %13 = arith.subf %3, %12 : vector<64x32xf32>
    %14 = arith.mulf %13, %13 : vector<64x32xf32>
    %cst_11 = arith.constant dense<0.000000e+00> : vector<64xf32>
    %15 = vector.multi_reduction <add>, %14, %cst_11 [1] : vector<64x32xf32> to vector<64xf32>
    %16 = vector.shape_cast %15 : vector<64xf32> to vector<64x1xf32>
    %cst_12 = arith.constant 3.200000e+01 : f32
    %17 = vector.broadcast %cst_12 : f32 to vector<64x1xf32>
    %18 = arith.divf %16, %17 : vector<64x1xf32>
    %19 = vector.broadcast %11 : vector<64x1xf32> to vector<64x32xf32>
    %20 = arith.subf %3, %19 : vector<64x32xf32>
    %cst_13 = arith.constant 9.99999974E-6 : f32
    %21 = vector.broadcast %cst_13 : f32 to vector<64x1xf32>
    %22 = arith.addf %18, %21 : vector<64x1xf32>
    %23 = math.rsqrt %22 : vector<64x1xf32>
    %24 = vector.broadcast %23 : vector<64x1xf32> to vector<64x32xf32>
    %25 = arith.mulf %20, %24 : vector<64x32xf32>
    %26 = vector.broadcast %6 : vector<1x32xf32> to vector<64x32xf32>
    %27 = arith.mulf %25, %26 : vector<64x32xf32>
    %28 = vector.broadcast %7 : vector<1x32xf32> to vector<64x32xf32>
    %29 = arith.addf %27, %28 : vector<64x32xf32>
    %30 = vector.extract_strided_slice %1 {offsets = [0, 0], sizes = [1, 4], strides = [1, 1]} : vector<2x4xf32> to vector<1x4xf32>
    %31 = vector.extract_strided_slice %1 {offsets = [1, 0], sizes = [1, 4], strides = [1, 1]} : vector<2x4xf32> to vector<1x4xf32>
    %cst_14 = arith.constant dense<0.000000e+00> : vector<8xf32>
    %32 = vector.multi_reduction <add>, %5, %cst_14 [1] : vector<8x4xf32> to vector<8xf32>
    %33 = vector.shape_cast %32 : vector<8xf32> to vector<8x1xf32>
    %cst_15 = arith.constant 4.000000e+00 : f32
    %34 = vector.broadcast %cst_15 : f32 to vector<8x1xf32>
    %35 = arith.divf %33, %34 : vector<8x1xf32>
    %36 = vector.broadcast %35 : vector<8x1xf32> to vector<8x4xf32>
    %37 = arith.subf %5, %36 : vector<8x4xf32>
    %38 = arith.mulf %37, %37 : vector<8x4xf32>
    %cst_16 = arith.constant dense<0.000000e+00> : vector<8xf32>
    %39 = vector.multi_reduction <add>, %38, %cst_16 [1] : vector<8x4xf32> to vector<8xf32>
    %40 = vector.shape_cast %39 : vector<8xf32> to vector<8x1xf32>
    %cst_17 = arith.constant 4.000000e+00 : f32
    %41 = vector.broadcast %cst_17 : f32 to vector<8x1xf32>
    %42 = arith.divf %40, %41 : vector<8x1xf32>
    %43 = vector.broadcast %35 : vector<8x1xf32> to vector<8x4xf32>
    %44 = arith.subf %5, %43 : vector<8x4xf32>
    %cst_18 = arith.constant 9.99999974E-6 : f32
    %45 = vector.broadcast %cst_18 : f32 to vector<8x1xf32>
    %46 = arith.addf %42, %45 : vector<8x1xf32>
    %47 = math.rsqrt %46 : vector<8x1xf32>
    %48 = vector.broadcast %47 : vector<8x1xf32> to vector<8x4xf32>
    %49 = arith.mulf %44, %48 : vector<8x4xf32>
    %50 = vector.broadcast %30 : vector<1x4xf32> to vector<8x4xf32>
    %51 = arith.mulf %49, %50 : vector<8x4xf32>
    %52 = vector.broadcast %31 : vector<1x4xf32> to vector<8x4xf32>
    %53 = arith.addf %51, %52 : vector<8x4xf32>
    %c0_19 = arith.constant 0 : index
    %c0_20 = arith.constant 0 : index
    %54 = vector.load %arg3[%c0_19, %c0_20] : memref<32x128xbf16, #tpu.memory_space<vmem>>, vector<32x128xbf16>
    %55 = arith.truncf %29 : vector<64x32xf32> to vector<64x32xbf16>
    %cst_21 = arith.constant dense<0.000000e+00> : vector<64x128xf32>
    %56 = tpu.matmul %55, %54, %cst_21 {dimension_numbers = #tpu.dot_dimension_numbers<[1], [0], [0], [1], [0, 0, 1, 1], [], []>} : vector<64x32xbf16>, vector<32x128xbf16>, vector<64x128xf32> -> vector<64x128xf32>
    %57 = arith.truncf %56 : vector<64x128xf32> to vector<64x128xbf16>
    %c0_22 = arith.constant 0 : index
    %c0_23 = arith.constant 0 : index
    %58 = vector.load %arg4[%c0_22, %c0_23] : memref<4x256xbf16, #tpu.memory_space<vmem>>, vector<4x256xbf16>
    %59 = arith.truncf %53 : vector<8x4xf32> to vector<8x4xbf16>
    %cst_24 = arith.constant dense<0.000000e+00> : vector<8x256xf32>
    %60 = tpu.matmul %59, %58, %cst_24 {dimension_numbers = #tpu.dot_dimension_numbers<[1], [0], [0], [1], [0, 0, 1, 1], [], []>} : vector<8x4xbf16>, vector<4x256xbf16>, vector<8x256xf32> -> vector<8x256xf32>
    %61 = arith.truncf %60 : vector<8x256xf32> to vector<8x256xbf16>
    %62 = vector.extract_strided_slice %61 {offsets = [0, 0], sizes = [8, 128], strides = [1, 1]} : vector<8x256xbf16> to vector<8x128xbf16>
    %63 = vector.extract_strided_slice %61 {offsets = [0, 128], sizes = [8, 128], strides = [1, 1]} : vector<8x256xbf16> to vector<8x128xbf16>
    %c0_25 = arith.constant 0 : index
    %c0_26 = arith.constant 0 : index
    %64 = vector.load %arg5[%c0_25, %c0_26] : memref<128x32xbf16, #tpu.memory_space<vmem>>, vector<128x32xbf16>
    %cst_27 = arith.constant 0.000000e+00 : f32
    %65 = vector.broadcast %cst_27 : f32 to vector<64x32xf32>
    %cst_28 = arith.constant dense<0.000000e+00> : vector<64x8xf32>
    %66 = tpu.matmul %57, %62, %cst_28 {dimension_numbers = #tpu.dot_dimension_numbers<[1], [1], [0], [0], [0, 0, 1, 0], [], []>} : vector<64x128xbf16>, vector<8x128xbf16>, vector<64x8xf32> -> vector<64x8xf32>
    %cst_29 = arith.constant dense<0xFF800000> : vector<64xf32>
    %67 = vector.multi_reduction <maximumf>, %66, %cst_29 [1] : vector<64x8xf32> to vector<64xf32>
    %68 = vector.shape_cast %67 : vector<64xf32> to vector<64x1xf32>
    %69 = vector.broadcast %68 : vector<64x1xf32> to vector<64x8xf32>
    %70 = arith.subf %66, %69 : vector<64x8xf32>
    %71 = math.exp %70 : vector<64x8xf32>
    %cst_30 = arith.constant dense<0.000000e+00> : vector<64xf32>
    %72 = vector.multi_reduction <add>, %71, %cst_30 [1] : vector<64x8xf32> to vector<64xf32>
    %73 = vector.shape_cast %72 : vector<64xf32> to vector<64x1xf32>
    %74 = tpu.reciprocal %73 {approx = true} : vector<64x1xf32> -> vector<64x1xf32>
    %75 = vector.broadcast %74 : vector<64x1xf32> to vector<64x8xf32>
    %76 = arith.mulf %71, %75 : vector<64x8xf32>
    %77 = arith.truncf %76 : vector<64x8xf32> to vector<64x8xbf16>
    %cst_31 = arith.constant dense<0.000000e+00> : vector<64x128xf32>
    %78 = tpu.matmul %77, %63, %cst_31 {dimension_numbers = #tpu.dot_dimension_numbers<[1], [0], [0], [1], [0, 0, 1, 1], [], []>} : vector<64x8xbf16>, vector<8x128xbf16>, vector<64x128xf32> -> vector<64x128xf32>
    %79 = arith.truncf %78 : vector<64x128xf32> to vector<64x128xbf16>
    %cst_32 = arith.constant dense<0.000000e+00> : vector<64x32xf32>
    %80 = tpu.matmul %79, %64, %cst_32 {dimension_numbers = #tpu.dot_dimension_numbers<[1], [0], [0], [1], [0, 0, 1, 1], [], []>} : vector<64x128xbf16>, vector<128x32xbf16>, vector<64x32xf32> -> vector<64x32xf32>
    %81 = arith.addf %65, %80 : vector<64x32xf32>
    %82 = arith.addf %3, %81 : vector<64x32xf32>
    %83 = vector.extract_strided_slice %0 {offsets = [2, 0], sizes = [1, 32], strides = [1, 1]} : vector<12x32xf32> to vector<1x32xf32>
    %84 = vector.broadcast %83 : vector<1x32xf32> to vector<64x32xf32>
    %85 = arith.addf %82, %84 : vector<64x32xf32>
    %86 = vector.extract_strided_slice %0 {offsets = [3, 0], sizes = [1, 32], strides = [1, 1]} : vector<12x32xf32> to vector<1x32xf32>
    %87 = vector.extract_strided_slice %0 {offsets = [4, 0], sizes = [1, 32], strides = [1, 1]} : vector<12x32xf32> to vector<1x32xf32>
    %c0_33 = arith.constant 0 : index
    %c0_34 = arith.constant 0 : index
    %88 = vector.load %arg6[%c0_33, %c0_34] : memref<32x256xbf16, #tpu.memory_space<vmem>>, vector<32x256xbf16>
    %89 = vector.extract_strided_slice %2 {offsets = [0, 0], sizes = [1, 256], strides = [1, 1]} : vector<2x256xf32> to vector<1x256xf32>
    %c0_35 = arith.constant 0 : index
    %c0_36 = arith.constant 0 : index
    %90 = vector.load %arg7[%c0_35, %c0_36] : memref<128x32xbf16, #tpu.memory_space<vmem>>, vector<128x32xbf16>
    %91 = vector.extract_strided_slice %0 {offsets = [5, 0], sizes = [1, 32], strides = [1, 1]} : vector<12x32xf32> to vector<1x32xf32>
    %cst_37 = arith.constant dense<0.000000e+00> : vector<64xf32>
    %92 = vector.multi_reduction <add>, %85, %cst_37 [1] : vector<64x32xf32> to vector<64xf32>
    %93 = vector.shape_cast %92 : vector<64xf32> to vector<64x1xf32>
    %cst_38 = arith.constant 3.200000e+01 : f32
    %94 = vector.broadcast %cst_38 : f32 to vector<64x1xf32>
    %95 = arith.divf %93, %94 : vector<64x1xf32>
    %96 = vector.broadcast %95 : vector<64x1xf32> to vector<64x32xf32>
    %97 = arith.subf %85, %96 : vector<64x32xf32>
    %98 = arith.mulf %97, %97 : vector<64x32xf32>
    %cst_39 = arith.constant dense<0.000000e+00> : vector<64xf32>
    %99 = vector.multi_reduction <add>, %98, %cst_39 [1] : vector<64x32xf32> to vector<64xf32>
    %100 = vector.shape_cast %99 : vector<64xf32> to vector<64x1xf32>
    %cst_40 = arith.constant 3.200000e+01 : f32
    %101 = vector.broadcast %cst_40 : f32 to vector<64x1xf32>
    %102 = arith.divf %100, %101 : vector<64x1xf32>
    %103 = vector.broadcast %95 : vector<64x1xf32> to vector<64x32xf32>
    %104 = arith.subf %85, %103 : vector<64x32xf32>
    %cst_41 = arith.constant 9.99999974E-6 : f32
    %105 = vector.broadcast %cst_41 : f32 to vector<64x1xf32>
    %106 = arith.addf %102, %105 : vector<64x1xf32>
    %107 = math.rsqrt %106 : vector<64x1xf32>
    %108 = vector.broadcast %107 : vector<64x1xf32> to vector<64x32xf32>
    %109 = arith.mulf %104, %108 : vector<64x32xf32>
    %110 = vector.broadcast %86 : vector<1x32xf32> to vector<64x32xf32>
    %111 = arith.mulf %109, %110 : vector<64x32xf32>
    %112 = vector.broadcast %87 : vector<1x32xf32> to vector<64x32xf32>
    %113 = arith.addf %111, %112 : vector<64x32xf32>
    %114 = arith.truncf %113 : vector<64x32xf32> to vector<64x32xbf16>
    %cst_42 = arith.constant dense<0.000000e+00> : vector<64x256xf32>
    %115 = tpu.matmul %114, %88, %cst_42 {dimension_numbers = #tpu.dot_dimension_numbers<[1], [0], [0], [1], [0, 0, 1, 1], [], []>} : vector<64x32xbf16>, vector<32x256xbf16>, vector<64x256xf32> -> vector<64x256xf32>
    %116 = vector.broadcast %89 : vector<1x256xf32> to vector<64x256xf32>
    %117 = arith.addf %115, %116 : vector<64x256xf32>
    %118 = vector.extract_strided_slice %117 {offsets = [0, 0], sizes = [64, 128], strides = [1, 1]} : vector<64x256xf32> to vector<64x128xf32>
    %119 = vector.extract_strided_slice %117 {offsets = [0, 128], sizes = [64, 128], strides = [1, 1]} : vector<64x256xf32> to vector<64x128xf32>
    %cst_43 = arith.constant 5.000000e-01 : f32
    %120 = vector.broadcast %cst_43 : f32 to vector<64x128xf32>
    %121 = arith.mulf %120, %119 : vector<64x128xf32>
    %cst_44 = arith.constant 0.707106769 : f32
    %122 = vector.broadcast %cst_44 : f32 to vector<64x128xf32>
    %123 = arith.mulf %119, %122 : vector<64x128xf32>
    %124 = math.erf %123 : vector<64x128xf32>
    %cst_45 = arith.constant 1.000000e+00 : f32
    %125 = vector.broadcast %cst_45 : f32 to vector<64x128xf32>
    %126 = arith.addf %125, %124 : vector<64x128xf32>
    %127 = arith.mulf %121, %126 : vector<64x128xf32>
    %128 = arith.mulf %118, %127 : vector<64x128xf32>
    %129 = arith.truncf %128 : vector<64x128xf32> to vector<64x128xbf16>
    %cst_46 = arith.constant dense<0.000000e+00> : vector<64x32xf32>
    %130 = tpu.matmul %129, %90, %cst_46 {dimension_numbers = #tpu.dot_dimension_numbers<[1], [0], [0], [1], [0, 0, 1, 1], [], []>} : vector<64x128xbf16>, vector<128x32xbf16>, vector<64x32xf32> -> vector<64x32xf32>
    %131 = vector.broadcast %91 : vector<1x32xf32> to vector<64x32xf32>
    %132 = arith.addf %130, %131 : vector<64x32xf32>
    %133 = arith.addf %85, %132 : vector<64x32xf32>
    %134 = vector.extract_strided_slice %0 {offsets = [6, 0], sizes = [1, 32], strides = [1, 1]} : vector<12x32xf32> to vector<1x32xf32>
    %135 = vector.extract_strided_slice %0 {offsets = [7, 0], sizes = [1, 32], strides = [1, 1]} : vector<12x32xf32> to vector<1x32xf32>
    %cst_47 = arith.constant dense<0.000000e+00> : vector<64xf32>
    %136 = vector.multi_reduction <add>, %133, %cst_47 [1] : vector<64x32xf32> to vector<64xf32>
    %137 = vector.shape_cast %136 : vector<64xf32> to vector<64x1xf32>
    %cst_48 = arith.constant 3.200000e+01 : f32
    %138 = vector.broadcast %cst_48 : f32 to vector<64x1xf32>
    %139 = arith.divf %137, %138 : vector<64x1xf32>
    %140 = vector.broadcast %139 : vector<64x1xf32> to vector<64x32xf32>
    %141 = arith.subf %133, %140 : vector<64x32xf32>
    %142 = arith.mulf %141, %141 : vector<64x32xf32>
    %cst_49 = arith.constant dense<0.000000e+00> : vector<64xf32>
    %143 = vector.multi_reduction <add>, %142, %cst_49 [1] : vector<64x32xf32> to vector<64xf32>
    %144 = vector.shape_cast %143 : vector<64xf32> to vector<64x1xf32>
    %cst_50 = arith.constant 3.200000e+01 : f32
    %145 = vector.broadcast %cst_50 : f32 to vector<64x1xf32>
    %146 = arith.divf %144, %145 : vector<64x1xf32>
    %147 = vector.broadcast %139 : vector<64x1xf32> to vector<64x32xf32>
    %148 = arith.subf %133, %147 : vector<64x32xf32>
    %cst_51 = arith.constant 9.99999974E-6 : f32
    %149 = vector.broadcast %cst_51 : f32 to vector<64x1xf32>
    %150 = arith.addf %146, %149 : vector<64x1xf32>
    %151 = math.rsqrt %150 : vector<64x1xf32>
    %152 = vector.broadcast %151 : vector<64x1xf32> to vector<64x32xf32>
    %153 = arith.mulf %148, %152 : vector<64x32xf32>
    %154 = vector.broadcast %134 : vector<1x32xf32> to vector<64x32xf32>
    %155 = arith.mulf %153, %154 : vector<64x32xf32>
    %156 = vector.broadcast %135 : vector<1x32xf32> to vector<64x32xf32>
    %157 = arith.addf %155, %156 : vector<64x32xf32>
    %c0_52 = arith.constant 0 : index
    %c0_53 = arith.constant 0 : index
    %158 = vector.load %arg8[%c0_52, %c0_53] : memref<32x3072xbf16, #tpu.memory_space<vmem>>, vector<32x3072xbf16>
    %159 = arith.truncf %157 : vector<64x32xf32> to vector<64x32xbf16>
    %cst_54 = arith.constant dense<0.000000e+00> : vector<64x3072xf32>
    %160 = tpu.matmul %159, %158, %cst_54 {dimension_numbers = #tpu.dot_dimension_numbers<[1], [0], [0], [1], [0, 0, 1, 1], [], []>} : vector<64x32xbf16>, vector<32x3072xbf16>, vector<64x3072xf32> -> vector<64x3072xf32>
    %161 = arith.truncf %160 : vector<64x3072xf32> to vector<64x3072xbf16>
    %162 = vector.extract_strided_slice %161 {offsets = [0, 0], sizes = [64, 1024], strides = [1, 1]} : vector<64x3072xbf16> to vector<64x1024xbf16>
    %163 = vector.extract_strided_slice %161 {offsets = [0, 1024], sizes = [64, 1024], strides = [1, 1]} : vector<64x3072xbf16> to vector<64x1024xbf16>
    %164 = vector.extract_strided_slice %161 {offsets = [0, 2048], sizes = [64, 1024], strides = [1, 1]} : vector<64x3072xbf16> to vector<64x1024xbf16>
    %c0_55 = arith.constant 0 : index
    %c0_56 = arith.constant 0 : index
    %165 = vector.load %arg9[%c0_55, %c0_56] : memref<1024x32xbf16, #tpu.memory_space<vmem>>, vector<1024x32xbf16>
    %cst_57 = arith.constant 0.000000e+00 : f32
    %166 = vector.broadcast %cst_57 : f32 to vector<64x32xf32>
    %167 = vector.extract_strided_slice %162 {offsets = [0, 0], sizes = [64, 128], strides = [1, 1]} : vector<64x1024xbf16> to vector<64x128xbf16>
    %168 = vector.extract_strided_slice %163 {offsets = [0, 0], sizes = [64, 128], strides = [1, 1]} : vector<64x1024xbf16> to vector<64x128xbf16>
    %cst_58 = arith.constant dense<0.000000e+00> : vector<64x64xf32>
    %169 = tpu.matmul %167, %168, %cst_58 {dimension_numbers = #tpu.dot_dimension_numbers<[1], [1], [0], [0], [0, 0, 1, 0], [], []>} : vector<64x128xbf16>, vector<64x128xbf16>, vector<64x64xf32> -> vector<64x64xf32>
    %cst_59 = arith.constant dense<0xFF800000> : vector<64xf32>
    %170 = vector.multi_reduction <maximumf>, %169, %cst_59 [1] : vector<64x64xf32> to vector<64xf32>
    %171 = vector.shape_cast %170 : vector<64xf32> to vector<64x1xf32>
    %172 = vector.broadcast %171 : vector<64x1xf32> to vector<64x64xf32>
    %173 = arith.subf %169, %172 : vector<64x64xf32>
    %174 = math.exp %173 : vector<64x64xf32>
    %cst_60 = arith.constant dense<0.000000e+00> : vector<64xf32>
    %175 = vector.multi_reduction <add>, %174, %cst_60 [1] : vector<64x64xf32> to vector<64xf32>
    %176 = vector.shape_cast %175 : vector<64xf32> to vector<64x1xf32>
    %177 = tpu.reciprocal %176 {approx = true} : vector<64x1xf32> -> vector<64x1xf32>
    %178 = vector.broadcast %177 : vector<64x1xf32> to vector<64x64xf32>
    %179 = arith.mulf %174, %178 : vector<64x64xf32>
    %180 = arith.truncf %179 : vector<64x64xf32> to vector<64x64xbf16>
    %181 = vector.extract_strided_slice %164 {offsets = [0, 0], sizes = [64, 128], strides = [1, 1]} : vector<64x1024xbf16> to vector<64x128xbf16>
    %cst_61 = arith.constant dense<0.000000e+00> : vector<64x128xf32>
    %182 = tpu.matmul %180, %181, %cst_61 {dimension_numbers = #tpu.dot_dimension_numbers<[1], [0], [0], [1], [0, 0, 1, 1], [], []>} : vector<64x64xbf16>, vector<64x128xbf16>, vector<64x128xf32> -> vector<64x128xf32>
    %183 = arith.truncf %182 : vector<64x128xf32> to vector<64x128xbf16>
    %184 = vector.extract_strided_slice %165 {offsets = [0, 0], sizes = [128, 32], strides = [1, 1]} : vector<1024x32xbf16> to vector<128x32xbf16>
    %cst_62 = arith.constant dense<0.000000e+00> : vector<64x32xf32>
    %185 = tpu.matmul %183, %184, %cst_62 {dimension_numbers = #tpu.dot_dimension_numbers<[1], [0], [0], [1], [0, 0, 1, 1], [], []>} : vector<64x128xbf16>, vector<128x32xbf16>, vector<64x32xf32> -> vector<64x32xf32>
    %186 = arith.addf %166, %185 : vector<64x32xf32>
    %187 = vector.extract_strided_slice %162 {offsets = [0, 128], sizes = [64, 128], strides = [1, 1]} : vector<64x1024xbf16> to vector<64x128xbf16>
    %188 = vector.extract_strided_slice %163 {offsets = [0, 128], sizes = [64, 128], strides = [1, 1]} : vector<64x1024xbf16> to vector<64x128xbf16>
    %cst_63 = arith.constant dense<0.000000e+00> : vector<64x64xf32>
    %189 = tpu.matmul %187, %188, %cst_63 {dimension_numbers = #tpu.dot_dimension_numbers<[1], [1], [0], [0], [0, 0, 1, 0], [], []>} : vector<64x128xbf16>, vector<64x128xbf16>, vector<64x64xf32> -> vector<64x64xf32>
    %cst_64 = arith.constant dense<0xFF800000> : vector<64xf32>
    %190 = vector.multi_reduction <maximumf>, %189, %cst_64 [1] : vector<64x64xf32> to vector<64xf32>
    %191 = vector.shape_cast %190 : vector<64xf32> to vector<64x1xf32>
    %192 = vector.broadcast %191 : vector<64x1xf32> to vector<64x64xf32>
    %193 = arith.subf %189, %192 : vector<64x64xf32>
    %194 = math.exp %193 : vector<64x64xf32>
    %cst_65 = arith.constant dense<0.000000e+00> : vector<64xf32>
    %195 = vector.multi_reduction <add>, %194, %cst_65 [1] : vector<64x64xf32> to vector<64xf32>
    %196 = vector.shape_cast %195 : vector<64xf32> to vector<64x1xf32>
    %197 = tpu.reciprocal %196 {approx = true} : vector<64x1xf32> -> vector<64x1xf32>
    %198 = vector.broadcast %197 : vector<64x1xf32> to vector<64x64xf32>
    %199 = arith.mulf %194, %198 : vector<64x64xf32>
    %200 = arith.truncf %199 : vector<64x64xf32> to vector<64x64xbf16>
    %201 = vector.extract_strided_slice %164 {offsets = [0, 128], sizes = [64, 128], strides = [1, 1]} : vector<64x1024xbf16> to vector<64x128xbf16>
    %cst_66 = arith.constant dense<0.000000e+00> : vector<64x128xf32>
    %202 = tpu.matmul %200, %201, %cst_66 {dimension_numbers = #tpu.dot_dimension_numbers<[1], [0], [0], [1], [0, 0, 1, 1], [], []>} : vector<64x64xbf16>, vector<64x128xbf16>, vector<64x128xf32> -> vector<64x128xf32>
    %203 = arith.truncf %202 : vector<64x128xf32> to vector<64x128xbf16>
    %204 = vector.extract_strided_slice %165 {offsets = [128, 0], sizes = [128, 32], strides = [1, 1]} : vector<1024x32xbf16> to vector<128x32xbf16>
    %cst_67 = arith.constant dense<0.000000e+00> : vector<64x32xf32>
    %205 = tpu.matmul %203, %204, %cst_67 {dimension_numbers = #tpu.dot_dimension_numbers<[1], [0], [0], [1], [0, 0, 1, 1], [], []>} : vector<64x128xbf16>, vector<128x32xbf16>, vector<64x32xf32> -> vector<64x32xf32>
    %206 = arith.addf %186, %205 : vector<64x32xf32>
    %207 = vector.extract_strided_slice %162 {offsets = [0, 256], sizes = [64, 128], strides = [1, 1]} : vector<64x1024xbf16> to vector<64x128xbf16>
    %208 = vector.extract_strided_slice %163 {offsets = [0, 256], sizes = [64, 128], strides = [1, 1]} : vector<64x1024xbf16> to vector<64x128xbf16>
    %cst_68 = arith.constant dense<0.000000e+00> : vector<64x64xf32>
    %209 = tpu.matmul %207, %208, %cst_68 {dimension_numbers = #tpu.dot_dimension_numbers<[1], [1], [0], [0], [0, 0, 1, 0], [], []>} : vector<64x128xbf16>, vector<64x128xbf16>, vector<64x64xf32> -> vector<64x64xf32>
    %cst_69 = arith.constant dense<0xFF800000> : vector<64xf32>
    %210 = vector.multi_reduction <maximumf>, %209, %cst_69 [1] : vector<64x64xf32> to vector<64xf32>
    %211 = vector.shape_cast %210 : vector<64xf32> to vector<64x1xf32>
    %212 = vector.broadcast %211 : vector<64x1xf32> to vector<64x64xf32>
    %213 = arith.subf %209, %212 : vector<64x64xf32>
    %214 = math.exp %213 : vector<64x64xf32>
    %cst_70 = arith.constant dense<0.000000e+00> : vector<64xf32>
    %215 = vector.multi_reduction <add>, %214, %cst_70 [1] : vector<64x64xf32> to vector<64xf32>
    %216 = vector.shape_cast %215 : vector<64xf32> to vector<64x1xf32>
    %217 = tpu.reciprocal %216 {approx = true} : vector<64x1xf32> -> vector<64x1xf32>
    %218 = vector.broadcast %217 : vector<64x1xf32> to vector<64x64xf32>
    %219 = arith.mulf %214, %218 : vector<64x64xf32>
    %220 = arith.truncf %219 : vector<64x64xf32> to vector<64x64xbf16>
    %221 = vector.extract_strided_slice %164 {offsets = [0, 256], sizes = [64, 128], strides = [1, 1]} : vector<64x1024xbf16> to vector<64x128xbf16>
    %cst_71 = arith.constant dense<0.000000e+00> : vector<64x128xf32>
    %222 = tpu.matmul %220, %221, %cst_71 {dimension_numbers = #tpu.dot_dimension_numbers<[1], [0], [0], [1], [0, 0, 1, 1], [], []>} : vector<64x64xbf16>, vector<64x128xbf16>, vector<64x128xf32> -> vector<64x128xf32>
    %223 = arith.truncf %222 : vector<64x128xf32> to vector<64x128xbf16>
    %224 = vector.extract_strided_slice %165 {offsets = [256, 0], sizes = [128, 32], strides = [1, 1]} : vector<1024x32xbf16> to vector<128x32xbf16>
    %cst_72 = arith.constant dense<0.000000e+00> : vector<64x32xf32>
    %225 = tpu.matmul %223, %224, %cst_72 {dimension_numbers = #tpu.dot_dimension_numbers<[1], [0], [0], [1], [0, 0, 1, 1], [], []>} : vector<64x128xbf16>, vector<128x32xbf16>, vector<64x32xf32> -> vector<64x32xf32>
    %226 = arith.addf %206, %225 : vector<64x32xf32>
    %227 = vector.extract_strided_slice %162 {offsets = [0, 384], sizes = [64, 128], strides = [1, 1]} : vector<64x1024xbf16> to vector<64x128xbf16>
    %228 = vector.extract_strided_slice %163 {offsets = [0, 384], sizes = [64, 128], strides = [1, 1]} : vector<64x1024xbf16> to vector<64x128xbf16>
    %cst_73 = arith.constant dense<0.000000e+00> : vector<64x64xf32>
    %229 = tpu.matmul %227, %228, %cst_73 {dimension_numbers = #tpu.dot_dimension_numbers<[1], [1], [0], [0], [0, 0, 1, 0], [], []>} : vector<64x128xbf16>, vector<64x128xbf16>, vector<64x64xf32> -> vector<64x64xf32>
    %cst_74 = arith.constant dense<0xFF800000> : vector<64xf32>
    %230 = vector.multi_reduction <maximumf>, %229, %cst_74 [1] : vector<64x64xf32> to vector<64xf32>
    %231 = vector.shape_cast %230 : vector<64xf32> to vector<64x1xf32>
    %232 = vector.broadcast %231 : vector<64x1xf32> to vector<64x64xf32>
    %233 = arith.subf %229, %232 : vector<64x64xf32>
    %234 = math.exp %233 : vector<64x64xf32>
    %cst_75 = arith.constant dense<0.000000e+00> : vector<64xf32>
    %235 = vector.multi_reduction <add>, %234, %cst_75 [1] : vector<64x64xf32> to vector<64xf32>
    %236 = vector.shape_cast %235 : vector<64xf32> to vector<64x1xf32>
    %237 = tpu.reciprocal %236 {approx = true} : vector<64x1xf32> -> vector<64x1xf32>
    %238 = vector.broadcast %237 : vector<64x1xf32> to vector<64x64xf32>
    %239 = arith.mulf %234, %238 : vector<64x64xf32>
    %240 = arith.truncf %239 : vector<64x64xf32> to vector<64x64xbf16>
    %241 = vector.extract_strided_slice %164 {offsets = [0, 384], sizes = [64, 128], strides = [1, 1]} : vector<64x1024xbf16> to vector<64x128xbf16>
    %cst_76 = arith.constant dense<0.000000e+00> : vector<64x128xf32>
    %242 = tpu.matmul %240, %241, %cst_76 {dimension_numbers = #tpu.dot_dimension_numbers<[1], [0], [0], [1], [0, 0, 1, 1], [], []>} : vector<64x64xbf16>, vector<64x128xbf16>, vector<64x128xf32> -> vector<64x128xf32>
    %243 = arith.truncf %242 : vector<64x128xf32> to vector<64x128xbf16>
    %244 = vector.extract_strided_slice %165 {offsets = [384, 0], sizes = [128, 32], strides = [1, 1]} : vector<1024x32xbf16> to vector<128x32xbf16>
    %cst_77 = arith.constant dense<0.000000e+00> : vector<64x32xf32>
    %245 = tpu.matmul %243, %244, %cst_77 {dimension_numbers = #tpu.dot_dimension_numbers<[1], [0], [0], [1], [0, 0, 1, 1], [], []>} : vector<64x128xbf16>, vector<128x32xbf16>, vector<64x32xf32> -> vector<64x32xf32>
    %246 = arith.addf %226, %245 : vector<64x32xf32>
    %247 = vector.extract_strided_slice %162 {offsets = [0, 512], sizes = [64, 128], strides = [1, 1]} : vector<64x1024xbf16> to vector<64x128xbf16>
    %248 = vector.extract_strided_slice %163 {offsets = [0, 512], sizes = [64, 128], strides = [1, 1]} : vector<64x1024xbf16> to vector<64x128xbf16>
    %cst_78 = arith.constant dense<0.000000e+00> : vector<64x64xf32>
    %249 = tpu.matmul %247, %248, %cst_78 {dimension_numbers = #tpu.dot_dimension_numbers<[1], [1], [0], [0], [0, 0, 1, 0], [], []>} : vector<64x128xbf16>, vector<64x128xbf16>, vector<64x64xf32> -> vector<64x64xf32>
    %cst_79 = arith.constant dense<0xFF800000> : vector<64xf32>
    %250 = vector.multi_reduction <maximumf>, %249, %cst_79 [1] : vector<64x64xf32> to vector<64xf32>
    %251 = vector.shape_cast %250 : vector<64xf32> to vector<64x1xf32>
    %252 = vector.broadcast %251 : vector<64x1xf32> to vector<64x64xf32>
    %253 = arith.subf %249, %252 : vector<64x64xf32>
    %254 = math.exp %253 : vector<64x64xf32>
    %cst_80 = arith.constant dense<0.000000e+00> : vector<64xf32>
    %255 = vector.multi_reduction <add>, %254, %cst_80 [1] : vector<64x64xf32> to vector<64xf32>
    %256 = vector.shape_cast %255 : vector<64xf32> to vector<64x1xf32>
    %257 = tpu.reciprocal %256 {approx = true} : vector<64x1xf32> -> vector<64x1xf32>
    %258 = vector.broadcast %257 : vector<64x1xf32> to vector<64x64xf32>
    %259 = arith.mulf %254, %258 : vector<64x64xf32>
    %260 = arith.truncf %259 : vector<64x64xf32> to vector<64x64xbf16>
    %261 = vector.extract_strided_slice %164 {offsets = [0, 512], sizes = [64, 128], strides = [1, 1]} : vector<64x1024xbf16> to vector<64x128xbf16>
    %cst_81 = arith.constant dense<0.000000e+00> : vector<64x128xf32>
    %262 = tpu.matmul %260, %261, %cst_81 {dimension_numbers = #tpu.dot_dimension_numbers<[1], [0], [0], [1], [0, 0, 1, 1], [], []>} : vector<64x64xbf16>, vector<64x128xbf16>, vector<64x128xf32> -> vector<64x128xf32>
    %263 = arith.truncf %262 : vector<64x128xf32> to vector<64x128xbf16>
    %264 = vector.extract_strided_slice %165 {offsets = [512, 0], sizes = [128, 32], strides = [1, 1]} : vector<1024x32xbf16> to vector<128x32xbf16>
    %cst_82 = arith.constant dense<0.000000e+00> : vector<64x32xf32>
    %265 = tpu.matmul %263, %264, %cst_82 {dimension_numbers = #tpu.dot_dimension_numbers<[1], [0], [0], [1], [0, 0, 1, 1], [], []>} : vector<64x128xbf16>, vector<128x32xbf16>, vector<64x32xf32> -> vector<64x32xf32>
    %266 = arith.addf %246, %265 : vector<64x32xf32>
    %267 = vector.extract_strided_slice %162 {offsets = [0, 640], sizes = [64, 128], strides = [1, 1]} : vector<64x1024xbf16> to vector<64x128xbf16>
    %268 = vector.extract_strided_slice %163 {offsets = [0, 640], sizes = [64, 128], strides = [1, 1]} : vector<64x1024xbf16> to vector<64x128xbf16>
    %cst_83 = arith.constant dense<0.000000e+00> : vector<64x64xf32>
    %269 = tpu.matmul %267, %268, %cst_83 {dimension_numbers = #tpu.dot_dimension_numbers<[1], [1], [0], [0], [0, 0, 1, 0], [], []>} : vector<64x128xbf16>, vector<64x128xbf16>, vector<64x64xf32> -> vector<64x64xf32>
    %cst_84 = arith.constant dense<0xFF800000> : vector<64xf32>
    %270 = vector.multi_reduction <maximumf>, %269, %cst_84 [1] : vector<64x64xf32> to vector<64xf32>
    %271 = vector.shape_cast %270 : vector<64xf32> to vector<64x1xf32>
    %272 = vector.broadcast %271 : vector<64x1xf32> to vector<64x64xf32>
    %273 = arith.subf %269, %272 : vector<64x64xf32>
    %274 = math.exp %273 : vector<64x64xf32>
    %cst_85 = arith.constant dense<0.000000e+00> : vector<64xf32>
    %275 = vector.multi_reduction <add>, %274, %cst_85 [1] : vector<64x64xf32> to vector<64xf32>
    %276 = vector.shape_cast %275 : vector<64xf32> to vector<64x1xf32>
    %277 = tpu.reciprocal %276 {approx = true} : vector<64x1xf32> -> vector<64x1xf32>
    %278 = vector.broadcast %277 : vector<64x1xf32> to vector<64x64xf32>
    %279 = arith.mulf %274, %278 : vector<64x64xf32>
    %280 = arith.truncf %279 : vector<64x64xf32> to vector<64x64xbf16>
    %281 = vector.extract_strided_slice %164 {offsets = [0, 640], sizes = [64, 128], strides = [1, 1]} : vector<64x1024xbf16> to vector<64x128xbf16>
    %cst_86 = arith.constant dense<0.000000e+00> : vector<64x128xf32>
    %282 = tpu.matmul %280, %281, %cst_86 {dimension_numbers = #tpu.dot_dimension_numbers<[1], [0], [0], [1], [0, 0, 1, 1], [], []>} : vector<64x64xbf16>, vector<64x128xbf16>, vector<64x128xf32> -> vector<64x128xf32>
    %283 = arith.truncf %282 : vector<64x128xf32> to vector<64x128xbf16>
    %284 = vector.extract_strided_slice %165 {offsets = [640, 0], sizes = [128, 32], strides = [1, 1]} : vector<1024x32xbf16> to vector<128x32xbf16>
    %cst_87 = arith.constant dense<0.000000e+00> : vector<64x32xf32>
    %285 = tpu.matmul %283, %284, %cst_87 {dimension_numbers = #tpu.dot_dimension_numbers<[1], [0], [0], [1], [0, 0, 1, 1], [], []>} : vector<64x128xbf16>, vector<128x32xbf16>, vector<64x32xf32> -> vector<64x32xf32>
    %286 = arith.addf %266, %285 : vector<64x32xf32>
    %287 = vector.extract_strided_slice %162 {offsets = [0, 768], sizes = [64, 128], strides = [1, 1]} : vector<64x1024xbf16> to vector<64x128xbf16>
    %288 = vector.extract_strided_slice %163 {offsets = [0, 768], sizes = [64, 128], strides = [1, 1]} : vector<64x1024xbf16> to vector<64x128xbf16>
    %cst_88 = arith.constant dense<0.000000e+00> : vector<64x64xf32>
    %289 = tpu.matmul %287, %288, %cst_88 {dimension_numbers = #tpu.dot_dimension_numbers<[1], [1], [0], [0], [0, 0, 1, 0], [], []>} : vector<64x128xbf16>, vector<64x128xbf16>, vector<64x64xf32> -> vector<64x64xf32>
    %cst_89 = arith.constant dense<0xFF800000> : vector<64xf32>
    %290 = vector.multi_reduction <maximumf>, %289, %cst_89 [1] : vector<64x64xf32> to vector<64xf32>
    %291 = vector.shape_cast %290 : vector<64xf32> to vector<64x1xf32>
    %292 = vector.broadcast %291 : vector<64x1xf32> to vector<64x64xf32>
    %293 = arith.subf %289, %292 : vector<64x64xf32>
    %294 = math.exp %293 : vector<64x64xf32>
    %cst_90 = arith.constant dense<0.000000e+00> : vector<64xf32>
    %295 = vector.multi_reduction <add>, %294, %cst_90 [1] : vector<64x64xf32> to vector<64xf32>
    %296 = vector.shape_cast %295 : vector<64xf32> to vector<64x1xf32>
    %297 = tpu.reciprocal %296 {approx = true} : vector<64x1xf32> -> vector<64x1xf32>
    %298 = vector.broadcast %297 : vector<64x1xf32> to vector<64x64xf32>
    %299 = arith.mulf %294, %298 : vector<64x64xf32>
    %300 = arith.truncf %299 : vector<64x64xf32> to vector<64x64xbf16>
    %301 = vector.extract_strided_slice %164 {offsets = [0, 768], sizes = [64, 128], strides = [1, 1]} : vector<64x1024xbf16> to vector<64x128xbf16>
    %cst_91 = arith.constant dense<0.000000e+00> : vector<64x128xf32>
    %302 = tpu.matmul %300, %301, %cst_91 {dimension_numbers = #tpu.dot_dimension_numbers<[1], [0], [0], [1], [0, 0, 1, 1], [], []>} : vector<64x64xbf16>, vector<64x128xbf16>, vector<64x128xf32> -> vector<64x128xf32>
    %303 = arith.truncf %302 : vector<64x128xf32> to vector<64x128xbf16>
    %304 = vector.extract_strided_slice %165 {offsets = [768, 0], sizes = [128, 32], strides = [1, 1]} : vector<1024x32xbf16> to vector<128x32xbf16>
    %cst_92 = arith.constant dense<0.000000e+00> : vector<64x32xf32>
    %305 = tpu.matmul %303, %304, %cst_92 {dimension_numbers = #tpu.dot_dimension_numbers<[1], [0], [0], [1], [0, 0, 1, 1], [], []>} : vector<64x128xbf16>, vector<128x32xbf16>, vector<64x32xf32> -> vector<64x32xf32>
    %306 = arith.addf %286, %305 : vector<64x32xf32>
    %307 = vector.extract_strided_slice %162 {offsets = [0, 896], sizes = [64, 128], strides = [1, 1]} : vector<64x1024xbf16> to vector<64x128xbf16>
    %308 = vector.extract_strided_slice %163 {offsets = [0, 896], sizes = [64, 128], strides = [1, 1]} : vector<64x1024xbf16> to vector<64x128xbf16>
    %cst_93 = arith.constant dense<0.000000e+00> : vector<64x64xf32>
    %309 = tpu.matmul %307, %308, %cst_93 {dimension_numbers = #tpu.dot_dimension_numbers<[1], [1], [0], [0], [0, 0, 1, 0], [], []>} : vector<64x128xbf16>, vector<64x128xbf16>, vector<64x64xf32> -> vector<64x64xf32>
    %cst_94 = arith.constant dense<0xFF800000> : vector<64xf32>
    %310 = vector.multi_reduction <maximumf>, %309, %cst_94 [1] : vector<64x64xf32> to vector<64xf32>
    %311 = vector.shape_cast %310 : vector<64xf32> to vector<64x1xf32>
    %312 = vector.broadcast %311 : vector<64x1xf32> to vector<64x64xf32>
    %313 = arith.subf %309, %312 : vector<64x64xf32>
    %314 = math.exp %313 : vector<64x64xf32>
    %cst_95 = arith.constant dense<0.000000e+00> : vector<64xf32>
    %315 = vector.multi_reduction <add>, %314, %cst_95 [1] : vector<64x64xf32> to vector<64xf32>
    %316 = vector.shape_cast %315 : vector<64xf32> to vector<64x1xf32>
    %317 = tpu.reciprocal %316 {approx = true} : vector<64x1xf32> -> vector<64x1xf32>
    %318 = vector.broadcast %317 : vector<64x1xf32> to vector<64x64xf32>
    %319 = arith.mulf %314, %318 : vector<64x64xf32>
    %320 = arith.truncf %319 : vector<64x64xf32> to vector<64x64xbf16>
    %321 = vector.extract_strided_slice %164 {offsets = [0, 896], sizes = [64, 128], strides = [1, 1]} : vector<64x1024xbf16> to vector<64x128xbf16>
    %cst_96 = arith.constant dense<0.000000e+00> : vector<64x128xf32>
    %322 = tpu.matmul %320, %321, %cst_96 {dimension_numbers = #tpu.dot_dimension_numbers<[1], [0], [0], [1], [0, 0, 1, 1], [], []>} : vector<64x64xbf16>, vector<64x128xbf16>, vector<64x128xf32> -> vector<64x128xf32>
    %323 = arith.truncf %322 : vector<64x128xf32> to vector<64x128xbf16>
    %324 = vector.extract_strided_slice %165 {offsets = [896, 0], sizes = [128, 32], strides = [1, 1]} : vector<1024x32xbf16> to vector<128x32xbf16>
    %cst_97 = arith.constant dense<0.000000e+00> : vector<64x32xf32>
    %325 = tpu.matmul %323, %324, %cst_97 {dimension_numbers = #tpu.dot_dimension_numbers<[1], [0], [0], [1], [0, 0, 1, 1], [], []>} : vector<64x128xbf16>, vector<128x32xbf16>, vector<64x32xf32> -> vector<64x32xf32>
    %326 = arith.addf %306, %325 : vector<64x32xf32>
    %327 = arith.addf %133, %326 : vector<64x32xf32>
    %328 = vector.extract_strided_slice %0 {offsets = [8, 0], sizes = [1, 32], strides = [1, 1]} : vector<12x32xf32> to vector<1x32xf32>
    %329 = vector.broadcast %328 : vector<1x32xf32> to vector<64x32xf32>
    %330 = arith.addf %327, %329 : vector<64x32xf32>
    %331 = vector.extract_strided_slice %0 {offsets = [9, 0], sizes = [1, 32], strides = [1, 1]} : vector<12x32xf32> to vector<1x32xf32>
    %332 = vector.extract_strided_slice %0 {offsets = [10, 0], sizes = [1, 32], strides = [1, 1]} : vector<12x32xf32> to vector<1x32xf32>
    %c0_98 = arith.constant 0 : index
    %c0_99 = arith.constant 0 : index
    %333 = vector.load %arg10[%c0_98, %c0_99] : memref<32x256xbf16, #tpu.memory_space<vmem>>, vector<32x256xbf16>
    %334 = vector.extract_strided_slice %2 {offsets = [1, 0], sizes = [1, 256], strides = [1, 1]} : vector<2x256xf32> to vector<1x256xf32>
    %c0_100 = arith.constant 0 : index
    %c0_101 = arith.constant 0 : index
    %335 = vector.load %arg11[%c0_100, %c0_101] : memref<128x32xbf16, #tpu.memory_space<vmem>>, vector<128x32xbf16>
    %336 = vector.extract_strided_slice %0 {offsets = [11, 0], sizes = [1, 32], strides = [1, 1]} : vector<12x32xf32> to vector<1x32xf32>
    %cst_102 = arith.constant dense<0.000000e+00> : vector<64xf32>
    %337 = vector.multi_reduction <add>, %330, %cst_102 [1] : vector<64x32xf32> to vector<64xf32>
    %338 = vector.shape_cast %337 : vector<64xf32> to vector<64x1xf32>
    %cst_103 = arith.constant 3.200000e+01 : f32
    %339 = vector.broadcast %cst_103 : f32 to vector<64x1xf32>
    %340 = arith.divf %338, %339 : vector<64x1xf32>
    %341 = vector.broadcast %340 : vector<64x1xf32> to vector<64x32xf32>
    %342 = arith.subf %330, %341 : vector<64x32xf32>
    %343 = arith.mulf %342, %342 : vector<64x32xf32>
    %cst_104 = arith.constant dense<0.000000e+00> : vector<64xf32>
    %344 = vector.multi_reduction <add>, %343, %cst_104 [1] : vector<64x32xf32> to vector<64xf32>
    %345 = vector.shape_cast %344 : vector<64xf32> to vector<64x1xf32>
    %cst_105 = arith.constant 3.200000e+01 : f32
    %346 = vector.broadcast %cst_105 : f32 to vector<64x1xf32>
    %347 = arith.divf %345, %346 : vector<64x1xf32>
    %348 = vector.broadcast %340 : vector<64x1xf32> to vector<64x32xf32>
    %349 = arith.subf %330, %348 : vector<64x32xf32>
    %cst_106 = arith.constant 9.99999974E-6 : f32
    %350 = vector.broadcast %cst_106 : f32 to vector<64x1xf32>
    %351 = arith.addf %347, %350 : vector<64x1xf32>
    %352 = math.rsqrt %351 : vector<64x1xf32>
    %353 = vector.broadcast %352 : vector<64x1xf32> to vector<64x32xf32>
    %354 = arith.mulf %349, %353 : vector<64x32xf32>
    %355 = vector.broadcast %331 : vector<1x32xf32> to vector<64x32xf32>
    %356 = arith.mulf %354, %355 : vector<64x32xf32>
    %357 = vector.broadcast %332 : vector<1x32xf32> to vector<64x32xf32>
    %358 = arith.addf %356, %357 : vector<64x32xf32>
    %359 = arith.truncf %358 : vector<64x32xf32> to vector<64x32xbf16>
    %cst_107 = arith.constant dense<0.000000e+00> : vector<64x256xf32>
    %360 = tpu.matmul %359, %333, %cst_107 {dimension_numbers = #tpu.dot_dimension_numbers<[1], [0], [0], [1], [0, 0, 1, 1], [], []>} : vector<64x32xbf16>, vector<32x256xbf16>, vector<64x256xf32> -> vector<64x256xf32>
    %361 = vector.broadcast %334 : vector<1x256xf32> to vector<64x256xf32>
    %362 = arith.addf %360, %361 : vector<64x256xf32>
    %363 = vector.extract_strided_slice %362 {offsets = [0, 0], sizes = [64, 128], strides = [1, 1]} : vector<64x256xf32> to vector<64x128xf32>
    %364 = vector.extract_strided_slice %362 {offsets = [0, 128], sizes = [64, 128], strides = [1, 1]} : vector<64x256xf32> to vector<64x128xf32>
    %cst_108 = arith.constant 5.000000e-01 : f32
    %365 = vector.broadcast %cst_108 : f32 to vector<64x128xf32>
    %366 = arith.mulf %365, %364 : vector<64x128xf32>
    %cst_109 = arith.constant 0.707106769 : f32
    %367 = vector.broadcast %cst_109 : f32 to vector<64x128xf32>
    %368 = arith.mulf %364, %367 : vector<64x128xf32>
    %369 = math.erf %368 : vector<64x128xf32>
    %cst_110 = arith.constant 1.000000e+00 : f32
    %370 = vector.broadcast %cst_110 : f32 to vector<64x128xf32>
    %371 = arith.addf %370, %369 : vector<64x128xf32>
    %372 = arith.mulf %366, %371 : vector<64x128xf32>
    %373 = arith.mulf %363, %372 : vector<64x128xf32>
    %374 = arith.truncf %373 : vector<64x128xf32> to vector<64x128xbf16>
    %cst_111 = arith.constant dense<0.000000e+00> : vector<64x32xf32>
    %375 = tpu.matmul %374, %335, %cst_111 {dimension_numbers = #tpu.dot_dimension_numbers<[1], [0], [0], [1], [0, 0, 1, 1], [], []>} : vector<64x128xbf16>, vector<128x32xbf16>, vector<64x32xf32> -> vector<64x32xf32>
    %376 = vector.broadcast %336 : vector<1x32xf32> to vector<64x32xf32>
    %377 = arith.addf %375, %376 : vector<64x32xf32>
    %378 = arith.addf %330, %377 : vector<64x32xf32>
    %c0_112 = arith.constant 0 : index
    %c0_113 = arith.constant 0 : index
    %c0_114 = arith.constant 0 : index
    %379 = vector.load %arg15[%c0_112, %c0_113, %c0_114] : memref<1x64x32xf32, #tpu.memory_space<vmem>>, vector<1x64x32xf32>
    %380 = vector.shape_cast %379 : vector<1x64x32xf32> to vector<64x32xf32>
    %381 = vector.shape_cast %378 : vector<64x32xf32> to vector<1x64x32xf32>
    tpu.vector_store %arg15[%c0_112, %c0_113, %c0_114], %381 {strides = array<i32>} : memref<1x64x32xf32, #tpu.memory_space<vmem>>, vector<1x64x32xf32>,
    return
  }
  func.func @transform_0(%arg0: i32) -> (i32, i32, i32) {
    %c0_i32 = arith.constant 0 : i32
    %c0_i32_0 = arith.constant 0 : i32
    %c0_i32_1 = arith.constant 0 : i32
    return %arg0, %c0_i32, %c0_i32_0 : i32, i32, i32
  }
  func.func @transform_1(%arg0: i32) -> (i32, i32) {
    %c0_i32 = arith.constant 0 : i32
    %c0_i32_0 = arith.constant 0 : i32
    %c0_i32_1 = arith.constant 0 : i32
    return %c0_i32, %c0_i32_0 : i32, i32
  }
  func.func @transform_2(%arg0: i32) -> (i32, i32) {
    %c0_i32 = arith.constant 0 : i32
    %c0_i32_0 = arith.constant 0 : i32
    %c0_i32_1 = arith.constant 0 : i32
    return %c0_i32, %c0_i32_0 : i32, i32
  }
  func.func @transform_3(%arg0: i32) -> (i32, i32) {
    %c0_i32 = arith.constant 0 : i32
    %c0_i32_0 = arith.constant 0 : i32
    %c0_i32_1 = arith.constant 0 : i32
    return %c0_i32, %c0_i32_0 : i32, i32
  }
  func.func @transform_4(%arg0: i32) -> (i32, i32) {
    %c0_i32 = arith.constant 0 : i32
    %c0_i32_0 = arith.constant 0 : i32
    %c0_i32_1 = arith.constant 0 : i32
    return %c0_i32, %c0_i32_0 : i32, i32
  }
  func.func @transform_5(%arg0: i32) -> (i32, i32) {
    %c0_i32 = arith.constant 0 : i32
    %c0_i32_0 = arith.constant 0 : i32
    %c0_i32_1 = arith.constant 0 : i32
    return %c0_i32, %c0_i32_0 : i32, i32
  }
  func.func @transform_6(%arg0: i32) -> (i32, i32) {
    %c0_i32 = arith.constant 0 : i32
    %c0_i32_0 = arith.constant 0 : i32
    %c0_i32_1 = arith.constant 0 : i32
    return %c0_i32, %c0_i32_0 : i32, i32
  }
  func.func @transform_7(%arg0: i32) -> (i32, i32) {
    %c0_i32 = arith.constant 0 : i32
    %c0_i32_0 = arith.constant 0 : i32
    %c0_i32_1 = arith.constant 0 : i32
    return %c0_i32, %c0_i32_0 : i32, i32
  }
  func.func @transform_8(%arg0: i32) -> (i32, i32) {
    %c0_i32 = arith.constant 0 : i32
    %c0_i32_0 = arith.constant 0 : i32
    %c0_i32_1 = arith.constant 0 : i32
    return %c0_i32, %c0_i32_0 : i32, i32
  }
  func.func @transform_9(%arg0: i32) -> (i32, i32) {
    %c0_i32 = arith.constant 0 : i32
    %c0_i32_0 = arith.constant 0 : i32
    %c0_i32_1 = arith.constant 0 : i32
    return %c0_i32, %c0_i32_0 : i32, i32
  }
  func.func @transform_10(%arg0: i32) -> (i32, i32) {
    %c0_i32 = arith.constant 0 : i32
    %c0_i32_0 = arith.constant 0 : i32
    %c0_i32_1 = arith.constant 0 : i32
    return %c0_i32, %c0_i32_0 : i32, i32
  }
  func.func @transform_11(%arg0: i32) -> (i32, i32) {
    %c0_i32 = arith.constant 0 : i32
    %c0_i32_0 = arith.constant 0 : i32
    %c0_i32_1 = arith.constant 0 : i32
    return %c0_i32, %c0_i32_0 : i32, i32
  }
  func.func @transform_12(%arg0: i32) -> (i32, i32) {
    %c0_i32 = arith.constant 0 : i32
    %c0_i32_0 = arith.constant 0 : i32
    %c0_i32_1 = arith.constant 0 : i32
    return %c0_i32, %c0_i32_0 : i32, i32
  }
  func.func @transform_13(%arg0: i32) -> (i32, i32) {
    %c0_i32 = arith.constant 0 : i32
    %c0_i32_0 = arith.constant 0 : i32
    %c0_i32_1 = arith.constant 0 : i32
    return %c0_i32, %c0_i32_0 : i32, i32
  }
  func.func @transform_14(%arg0: i32) -> (i32, i32, i32) {
    %c0_i32 = arith.constant 0 : i32
    %c0_i32_0 = arith.constant 0 : i32
    %c0_i32_1 = arith.constant 0 : i32
    return %arg0, %c0_i32, %c0_i32_0 : i32, i32, i32
  }
}

</mosaic_0001>

<bundles_post_ra>
// kernel: tpu_custom_call.1
= control target key start
LH: loop header
LB: loop body
LE: loop exit
PB: predicated region body
PF: predicated region fallthrough
CT: control target
= control target key end

     0   :  { %s8304_s29 = smov 0   ;;  %s10524_s0 = inlined_call_operand.vmem [shape: f32[2,8,4], index: 0, kind: input, shape index: {}]   ;;  %s10525_s1 = inlined_call_operand.vmem [shape: f32[64,32], index: 1, kind: input, shape index: {}]   ;;  %s10526_s2 = inlined_call_operand.vmem [shape: bf16[32,128], index: 2, kind: input, shape index: {}]   ;;  %s10527_s3 = inlined_call_operand.vmem [shape: bf16[4,256], index: 3, kind: input, shape index: {}]   ;;  %s10528_s4 = inlined_call_operand.vmem [shape: bf16[128,32], index: 4, kind: input, shape index: {}]   ;;  %s10529_s5 = inlined_call_operand.vmem [shape: bf16[32,256], index: 5, kind: input, shape index: {}]   ;;  %s10530_s6 = inlined_call_operand.vmem [shape: bf16[128,32], index: 6, kind: input, shape index: {}]   ;;  %s10531_s7 = inlined_call_operand.vmem [shape: bf16[32,3072], index: 7, kind: input, shape index: {}]   ;;  %s10532_s8 = inlined_call_operand.vmem [shape: bf16[1024,32], index: 8, kind: input, shape index: {}]   ;;  %s10533_s9 = inlined_call_operand.vmem [shape: bf16[32,256], index: 9, kind: input, shape index: {}]   ;;  %s10534_s10 = inlined_call_operand.vmem [shape: bf16[128,32], index: 10, kind: input, shape index: {}]   ;;  %s10535_s11 = inlined_call_operand.vmem [shape: f32[12,32], index: 11, kind: input, shape index: {}]   ;;  %s10536_s12 = inlined_call_operand.vmem [shape: f32[2,4], index: 12, kind: input, shape index: {}]   ;;  %s10537_s13 = inlined_call_operand.vmem [shape: f32[2,256], index: 13, kind: input, shape index: {}]   ;;  %s10538_s14 = inlined_call_operand.vmem [shape: f32[2,64,32], index: 14, kind: output, shape index: {}]  }
   0x1 LB: > { %s6568_s30 = sadd.s32 4294967295, %s8226_s29   ;;  %p6572_p0 = scmp.ge.s32.totalorder %s8226_s29, 1  ;;  %s8226_s29 = sphi %s8304_s29, %s24_s29  }
   0x2   : > { %p411_p1 = scmp.lt.s32.totalorder %s8226_s29, 3 }
   0x4   : > { %p412_p2 = pnand %p6572_p0, %p411_p1 }
   0x6   : > { %415 = sbr.rel (%p412_p2) target bundleno = 7057 (0x1b91), region = 76 }
   0xd   : > { %v471_v0 = vld [vmem:[%s10525_s1 + $0x8] sm:$0xff]  ;;  %vm479_vm0 = vcmask 261120   ;;  %v470_v1 = vld [vmem:[%s10525_s1] sm:$0xff]  ;;  %v472_v2 = vld [vmem:[%s10525_s1 + $0x10] sm:$0xff]  ;;  %p456_p3 = scmp.lt.s32.totalorder %s6568_s30, 1  ;;  %vm609_vm1 = vcmask 31744  }
   0xe   : > { %v483_v3 = vsel %vm479_vm0, %v471_v0, 0.0  ;;  %v480_v4 = vsel %vm479_vm0, %v470_v1, 0.0  ;;  %v474_v5 = vld [vmem:[%s10525_s1 + $0x20] sm:$0xff]  ;;  %v486_v6 = vsel %vm479_vm0, %v472_v2, 0.0  ;;  %v473_v7 = vld [vmem:[%s10525_s1 + $0x18] sm:$0xff]  ;;  %v476_v11 = vld [vmem:[%s10525_s1 + $0x30] sm:$0xff] }
   0xf   : > { %484 = vadd.xlane.f32.xlu1 %v483_v3  ;;  %481 = vadd.xlane.f32.xlu0 %v480_v4  ;;  %s10818_s30 = smov (!%p456_p3, %s6568_s30), 1  ;;  %v492_v8 = vsel %vm479_vm0, %v474_v5, 0.0  ;;  %v489_v10 = vsel %vm479_vm0, %v473_v7, 0.0  ;;  %v475_v12 = vld [vmem:[%s10525_s1 + $0x28] sm:$0xff]  ;;  %v477_v13 = vld [vmem:[%s10525_s1 + $0x38] sm:$0xff]  ;;  %v498_v15 = vsel %vm479_vm0, %v476_v11, 0.0 }
  0x10   : > { %s6573_s25 = sshll.u32 %s10818_s30, 3  ;;  %v495_v16 = vsel %vm479_vm0, %v475_v12, 0.0  ;;  %v501_v17 = vsel %vm479_vm0, %v477_v13, 0.0  ;;  %vm749_vm2 = vcmask 1041408   ;;  %v10539_v4 = vmov 0   ;;  %s6823_s21 = sshll.u32 %s10818_s30, 6 }
  0x11   : > { %s459_s28 = scalar_lea.vmem %s10524_s0, %s6573_s25  ;;  %v6582_v63 = vld.sshfl [vmem:[%s10527_s3] sm:$0x33 pattern:$0x76325410]  ;;  %788 = vmatprep.mubr.bf16.mxu1 %v10539_v4  ;;  %vm985_vm3 = vcmask 1043456   ;;  %vm880_vm4 = vcmask 64512   ;;  %s464_s24 = scalar_lea.vmem %s10538_s14, %s6823_s21 }
  0x12   : > { %v478_v9 = vld [vmem:[%s459_s28] sm:$0xff]  ;;  %v751_v3 = vsel %vm749_vm2, %v6582_v63, 0  ;;  %vm3241_vm5 = vcmask 523264  }
  0x13   : > { %487 = vadd.xlane.f32.xlu1 %v486_v6  ;;  %v610_v14 = vsel %vm609_vm1, %v478_v9, 0.0 }
  0x14   : > { %611 = vadd.xlane.f32.xlu0 %v610_v14 }
  0x17   : > { %493 = vadd.xlane.f32.xlu1 %v492_v8 }
  0x18   : > { %490 = vadd.xlane.f32.xlu0 %v489_v10 }
  0x1b   : > { %499 = vadd.xlane.f32.xlu1 %v498_v15 }
  0x1c   : > { %496 = vadd.xlane.f32.xlu0 %v495_v16 }
  0x20   : > { %502 = vadd.xlane.f32.xlu0 %v501_v17 }
  0x9c   : > { %v485_v18 = vpop.xlane.xlu1 %484  ;;  %v482_v19 = vpop.xlane.xlu0 %481 }
  0x9d   : > { %v506_v20 = vmul.f32 0.03125, %v485_v18  ;;  %v505_v21 = vmul.f32 0.03125, %v482_v19 }
  0x9f   : > { %v8351_v22 = vsub.f32 %v471_v0, %v506_v20  ;;  %v8353_v23 = vsub.f32 %v470_v1, %v505_v21  ;;  %v7722_v0 = vld [vmem:[%s10526_s2] sm:$0xff]   ;;  %v745_v1 = vcombine.high %v6582_v63, %v6582_v63 }
  0xa0   : > { %v488_v24 = vpop.xlane.xlu1 %487  ;;  %7100 = vmatprep.subr.bf16.mxu0 %v7722_v0 }
  0xa1   : > { %v507_v25 = vmul.f32 0.03125, %v488_v24  ;;  %v522_v26 = vmul.f32 %v8351_v22, %v8351_v22  ;;  %v521_v27 = vmul.f32 %v8353_v23, %v8353_v23  ;;  %v612_v28 = vpop.xlane.xlu0 %611  ;;  %6583 = vmatprep.subr.msk.bf16.mxu1 %vm749_vm2, %v745_v1  ;;  %7101 = vmatpush3.bf16.msra.mxu0 %v7722_v0 }
  0xa2   : > { %v614_v30 = vmul.f32 0.25, %v612_v28  ;;  %757 = vmatpush1.bf16.msra.mxu1 %v751_v3 }
  0xa3   : > { %v8359_v29 = vsub.f32 %v472_v2, %v507_v25  ;;  %v532_v31 = vsel %vm479_vm0, %v522_v26, 0.0  ;;  %v529_v32 = vsel %vm479_vm0, %v521_v27, 0.0  ;;  %v7723_v2 = vld [vmem:[%s10526_s2 + $0x8] sm:$0xff]   ;;  %v8414_v27 = vld [vmem:[%s10535_s11] sm:$0xff] }
  0xa4   : > { %533 = vadd.xlane.f32.xlu1 %v532_v31  ;;  %v494_v33 = vpop.xlane.xlu1 %493  ;;  %530 = vadd.xlane.f32.xlu0 %v529_v32  ;;  %v8363_v34 = vsub.f32 %v478_v9, %v614_v30  ;;  %v585_v9 = vlaneseq }
  0xa5   : > { %v509_v35 = vmul.f32 0.03125, %v494_v33  ;;  %v523_v36 = vmul.f32 %v8359_v29, %v8359_v29  ;;  %v491_v37 = vpop.xlane.xlu0 %490  ;;  %7102 = vmatprep.subr.bf16.mxu0 %v7723_v2 }
  0xa6   : > { %v508_v39 = vmul.f32 0.03125, %v491_v37  ;;  %v616_v41 = vmul.f32 %v8363_v34, %v8363_v34  ;;  %7103 = vmatpush3.bf16.msra.mxu0 %v7723_v2  ;;  %v8406_v15 = vshrl.u32 %v585_v9, 7 }
  0xa7   : > { %v8367_v38 = vsub.f32 %v474_v5, %v509_v35  ;;  %v535_v40 = vsel %vm479_vm0, %v523_v36, 0.0 }
  0xa8   : > { %v500_v42 = vpop.xlane.xlu1 %499  ;;  %536 = vadd.xlane.f32.xlu0 %v535_v40  ;;  %v8372_v43 = vsub.f32 %v473_v7, %v508_v39  ;;  %v617_v45 = vsel %vm609_vm1, %v616_v41, 0.0  ;;  %v8409_v24 = vsub.s32 0, %v8406_v15  ;;  %v8417_v30 = vsub.s32 1, %v8406_v15 }
  0xa9   : > { %v511_v44 = vmul.f32 0.03125, %v500_v42  ;;  %v525_v46 = vmul.f32 %v8367_v38, %v8367_v38  ;;  %618 = vadd.xlane.f32.xlu1 %v617_v45  ;;  %v497_v47 = vpop.xlane.xlu0 %496 }
  0xaa   : > { %v510_v49 = vmul.f32 0.03125, %v497_v47  ;;  %v524_v51 = vmul.f32 %v8372_v43, %v8372_v43  ;;  %10624 = vst [vmem:[#allocation2_spill] sm:$0xff] %v8409_v24  ;;  %10625 = vst [vmem:[#allocation3_spill] sm:$0xff] %v8417_v30  ;;  %v588_v35 = vrot.slane %v8414_v27, %v8409_v24  ;;  %v600_v42 = vrot.slane %v8414_v27, %v8417_v30 }
  0xab   : > { %v8377_v48 = vsub.f32 %v476_v11, %v511_v44  ;;  %v541_v50 = vsel %vm479_vm0, %v525_v46, 0.0  ;;  %v468_v46 = vld [vmem:[%s10536_s12] sm:$0x3] }
  0xac   : > { %542 = vadd.xlane.f32.xlu0 %v541_v50  ;;  %v8382_v52 = vsub.f32 %v475_v12, %v510_v49  ;;  %v538_v53 = vsel %vm479_vm0, %v524_v51, 0.0 }
  0xad   : > { %v527_v54 = vmul.f32 %v8377_v48, %v8377_v48  ;;  %539 = vadd.xlane.f32.xlu1 %v538_v53  ;;  %v503_v55 = vpop.xlane.xlu0 %502 }
  0xae   : > { %v512_v56 = vmul.f32 0.03125, %v503_v55  ;;  %v526_v58 = vmul.f32 %v8382_v52, %v8382_v52 }
  0xaf   : > { %v547_v57 = vsel %vm479_vm0, %v527_v54, 0.0 }
  0xb0   : > { %548 = vadd.xlane.f32.xlu0 %v547_v57  ;;  %v8390_v59 = vsub.f32 %v477_v13, %v512_v56  ;;  %v544_v60 = vsel %vm479_vm0, %v526_v58, 0.0 }
  0xb1   : > { %545 = vadd.xlane.f32.xlu1 %v544_v60  ;;  %v632_v60 = vrot.slane %v468_v46, %v8417_v30 }
  0xb2   : > { %v528_v61 = vmul.f32 %v8390_v59, %v8390_v59 }
  0xb4   : > { %v550_v62 = vsel %vm479_vm0, %v528_v61, 0.0 }
  0xb5   : > { %551 = vadd.xlane.f32.xlu1 %v550_v62 }
 0x131   : > { %v534_v5 = vpop.xlane.xlu1 %533  ;;  %v531_v6 = vpop.xlane.xlu0 %530 }
 0x132   : > { %v554_v7 = vmul.f32 0.03125, %v534_v5  ;;  %v553_v8 = vmul.f32 0.03125, %v531_v6 }
 0x134   : > { %v562_v10 = vadd.f32 1e-05, %v554_v7  ;;  %v561_v11 = vadd.f32 1e-05, %v553_v8 }
 0x135   : > { %v537_v12 = vpop.xlane.xlu0 %536 }
 0x136   : > { %7824 = vrsqrt.f32 %v562_v10  ;;  %v555_v13 = vmul.f32 0.03125, %v537_v12  ;;  %v619_v14 = vpop.xlane.xlu1 %618 }
 0x137   : > { %7826 = vrsqrt.f32 %v561_v11  ;;  %v620_v17 = vmul.f32 0.25, %v619_v14 }
 0x138   : > { %v563_v16 = vadd.f32 1e-05, %v555_v13 }
 0x139   : > { %v543_v18 = vpop.xlane.xlu0 %542  ;;  %v621_v19 = vadd.f32 1e-05, %v620_v17 }
 0x13a   : > { %7828 = vrsqrt.f32 %v563_v16  ;;  %v557_v20 = vmul.f32 0.03125, %v543_v18  ;;  %v540_v21 = vpop.xlane.xlu1 %539 }
 0x13b   : > { %7830 = vrsqrt.f32 %v621_v19  ;;  %v556_v26 = vmul.f32 0.03125, %v540_v21 }
 0x13c   : > { %v565_v25 = vadd.f32 1e-05, %v557_v20 }
 0x13d   : > { %v549_v28 = vpop.xlane.xlu0 %548  ;;  %v564_v31 = vadd.f32 1e-05, %v556_v26 }
 0x13e   : > { %7832 = vrsqrt.f32 %v565_v25  ;;  %v559_v32 = vmul.f32 0.03125, %v549_v28  ;;  %v546_v33 = vpop.xlane.xlu1 %545 }
 0x13f   : > { %7834 = vrsqrt.f32 %v564_v31  ;;  %v558_v39 = vmul.f32 0.03125, %v546_v33 }
 0x140   : > { %v7825_v36 = vpop.eup %7824  ;;  %v567_v37 = vadd.f32 1e-05, %v559_v32 }
 0x141   : > { %v7827_v40 = vpop.eup %7826  ;;  %v578_v41 = vmul.f32 %v7825_v36, %v8351_v22  ;;  %v566_v44 = vadd.f32 1e-05, %v558_v39  ;;  %v627_v22 = vrot.slane %v468_v46, %v8409_v24 }
 0x142   : > { %7836 = vrsqrt.f32 %v567_v37  ;;  %v577_v45 = vmul.f32 %v7827_v40, %v8353_v23  ;;  %v552_v47 = vpop.xlane.xlu1 %551 }
 0x143   : > { %v590_v49 = vmul.f32 %v588_v35, %v578_v41  ;;  %7838 = vrsqrt.f32 %v566_v44  ;;  %v560_v51 = vmul.f32 0.03125, %v552_v47 }
 0x144   : > { %v7829_v50 = vpop.eup %7828  ;;  %v589_v53 = vmul.f32 %v588_v35, %v577_v45 }
 0x145   : > { %v602_v54 = vadd.f32 %v600_v42, %v590_v49  ;;  %v7831_v55 = vpop.eup %7830  ;;  %v568_v56 = vadd.f32 1e-05, %v560_v51  ;;  %v579_v58 = vmul.f32 %v7829_v50, %v8359_v29 }
 0x146   : > { %v601_v57 = vadd.f32 %v600_v42, %v589_v53  ;;  %v623_v23 = vmul.f32 %v7831_v55, %v8363_v34 }
 0x147   : > { %7840 = vrsqrt.f32 %v568_v56  ;;  %v591_v1 = vmul.f32 %v588_v35, %v579_v58 }
 0x148   : > { %v7833_v61 = vpop.eup %7832  ;;  %v638_v62 = vpack.c.bf16 %v602_v54, %v601_v57  ;;  %v628_v63 = vmul.f32 %v627_v22, %v623_v23 }
 0x149   : > { %v7835_v0 = vpop.eup %7834  ;;  %v581_v5 = vmul.f32 %v7833_v61, %v8367_v38  ;;  %v603_v34 = vadd.f32 %v600_v42, %v591_v1 }
 0x14a   : > { %7104 = vmatprep.mubr.msk.bf16.mxu0 %vm479_vm0, %v638_v62  ;;  %v633_v2 = vadd.f32 %v632_v60, %v628_v63  ;;  %v580_v3 = vmul.f32 %v7835_v0, %v8372_v43 }
 0x14b   : > { %v593_v11 = vmul.f32 %v588_v35, %v581_v5 }
 0x14c   : > { %v7837_v6 = vpop.eup %7836  ;;  %v736_v7 = vpack.c.bf16 %v633_v2, %v633_v2  ;;  %v592_v29 = vmul.f32 %v588_v35, %v580_v3 }
 0x14d   : > { %v7839_v8 = vpop.eup %7838  ;;  %v583_v12 = vmul.f32 %v7837_v6, %v8377_v48  ;;  %v605_v43 = vadd.f32 %v600_v42, %v593_v11 }
 0x14e   : > { %6584 = vmatmul.mubr.msk.bf16.vlgmr.msra.gmra.mrb[0].mxu1 %vm609_vm1, %v736_v7  ;;  %v604_v9 = vadd.f32 %v600_v42, %v592_v29  ;;  %v582_v10 = vmul.f32 %v7839_v8, %v8382_v52 }
 0x14f   : > { %v595_v18 = vmul.f32 %v588_v35, %v583_v12 }
 0x150   : > { %v639_v13 = vpack.c.bf16 %v604_v9, %v603_v34  ;;  %v594_v14 = vmul.f32 %v588_v35, %v582_v10 }
 0x151   : > { %v7841_v16 = vpop.eup %7840  ;;  %v607_v21 = vadd.f32 %v600_v42, %v595_v18 }
 0x152   : > { %7105 = vmatmul.mubr.msk.bf16.vlgmr.msra.gmra.mrb[0].mxu0 %vm479_vm0, %v639_v13  ;;  %v606_v38 = vadd.f32 %v600_v42, %v594_v14  ;;  %v584_v17 = vmul.f32 %v7841_v16, %v8390_v59 }
 0x154   : > { %v640_v19 = vpack.c.bf16 %v606_v38, %v605_v43  ;;  %v596_v20 = vmul.f32 %v588_v35, %v584_v17 }
 0x156   : > { %7108 = vmatprep.mubr.msk.bf16.mxu0 %vm479_vm0, %v640_v19  ;;  %v608_v25 = vadd.f32 %v600_v42, %v596_v20 }
 0x158   : > { %v641_v52 = vpack.c.bf16 %v608_v25, %v607_v21 }
 0x15a   : > { %7109 = vmatmul.mubr.msk.bf16.gmra.mrb[4].mxu0 %vm479_vm0, %v641_v52 }
 0x221   : > { %v790_v48 = vpop.f32.mrb[0].mxu1 }
 0x222   : > { %v797_v26 = vpack.c.bf16 %v790_v48, %v790_v48  ;;  %v792_v28 = vpop.f32.mrb[1].mxu1 }
 0x223   : > { %v798_v31 = vpack.c.bf16 %v792_v28, %v792_v28  ;;  %v794_v32 = vpop.f32.mrb[2].mxu1 }
 0x224   : > { %v795_v33 = vpop.f32.mrb[3].mxu1  ;;  %7112 = vmatprep.subr.bf16.mxu1 %v797_v26 }
 0x225   : > { %v987_v36 = vsel %vm985_vm3, %v798_v31, 0  ;;  %v7106_v59 = vpop.f32.mrb[0].mxu0  ;;  %7113 = vmatpush3.bf16.xpose.msra.mxu1 %v797_v26  ;;  %7712 = vmatprep.subr.msk.bf16.mxu0 %vm985_vm3, %v798_v31 }
 0x226   : > { %v700_v35 = vpop.f32.mrb[1].mxu0  ;;  %7123 = vmatpush3.bf16.msra.mxu0 %v987_v36 }
 0x227   : > { %v7107_v37 = vpop.f32.mrb[2].mxu0 }
 0x228   : > { %v732_v39 = vpack.c.bf16 %v7107_v37, %v7106_v59  ;;  %v703_v40 = vpop.f32.mrb[3].mxu0 }
 0x229   : > { %v731_v41 = vpack.c.bf16 %v703_v40, %v700_v35 }
 0x22b   : > { %7114 = vmatprep.mubr.bf16.mxu1 %v731_v41 }
 0x22c   : > { %7115 = vmatmul.mubr.bf16.vlgmr.msra.gmra.mrb[4].mxu1 %v732_v39 }
 0x22d   : > { %v7110_v42 = vpop.f32.mrb[4].mxu0 }
 0x22e   : > { %v716_v44 = vpop.f32.mrb[5].mxu0 }
 0x22f   : > { %v7111_v45 = vpop.f32.mrb[6].mxu0 }
 0x230   : > { %v734_v46 = vpack.c.bf16 %v7111_v45, %v7110_v42  ;;  %v719_v47 = vpop.f32.mrb[7].mxu0 }
 0x231   : > { %v733_v49 = vpack.c.bf16 %v719_v47, %v716_v44  ;;  %v7725_v47 = vld [vmem:[%s10528_s4 + $0x8] sm:$0xff]  }
 0x233   : > { %7118 = vmatprep.mubr.bf16.mxu1 %v733_v49  ;;  %v7726_v49 = vld [vmem:[%s10528_s4 + $0x10] sm:$0xff]  }
 0x234   : > { %7119 = vmatmul.mubr.bf16.gmra.mrb[8].mxu1 %v734_v46  ;;  %v7724_v46 = vld [vmem:[%s10528_s4] sm:$0xff]  }
 0x235   : > { %7132 = vmatprep.subr.bf16.mxu1 %v7724_v46 }
 0x236   : > { %7133 = vmatpush3.bf16.msra.mxu1 %v7724_v46  ;;  %v8212_v46 = vld [vmem:[%s10525_s1 + $0x18] sm:$0xff] }
 0x237   : > { %7134 = vmatprep.subr.bf16.mxu1 %v7725_v47 }
 0x23a   : > { %7135 = vmatpush3.bf16.msra.mxu1 %v7725_v47 }
 0x23b   : > { %7136 = vmatprep.subr.bf16.mxu1 %v7726_v49 }
 0x23e   : > { %7137 = vmatpush3.bf16.msra.mxu1 %v7726_v49  ;;  %v8213_v49 = vld [vmem:[%s10525_s1 + $0x8] sm:$0xff] }
 0x2ff   : > { %v7116_v50 = vpop.f32.mrb[4].mxu1 }
 0x300   : > { %v849_v51 = vpop.f32.mrb[5].mxu1  ;;  %v887_v56 = vsel %vm880_vm4, %v7116_v50, -inf }
 0x301   : > { %v7117_v53 = vpop.f32.mrb[6].mxu1  ;;  %v881_v54 = vsel %vm880_vm4, %v849_v51, -inf }
 0x302   : > { %882 = vmax.xlane.f32.xlu0 %v881_v54  ;;  %v852_v22 = vpop.f32.mrb[7].mxu1  ;;  %v890_v58 = vsel %vm880_vm4, %v7117_v53, -inf  ;;  %v7730_v54 = vld [vmem:[%s10528_s4 + $0x30] sm:$0xff]  }
 0x303   : > { %v884_v55 = vsel %vm880_vm4, %v852_v22, -inf }
 0x304   : > { %885 = vmax.xlane.f32.xlu1 %v884_v55 }
 0x306   : > { %888 = vmax.xlane.f32.xlu0 %v887_v56 }
 0x307   : > { %v7120_v57 = vpop.f32.mrb[8].mxu1 }
 0x308   : > { %891 = vmax.xlane.f32.xlu1 %v890_v58  ;;  %v865_v23 = vpop.f32.mrb[9].mxu1  ;;  %v899_v0 = vsel %vm880_vm4, %v7120_v57, -inf }
 0x309   : > { %v7121_v60 = vpop.f32.mrb[10].mxu1  ;;  %v893_v61 = vsel %vm880_vm4, %v865_v23, -inf }
 0x30a   : > { %894 = vmax.xlane.f32.xlu0 %v893_v61  ;;  %v868_v62 = vpop.f32.mrb[11].mxu1  ;;  %v902_v1 = vsel %vm880_vm4, %v7121_v60, -inf }
 0x30b   : > { %v896_v63 = vsel %vm880_vm4, %v868_v62, -inf }
 0x30c   : > { %897 = vmax.xlane.f32.xlu1 %v896_v63 }
 0x30e   : > { %900 = vmax.xlane.f32.xlu0 %v899_v0 }
 0x310   : > { %903 = vmax.xlane.f32.xlu1 %v902_v1 }
 0x38f   : > { %v883_v2 = vpop.xlane.xlu0 %882 }
 0x390   : > { %v905_v3 = vsub.f32 %v849_v51, %v883_v2  ;;  %v7728_v51 = vld [vmem:[%s10528_s4 + $0x20] sm:$0xff]  }
 0x391   : > { %v886_v5 = vpop.xlane.xlu1 %885 }
 0x392   : > { %v913_v6 = vmul.f32 1.442695, %v905_v3  ;;  %v906_v7 = vsub.f32 %v852_v22, %v886_v5 }
 0x393   : > { %v889_v29 = vpop.xlane.xlu0 %888 }
 0x394   : > { %7842 = vpow2.f32 %v913_v6  ;;  %v915_v8 = vmul.f32 1.442695, %v906_v7  ;;  %v907_v34 = vsub.f32 %v7116_v50, %v889_v29  ;;  %v7727_v50 = vld [vmem:[%s10528_s4 + $0x18] sm:$0xff]  }
 0x395   : > { %v892_v9 = vpop.xlane.xlu1 %891  ;;  %7138 = vmatprep.subr.bf16.mxu1 %v7727_v50 }
 0x396   : > { %7844 = vpow2.f32 %v915_v8  ;;  %v917_v10 = vmul.f32 1.442695, %v907_v34  ;;  %v908_v11 = vsub.f32 %v7117_v53, %v892_v9  ;;  %7139 = vmatpush3.bf16.msra.mxu1 %v7727_v50  ;;  %v7729_v53 = vld [vmem:[%s10528_s4 + $0x28] sm:$0xff]  }
 0x397   : > { %v895_v12 = vpop.xlane.xlu0 %894  ;;  %7140 = vmatprep.subr.bf16.mxu1 %v7728_v51 }
 0x398   : > { %7846 = vpow2.f32 %v917_v10  ;;  %v919_v13 = vmul.f32 1.442695, %v908_v11  ;;  %v909_v14 = vsub.f32 %v865_v23, %v895_v12 }
 0x399   : > { %v898_v16 = vpop.xlane.xlu1 %897 }
 0x39a   : > { %7848 = vpow2.f32 %v919_v13  ;;  %v921_v43 = vmul.f32 1.442695, %v909_v14  ;;  %v910_v38 = vsub.f32 %v868_v62, %v898_v16  ;;  %7141 = vmatpush3.bf16.msra.mxu1 %v7728_v51 }
 0x39b   : > { %v901_v17 = vpop.xlane.xlu0 %900  ;;  %7142 = vmatprep.subr.bf16.mxu1 %v7729_v53 }
 0x39c   : > { %7850 = vpow2.f32 %v921_v43  ;;  %v923_v18 = vmul.f32 1.442695, %v910_v38  ;;  %v911_v19 = vsub.f32 %v7120_v57, %v901_v17  ;;  %v7731_v38 = vld [vmem:[%s10528_s4 + $0x38] sm:$0xff]  }
 0x39d   : > { %v904_v20 = vpop.xlane.xlu1 %903 }
 0x39e   : > { %v8450_v21 = vpop.eup %7842  ;;  %7852 = vpow2.f32 %v923_v18  ;;  %v925_v25 = vmul.f32 1.442695, %v911_v19  ;;  %v912_v52 = vsub.f32 %v7121_v60, %v904_v20  ;;  %7143 = vmatpush3.bf16.msra.mxu1 %v7729_v53 }
 0x39f   : > { %v929_v48 = vsel %vm880_vm4, %v8450_v21, 0.0  ;;  %7144 = vmatprep.subr.bf16.mxu1 %v7730_v54 }
 0x3a0   : > { %v8454_v26 = vpop.eup %7844  ;;  %7854 = vpow2.f32 %v925_v25  ;;  %v927_v28 = vmul.f32 1.442695, %v912_v52  ;;  %930 = vadd.xlane.f32.xlu0 %v929_v48 }
 0x3a1   : > { %v932_v31 = vsel %vm880_vm4, %v8454_v26, 0.0 }
 0x3a2   : > { %v8458_v32 = vpop.eup %7846  ;;  %7856 = vpow2.f32 %v927_v28  ;;  %933 = vadd.xlane.f32.xlu1 %v932_v31  ;;  %7145 = vmatpush3.bf16.msra.mxu1 %v7730_v54 }
 0x3a3   : > { %v935_v33 = vsel %vm880_vm4, %v8458_v32, 0.0  ;;  %7146 = vmatprep.subr.bf16.mxu1 %v7731_v38 }
 0x3a4   : > { %v7849_v36 = vpop.eup %7848  ;;  %936 = vadd.xlane.f32.xlu0 %v935_v33  ;;  %v8509_v33 = vsub.s32 2, %v8406_v15 }
 0x3a5   : > { %v938_v59 = vsel %vm880_vm4, %v7849_v36, 0.0 }
 0x3a6   : > { %v8463_v35 = vpop.eup %7850  ;;  %939 = vadd.xlane.f32.xlu1 %v938_v59  ;;  %7147 = vmatpush3.bf16.msra.mxu1 %v7731_v38  ;;  %10626 = vst [vmem:[#allocation4_spill] sm:$0xff] %v8509_v33  ;;  %v1182_v59 = vrot.slane %v8414_v27, %v8509_v33 }
 0x3a7   : > { %v941_v37 = vsel %vm880_vm4, %v8463_v35, 0.0 }
 0x3a8   : > { %v7853_v39 = vpop.eup %7852  ;;  %942 = vadd.xlane.f32.xlu0 %v941_v37  ;;  %v8210_v37 = vld [vmem:[%s10525_s1 + $0x10] sm:$0xff] }
 0x3a9   : > { %v944_v40 = vsel %vm880_vm4, %v7853_v39, 0.0 }
 0x3aa   : > { %v8468_v41 = vpop.eup %7854  ;;  %945 = vadd.xlane.f32.xlu1 %v944_v40  ;;  %v8211_v40 = vld [vmem:[%s10525_s1] sm:$0xff] }
 0x3ab   : > { %v947_v42 = vsel %vm880_vm4, %v8468_v41, 0.0 }
 0x3ac   : > { %v7857_v44 = vpop.eup %7856  ;;  %948 = vadd.xlane.f32.xlu0 %v947_v42 }
 0x3ad   : > { %v950_v45 = vsel %vm880_vm4, %v7857_v44, 0.0 }
 0x3ae   : > { %951 = vadd.xlane.f32.xlu1 %v950_v45 }
 0x42d   : > { %v931_v22 = vpop.xlane.xlu0 %930 }
 0x42e   : > { %7858 = vrcp.f32 %v931_v22 }
 0x42f   : > { %v934_v55 = vpop.xlane.xlu1 %933 }
 0x430   : > { %7860 = vrcp.f32 %v934_v55 }
 0x431   : > { %v937_v56 = vpop.xlane.xlu0 %936 }
 0x432   : > { %7862 = vrcp.f32 %v937_v56 }
 0x433   : > { %v940_v57 = vpop.xlane.xlu1 %939 }
 0x434   : > { %7864 = vrcp.f32 %v940_v57 }
 0x435   : > { %v943_v58 = vpop.xlane.xlu0 %942 }
 0x436   : > { %7866 = vrcp.f32 %v943_v58  ;;  %v8214_v58 = vld [vmem:[%s10525_s1 + $0x30] sm:$0xff] }
 0x437   : > { %v946_v23 = vpop.xlane.xlu1 %945 }
 0x438   : > { %v7859_v60 = vpop.eup %7858  ;;  %7868 = vrcp.f32 %v946_v23 }
 0x439   : > { %v949_v61 = vpop.xlane.xlu0 %948  ;;  %v961_v0 = vmul.f32 %v7859_v60, %v8450_v21  ;;  %v8215_v60 = vld [vmem:[%s10525_s1 + $0x20] sm:$0xff] }
 0x43a   : > { %v7861_v62 = vpop.eup %7860  ;;  %7870 = vrcp.f32 %v949_v61 }
 0x43b   : > { %v952_v63 = vpop.xlane.xlu1 %951  ;;  %v962_v1 = vmul.f32 %v7861_v62, %v8454_v26 }
 0x43c   : > { %v7863_v2 = vpop.eup %7862  ;;  %7872 = vrcp.f32 %v952_v63 }
 0x43d   : > { %v969_v3 = vpack.c.bf16 %v962_v1, %v961_v0  ;;  %v963_v6 = vmul.f32 %v7863_v2, %v8458_v32  ;;  %v8216_v2 = vld [vmem:[%s10525_s1 + $0x38] sm:$0xff] }
 0x43e   : > { %v7865_v5 = vpop.eup %7864 }
 0x43f   : > { %v964_v7 = vmul.f32 %v7865_v5, %v7849_v36  ;;  %7124 = vmatprep.mubr.msk.bf16.mxu0 %vm880_vm4, %v969_v3  ;;  %v8217_v5 = vld [vmem:[%s10525_s1 + $0x28] sm:$0xff] }
 0x440   : > { %v7867_v29 = vpop.eup %7866 }
 0x441   : > { %v970_v8 = vpack.c.bf16 %v964_v7, %v963_v6  ;;  %v965_v9 = vmul.f32 %v7867_v29, %v8463_v35 }
 0x442   : > { %v7869_v34 = vpop.eup %7868 }
 0x443   : > { %7125 = vmatmul.mubr.msk.bf16.vlgmr.msra.gmra.mrb[8].mxu0 %vm880_vm4, %v970_v8  ;;  %v966_v10 = vmul.f32 %v7869_v34, %v7853_v39 }
 0x444   : > { %v7871_v11 = vpop.eup %7870 }
 0x445   : > { %v971_v12 = vpack.c.bf16 %v966_v10, %v965_v9  ;;  %v967_v14 = vmul.f32 %v7871_v11, %v8468_v41 }
 0x446   : > { %v7873_v13 = vpop.eup %7872 }
 0x447   : > { %7128 = vmatprep.mubr.msk.bf16.mxu0 %vm880_vm4, %v971_v12  ;;  %v968_v16 = vmul.f32 %v7873_v13, %v7857_v44 }
 0x449   : > { %v972_v43 = vpack.c.bf16 %v968_v16, %v967_v14 }
 0x44b   : > { %7129 = vmatmul.mubr.msk.bf16.gmra.mrb[12].mxu0 %vm880_vm4, %v972_v43 }
 0x44c   : > { %1426 = vmatprep.mubr.bf16.mxu0 %v10539_v4 }
 0x516   : > { %v7126_v17 = vpop.f32.mrb[8].mxu0 }
 0x517   : > { %v1023_v18 = vpop.f32.mrb[9].mxu0 }
 0x518   : > { %v7127_v19 = vpop.f32.mrb[10].mxu0 }
 0x519   : > { %v1055_v20 = vpack.c.bf16 %v7127_v19, %v7126_v17  ;;  %v1026_v21 = vpop.f32.mrb[11].mxu0 }
 0x51a   : > { %v1054_v25 = vpack.c.bf16 %v1026_v21, %v1023_v18 }
 0x51c   : > { %7148 = vmatprep.mubr.bf16.mxu1 %v1054_v25 }
 0x51d   : > { %7149 = vmatmul.mubr.bf16.vlgmr.msra.gmra.mrb[12].mxu1 %v1055_v20 }
 0x51e   : > { %v7130_v52 = vpop.f32.mrb[12].mxu0 }
 0x51f   : > { %v1039_v48 = vpop.f32.mrb[13].mxu0 }
 0x520   : > { %v7131_v26 = vpop.f32.mrb[14].mxu0 }
 0x521   : > { %v1057_v28 = vpack.c.bf16 %v7131_v26, %v7130_v52  ;;  %v1042_v31 = vpop.f32.mrb[15].mxu0 }
 0x522   : > { %v1056_v32 = vpack.c.bf16 %v1042_v31, %v1039_v48 }
 0x524   : > { %7152 = vmatprep.mubr.bf16.mxu1 %v1056_v32 }
 0x525   : > { %7153 = vmatmul.mubr.bf16.gmra.mrb[16].mxu1 %v1057_v28 }
 0x526   : > { %2118 = vmatprep.mubr.bf16.mxu1 %v10539_v4 }
 0x5f0   : > { %v7150_v36 = vpop.f32.mrb[12].mxu1 }
 0x5f1   : > { %v1140_v35 = vpop.f32.mrb[13].mxu1  ;;  %v1173_v39 = vadd.f32 %v8210_v37, %v7150_v36 }
 0x5f2   : > { %v1171_v41 = vadd.f32 %v8211_v40, %v1140_v35  ;;  %v7151_v42 = vpop.f32.mrb[14].mxu1 }
 0x5f3   : > { %v1143_v44 = vpop.f32.mrb[15].mxu1  ;;  %v1174_v47 = vadd.f32 %v8212_v46, %v7151_v42  ;;  %v8527_v51 = vadd.f32 %v1182_v59, %v1173_v39 }
 0x5f4   : > { %v8519_v45 = vadd.f32 %v1182_v59, %v1171_v41  ;;  %v1172_v50 = vadd.f32 %v8213_v49, %v1143_v44 }
 0x5f5   : > { %v8533_v22 = vadd.f32 %v1182_v59, %v1174_v47  ;;  %v1217_v63 = vsel %vm479_vm0, %v8527_v51, 0.0 }
 0x5f6   : > { %v8529_v53 = vadd.f32 %v1182_v59, %v1172_v50  ;;  %v1211_v54 = vsel %vm479_vm0, %v8519_v45, 0.0 }
 0x5f7   : > { %1212 = vadd.xlane.f32.xlu0 %v1211_v54  ;;  %v1220_v7 = vsel %vm479_vm0, %v8533_v22, 0.0 }
 0x5f8   : > { %v7154_v55 = vpop.f32.mrb[16].mxu1  ;;  %v1214_v56 = vsel %vm479_vm0, %v8529_v53, 0.0 }
 0x5f9   : > { %1215 = vadd.xlane.f32.xlu1 %v1214_v56  ;;  %v1156_v57 = vpop.f32.mrb[17].mxu1  ;;  %v1177_v23 = vadd.f32 %v8214_v58, %v7154_v55 }
 0x5fa   : > { %v1175_v61 = vadd.f32 %v8215_v60, %v1156_v57  ;;  %v7155_v62 = vpop.f32.mrb[18].mxu1 }
 0x5fb   : > { %1218 = vadd.xlane.f32.xlu0 %v1217_v63  ;;  %v1159_v0 = vpop.f32.mrb[19].mxu1  ;;  %v1178_v3 = vadd.f32 %v8216_v2, %v7155_v62  ;;  %v8555_v29 = vadd.f32 %v1182_v59, %v1177_v23  ;;  %v7732_v2 = vld [vmem:[%s10529_s5] ss:$8 sps:$4 sm:$0xff]  }
 0x5fc   : > { %v8545_v1 = vadd.f32 %v1182_v59, %v1175_v61  ;;  %v1176_v6 = vadd.f32 %v8217_v5, %v1159_v0  ;;  %v7734_v0 = vld [vmem:[%s10529_s5 + $0x4] ss:$8 sps:$4 sm:$0xff]   ;;  %v7735_v5 = vld [vmem:[%s10529_s5 + $0x10] ss:$8 sps:$4 sm:$0xff]  }
 0x5fd   : > { %1221 = vadd.xlane.f32.xlu1 %v1220_v7  ;;  %v8561_v9 = vadd.f32 %v1182_v59, %v1178_v3  ;;  %v1229_v11 = vsel %vm479_vm0, %v8555_v29, 0.0  ;;  %1394 = vmatprep.subr.bf16.mxu0 %v7734_v0  ;;  %v7737_v3 = vld [vmem:[%s10529_s5 + $0x14] ss:$8 sps:$4 sm:$0xff]  }
 0x5fe   : > { %v8557_v8 = vadd.f32 %v1182_v59, %v1176_v6  ;;  %v1223_v34 = vsel %vm479_vm0, %v8545_v1, 0.0  ;;  %1395 = vmatpush1.bf16.msra.mxu0 %v7732_v2 }
 0x5ff   : > { %1224 = vadd.xlane.f32.xlu0 %v1223_v34  ;;  %v1232_v12 = vsel %vm479_vm0, %v8561_v9, 0.0  ;;  %1396 = vmatprep.subr.bf16.mxu0 %v7737_v3 }
 0x600   : > { %v1226_v10 = vsel %vm479_vm0, %v8557_v8, 0.0 }
 0x601   : > { %1227 = vadd.xlane.f32.xlu1 %v1226_v10 }
 0x602   : > { %1397 = vmatpush1.bf16.msra.mxu0 %v7735_v5 }
 0x603   : > { %1230 = vadd.xlane.f32.xlu0 %v1229_v11 }
 0x605   : > { %1233 = vadd.xlane.f32.xlu1 %v1232_v12 }
 0x684   : > { %v1213_v13 = vpop.xlane.xlu0 %1212 }
 0x685   : > { %v1235_v14 = vmul.f32 0.03125, %v1213_v13 }
 0x686   : > { %v1216_v16 = vpop.xlane.xlu1 %1215 }
 0x687   : > { %v8570_v43 = vsub.f32 %v8519_v45, %v1235_v14  ;;  %v1236_v38 = vmul.f32 0.03125, %v1216_v16 }
 0x688   : > { %v1219_v17 = vpop.xlane.xlu0 %1218 }
 0x689   : > { %v8573_v18 = vsub.f32 %v8529_v53, %v1236_v38  ;;  %v1237_v19 = vmul.f32 0.03125, %v1219_v17  ;;  %v1251_v20 = vmul.f32 %v8570_v43, %v8570_v43 }
 0x68a   : > { %v1222_v21 = vpop.xlane.xlu1 %1221 }
 0x68b   : > { %v8578_v25 = vsub.f32 %v8527_v51, %v1237_v19  ;;  %v1238_v52 = vmul.f32 0.03125, %v1222_v21  ;;  %v1259_v48 = vsel %vm479_vm0, %v1251_v20, 0.0  ;;  %v1252_v26 = vmul.f32 %v8573_v18, %v8573_v18 }
 0x68c   : > { %1260 = vadd.xlane.f32.xlu0 %v1259_v48  ;;  %v1225_v28 = vpop.xlane.xlu0 %1224 }
 0x68d   : > { %v8584_v31 = vsub.f32 %v8533_v22, %v1238_v52  ;;  %v1239_v32 = vmul.f32 0.03125, %v1225_v28  ;;  %v1262_v36 = vsel %vm479_vm0, %v1252_v26, 0.0  ;;  %v1253_v59 = vmul.f32 %v8578_v25, %v8578_v25 }
 0x68e   : > { %1263 = vadd.xlane.f32.xlu1 %v1262_v36  ;;  %v1228_v35 = vpop.xlane.xlu1 %1227  ;;  %v8630_v52 = vsub.s32 3, %v8406_v15 }
 0x68f   : > { %v8590_v37 = vsub.f32 %v8545_v1, %v1239_v32  ;;  %v1240_v39 = vmul.f32 0.03125, %v1228_v35  ;;  %v1265_v40 = vsel %vm479_vm0, %v1253_v59, 0.0  ;;  %v1254_v41 = vmul.f32 %v8584_v31, %v8584_v31 }
 0x690   : > { %1266 = vadd.xlane.f32.xlu0 %v1265_v40  ;;  %v1231_v42 = vpop.xlane.xlu0 %1230  ;;  %10627 = vst [vmem:[#allocation5_spill] sm:$0xff] %v8630_v52  ;;  %v1318_v36 = vrot.slane %v8414_v27, %v8630_v52  ;;  %v1329_v59 = vsub.s32 4, %v8406_v15 }
 0x691   : > { %v8596_v44 = vsub.f32 %v8557_v8, %v1240_v39  ;;  %v1241_v46 = vmul.f32 0.03125, %v1231_v42  ;;  %v1268_v47 = vsel %vm479_vm0, %v1254_v41, 0.0  ;;  %v1255_v49 = vmul.f32 %v8590_v37, %v8590_v37 }
 0x692   : > { %1269 = vadd.xlane.f32.xlu1 %v1268_v47  ;;  %v1234_v50 = vpop.xlane.xlu1 %1233 }
 0x693   : > { %v8602_v54 = vsub.f32 %v8555_v29, %v1241_v46  ;;  %v1242_v55 = vmul.f32 0.03125, %v1234_v50  ;;  %v1271_v56 = vsel %vm479_vm0, %v1255_v49, 0.0  ;;  %v1256_v57 = vmul.f32 %v8596_v44, %v8596_v44 }
 0x694   : > { %1272 = vadd.xlane.f32.xlu0 %v1271_v56  ;;  %v1330_v49 = vrot.slane %v8414_v27, %v1329_v59  ;;  %v7744_v59 = vld [vmem:[%s10530_s6 + $0x30] sm:$0xff]  }
 0x695   : > { %v8608_v58 = vsub.f32 %v8561_v9, %v1242_v55  ;;  %v1274_v23 = vsel %vm479_vm0, %v1256_v57, 0.0  ;;  %v1257_v60 = vmul.f32 %v8602_v54, %v8602_v54 }
 0x696   : > { %1275 = vadd.xlane.f32.xlu1 %v1274_v23 }
 0x697   : > { %v1277_v61 = vsel %vm479_vm0, %v1257_v60, 0.0  ;;  %v1258_v62 = vmul.f32 %v8608_v58, %v8608_v58 }
 0x698   : > { %1278 = vadd.xlane.f32.xlu0 %v1277_v61 }
 0x699   : > { %v1280_v63 = vsel %vm479_vm0, %v1258_v62, 0.0 }
 0x69a   : > { %1281 = vadd.xlane.f32.xlu1 %v1280_v63 }
 0x719   : > { %v1261_v6 = vpop.xlane.xlu0 %1260 }
 0x71a   : > { %v1283_v7 = vmul.f32 0.03125, %v1261_v6 }
 0x71b   : > { %v1264_v34 = vpop.xlane.xlu1 %1263 }
 0x71c   : > { %v1291_v10 = vadd.f32 1e-05, %v1283_v7  ;;  %v1284_v11 = vmul.f32 0.03125, %v1264_v34 }
 0x71d   : > { %v1267_v12 = vpop.xlane.xlu0 %1266 }
 0x71e   : > { %7874 = vrsqrt.f32 %v1291_v10  ;;  %v1292_v13 = vadd.f32 1e-05, %v1284_v11  ;;  %v1285_v14 = vmul.f32 0.03125, %v1267_v12 }
 0x71f   : > { %v1270_v16 = vpop.xlane.xlu1 %1269 }
 0x720   : > { %7876 = vrsqrt.f32 %v1292_v13  ;;  %v1293_v38 = vadd.f32 1e-05, %v1285_v14  ;;  %v1286_v17 = vmul.f32 0.03125, %v1270_v16 }
 0x721   : > { %v1273_v19 = vpop.xlane.xlu0 %1272 }
 0x722   : > { %7878 = vrsqrt.f32 %v1293_v38  ;;  %v1294_v20 = vadd.f32 1e-05, %v1286_v17  ;;  %v1287_v21 = vmul.f32 0.03125, %v1273_v19 }
 0x723   : > { %v1276_v48 = vpop.xlane.xlu1 %1275 }
 0x724   : > { %7880 = vrsqrt.f32 %v1294_v20  ;;  %v1288_v26 = vmul.f32 0.03125, %v1276_v48  ;;  %v1295_v28 = vadd.f32 1e-05, %v1287_v21 }
 0x725   : > { %v1279_v35 = vpop.xlane.xlu0 %1278 }
 0x726   : > { %v1296_v32 = vadd.f32 1e-05, %v1288_v26  ;;  %v1289_v47 = vmul.f32 0.03125, %v1279_v35  ;;  %v7738_v26 = vld [vmem:[%s10530_s6] sm:$0xff]   ;;  %v7745_v35 = vld [vmem:[%s10530_s6 + $0x38] sm:$0xff]  }
 0x727   : > { %v1282_v39 = vpop.xlane.xlu1 %1281  ;;  %7156 = vmatprep.subr.bf16.mxu0 %v7738_v26 }
 0x728   : > { %v7875_v40 = vpop.eup %7874  ;;  %7882 = vrsqrt.f32 %v1296_v32  ;;  %v1290_v41 = vmul.f32 0.03125, %v1282_v39  ;;  %v1297_v61 = vadd.f32 1e-05, %v1289_v47  ;;  %v7742_v32 = vld [vmem:[%s10530_s6 + $0x20] sm:$0xff]  }
 0x729   : > { %v1307_v42 = vmul.f32 %v7875_v40, %v8570_v43  ;;  %7884 = vrsqrt.f32 %v1295_v28  ;;  %v7741_v28 = vld [vmem:[%s10530_s6 + $0x18] sm:$0xff]   ;;  %v469_v39 = vld [vmem:[%s10537_s13] sm:$0xf] }
 0x72a   : > { %v7877_v46 = vpop.eup %7876  ;;  %v1298_v57 = vadd.f32 1e-05, %v1290_v41  ;;  %v1351_v40 = vrot.slane %v469_v39, %v8509_v33 }
 0x72b   : > { %v1319_v50 = vmul.f32 %v1318_v36, %v1307_v42  ;;  %v1308_v55 = vmul.f32 %v7877_v46, %v8573_v18 }
 0x72c   : > { %v7879_v56 = vpop.eup %7878  ;;  %7886 = vrsqrt.f32 %v1298_v57  ;;  %v1361_v41 = vrot.slane %v1351_v40, %v8409_v24 }
 0x72d   : > { %v1320_v23 = vmul.f32 %v1318_v36, %v1308_v55  ;;  %v1331_v62 = vadd.f32 %v1330_v49, %v1319_v50  ;;  %v1309_v0 = vmul.f32 %v7879_v56, %v8578_v25  ;;  %7888 = vrsqrt.f32 %v1297_v61 }
 0x72e   : > { %v7881_v60 = vpop.eup %7880 }
 0x72f   : > { %v1332_v63 = vadd.f32 %v1330_v49, %v1320_v23  ;;  %v1310_v2 = vmul.f32 %v7881_v60, %v8584_v31  ;;  %v1321_v27 = vmul.f32 %v1318_v36, %v1309_v0 }
 0x731   : > { %v1339_v43 = vpack.c.bf16 %v1332_v63, %v1331_v62  ;;  %v1322_v3 = vmul.f32 %v1318_v36, %v1310_v2  ;;  %v1333_v34 = vadd.f32 %v1330_v49, %v1321_v27  ;;  %v1347_v63 = vrot.slane %v469_v39, %v8409_v24 }
 0x732   : > { %v7883_v5 = vpop.eup %7882 }
 0x733   : > { %6601 = vmatmul.mubr.msk.bf16.vlgmr.msra.gmra.mrb[16].mxu0 %vm479_vm0, %v1339_v43  ;;  %v7885_v18 = vpop.eup %7884  ;;  %v1334_v6 = vadd.f32 %v1330_v49, %v1322_v3  ;;  %v1312_v7 = vmul.f32 %v7883_v5, %v8596_v44  ;;  %v8682_v5 = vrot.slane %v1347_v63, %v8409_v24 }
 0x734   : > { %1436 = vmatprep.mubr.bf16.mxu0 %v10539_v4  ;;  %v1311_v10 = vmul.f32 %v7885_v18, %v8590_v37  ;;  %7157 = vmatpush3.bf16.msra.mxu0 %v7738_v26 }
 0x735   : > { %v1340_v25 = vpack.c.bf16 %v1334_v6, %v1333_v34  ;;  %v1324_v11 = vmul.f32 %v1318_v36, %v1312_v7 }
 0x736   : > { %v7887_v31 = vpop.eup %7886  ;;  %v1323_v12 = vmul.f32 %v1318_v36, %v1311_v10 }
 0x737   : > { %v7889_v13 = vpop.eup %7888  ;;  %v1336_v14 = vadd.f32 %v1330_v49, %v1324_v11  ;;  %v1314_v16 = vmul.f32 %v7887_v31, %v8608_v58  ;;  %v7740_v58 = vld [vmem:[%s10530_s6 + $0x10] sm:$0xff]  }
 0x738   : > { %v1335_v38 = vadd.f32 %v1330_v49, %v1323_v12  ;;  %v1313_v17 = vmul.f32 %v7889_v13, %v8602_v54  ;;  %v7739_v54 = vld [vmem:[%s10530_s6 + $0x8] sm:$0xff]  }
 0x739   : > { %v1326_v44 = vmul.f32 %v1318_v36, %v1314_v16  ;;  %7158 = vmatprep.subr.bf16.mxu0 %v7739_v54 }
 0x73a   : > { %v1341_v19 = vpack.c.bf16 %v1336_v14, %v1335_v38  ;;  %v1325_v37 = vmul.f32 %v1318_v36, %v1313_v17  ;;  %7159 = vmatpush3.bf16.msra.mxu0 %v7739_v54  ;;  %v7743_v36 = vld [vmem:[%s10530_s6 + $0x28] sm:$0xff]  }
 0x73b   : > { %6602 = vmatmul.mubr.msk.bf16.gmra.mrb[20].mxu0 %vm479_vm0, %v1340_v25  ;;  %v1338_v20 = vadd.f32 %v1330_v49, %v1326_v44  ;;  %7160 = vmatprep.subr.bf16.mxu0 %v7740_v58 }
 0x73c   : > { %1446 = vmatprep.mubr.bf16.mxu0 %v10539_v4  ;;  %v1337_v21 = vadd.f32 %v1330_v49, %v1325_v37 }
 0x73e   : > { %v1342_v48 = vpack.c.bf16 %v1338_v20, %v1337_v21  ;;  %7161 = vmatpush3.bf16.msra.mxu0 %v7740_v58 }
 0x73f   : > { %7162 = vmatprep.subr.bf16.mxu0 %v7741_v28 }
 0x742   : > { %7163 = vmatpush3.bf16.msra.mxu0 %v7741_v28 }
 0x743   : > { %6603 = vmatmul.mubr.msk.bf16.gmra.mrb[24].mxu0 %vm479_vm0, %v1341_v19  ;;  %7164 = vmatprep.subr.bf16.mxu0 %v7742_v32 }
 0x744   : > { %1456 = vmatprep.mubr.bf16.mxu0 %v10539_v4 }
 0x746   : > { %7165 = vmatpush3.bf16.msra.mxu0 %v7742_v32 }
 0x747   : > { %7166 = vmatprep.subr.bf16.mxu0 %v7743_v36 }
 0x74a   : > { %7167 = vmatpush3.bf16.msra.mxu0 %v7743_v36 }
 0x74b   : > { %6604 = vmatmul.mubr.msk.bf16.gmra.mrb[28].mxu0 %vm479_vm0, %v1342_v48  ;;  %7168 = vmatprep.subr.bf16.mxu0 %v7744_v59 }
 0x74e   : > { %7169 = vmatpush3.bf16.msra.mxu0 %v7744_v59 }
 0x74f   : > { %7170 = vmatprep.subr.bf16.mxu0 %v7745_v35 }
 0x752   : > { %7171 = vmatpush3.bf16.msra.mxu0 %v7745_v35 }
 0x806   : > { %v1428_v42 = vpop.f32.mrb[16].mxu0 }
 0x807   : > { %v1430_v46 = vpop.f32.mrb[17].mxu0  ;;  %v1429_v31 = vadd.f32 %v1428_v42, %v8682_v5 }
 0x808   : > { %v1431_v47 = vadd.f32 %v1430_v46, %v1361_v41  ;;  %v1432_v49 = vpop.f32.mrb[18].mxu0 }
 0x809   : > { %v1434_v50 = vpop.f32.mrb[19].mxu0  ;;  %v1433_v19 = vadd.f32 %v1432_v49, %v8682_v5 }
 0x80a   : > { %v1475_v55 = vmul.f32 0.70710677, %v1431_v47  ;;  %v1435_v56 = vadd.f32 %v1434_v50, %v1361_v41  ;;  %v1467_v6 = vmul.f32 0.5, %v1431_v47 }
 0x80c   : > { %7890 = verf.f32 %v1475_v55  ;;  %v1476_v57 = vmul.f32 0.70710677, %v1435_v56  ;;  %v1468_v13 = vmul.f32 0.5, %v1435_v56 }
 0x80e   : > { %7892 = verf.f32 %v1476_v57  ;;  %v1438_v23 = vpop.f32.mrb[20].mxu0 }
 0x80f   : > { %v1440_v60 = vpop.f32.mrb[21].mxu0  ;;  %v1439_v39 = vadd.f32 %v1438_v23, %v8682_v5 }
 0x810   : > { %v1441_v61 = vadd.f32 %v1440_v60, %v1361_v41  ;;  %v1442_v62 = vpop.f32.mrb[22].mxu0 }
 0x811   : > { %v1444_v0 = vpop.f32.mrb[23].mxu0  ;;  %v1443_v56 = vadd.f32 %v1442_v62, %v8682_v5 }
 0x812   : > { %v1477_v2 = vmul.f32 0.70710677, %v1441_v61  ;;  %v1445_v43 = vadd.f32 %v1444_v0, %v1361_v41  ;;  %v1469_v54 = vmul.f32 0.5, %v1441_v61 }
 0x814   : > { %7894 = verf.f32 %v1477_v2  ;;  %v1478_v3 = vmul.f32 0.70710677, %v1445_v43  ;;  %v1470_v42 = vmul.f32 0.5, %v1445_v43 }
 0x816   : > { %v7891_v27 = vpop.eup %7890  ;;  %7896 = verf.f32 %v1478_v3  ;;  %v1448_v18 = vpop.f32.mrb[24].mxu0 }
 0x817   : > { %v1491_v7 = vadd.f32 1.0, %v7891_v27  ;;  %v1450_v34 = vpop.f32.mrb[25].mxu0  ;;  %v1449_v43 = vadd.f32 %v1448_v18, %v8682_v5 }
 0x818   : > { %v7893_v10 = vpop.eup %7892  ;;  %v1451_v25 = vadd.f32 %v1450_v34, %v1361_v41  ;;  %v1452_v11 = vpop.f32.mrb[26].mxu0 }
 0x819   : > { %v1499_v12 = vmul.f32 %v1491_v7, %v1467_v6  ;;  %v1492_v14 = vadd.f32 1.0, %v7893_v10  ;;  %v1454_v16 = vpop.f32.mrb[27].mxu0 }
 0x81a   : > { %v1479_v38 = vmul.f32 0.70710677, %v1451_v25  ;;  %v1455_v17 = vadd.f32 %v1454_v16, %v1361_v41  ;;  %v1471_v2 = vmul.f32 0.5, %v1451_v25 }
 0x81b   : > { %v1500_v44 = vmul.f32 %v1492_v14, %v1468_v13  ;;  %v1507_v37 = vmul.f32 %v1499_v12, %v1429_v31 }
 0x81c   : > { %7898 = verf.f32 %v1479_v38  ;;  %v1480_v20 = vmul.f32 0.70710677, %v1455_v17  ;;  %v1472_v6 = vmul.f32 0.5, %v1455_v17 }
 0x81d   : > { %v1508_v21 = vmul.f32 %v1500_v44, %v1433_v19 }
 0x81e   : > { %v7895_v48 = vpop.eup %7894  ;;  %7900 = verf.f32 %v1480_v20  ;;  %v1458_v26 = vpop.f32.mrb[28].mxu0 }
 0x81f   : > { %v1493_v58 = vadd.f32 1.0, %v7895_v48  ;;  %v1460_v28 = vpop.f32.mrb[29].mxu0  ;;  %v1515_v32 = vpack.c.bf16 %v1508_v21, %v1507_v37  ;;  %v1459_v25 = vadd.f32 %v1458_v26, %v8682_v5  ;;  %v1521_v21 = vsub.s32 5, %v8406_v15  ;;  %v8697_v48 = vld [vmem:[%s10535_s11] sm:$0xff] }
 0x820   : > { %v7897_v36 = vpop.eup %7896  ;;  %v1461_v59 = vadd.f32 %v1460_v28, %v1361_v41  ;;  %v1462_v35 = vpop.f32.mrb[30].mxu0 }
 0x821   : > { %v1501_v40 = vmul.f32 %v1493_v58, %v1469_v54  ;;  %v1494_v46 = vadd.f32 1.0, %v7897_v36  ;;  %v1464_v47 = vpop.f32.mrb[31].mxu0  ;;  %7172 = vmatprep.mubr.bf16.mxu0 %v1515_v32  ;;  %v1463_v18 = vadd.f32 %v1462_v35, %v8682_v5  ;;  %v1522_v26 = vrot.slane %v8697_v48, %v1521_v21 }
 0x822   : > { %v1481_v49 = vmul.f32 0.70710677, %v1461_v59  ;;  %v1465_v50 = vadd.f32 %v1464_v47, %v1361_v41  ;;  %v1453_v41 = vadd.f32 %v1452_v11, %v8682_v5  ;;  %v1473_v12 = vmul.f32 0.5, %v1461_v59 }
 0x823   : > { %v1509_v55 = vmul.f32 %v1501_v40, %v1439_v39  ;;  %v1502_v57 = vmul.f32 %v1494_v46, %v1470_v42 }
 0x824   : > { %7902 = verf.f32 %v1481_v49  ;;  %v1482_v60 = vmul.f32 0.70710677, %v1465_v50  ;;  %v1474_v19 = vmul.f32 0.5, %v1465_v50 }
 0x825   : > { %v1510_v61 = vmul.f32 %v1502_v57, %v1443_v56 }
 0x826   : > { %v7899_v63 = vpop.eup %7898  ;;  %7904 = verf.f32 %v1482_v60 }
 0x827   : > { %v1516_v0 = vpack.c.bf16 %v1510_v61, %v1509_v55  ;;  %v1495_v3 = vadd.f32 1.0, %v7899_v63 }
 0x828   : > { %v7901_v23 = vpop.eup %7900 }
 0x829   : > { %v1503_v27 = vmul.f32 %v1495_v3, %v1471_v2  ;;  %v1496_v7 = vadd.f32 1.0, %v7901_v23  ;;  %7173 = vmatmul.mubr.bf16.vlgmr.msra.gmra.mrb[32].mxu0 %v1516_v0 }
 0x82b   : > { %v1504_v34 = vmul.f32 %v1496_v7, %v1472_v6  ;;  %v1511_v62 = vmul.f32 %v1503_v27, %v1449_v43 }
 0x82d   : > { %v1512_v10 = vmul.f32 %v1504_v34, %v1453_v41 }
 0x82e   : > { %v7903_v31 = vpop.eup %7902 }
 0x82f   : > { %v1497_v13 = vadd.f32 1.0, %v7903_v31  ;;  %v1517_v14 = vpack.c.bf16 %v1512_v10, %v1511_v62 }
 0x830   : > { %v7905_v16 = vpop.eup %7904 }
 0x831   : > { %v1505_v38 = vmul.f32 %v1497_v13, %v1473_v12  ;;  %v1498_v44 = vadd.f32 1.0, %v7905_v16  ;;  %7176 = vmatprep.mubr.bf16.mxu0 %v1517_v14 }
 0x833   : > { %v1506_v17 = vmul.f32 %v1498_v44, %v1474_v19  ;;  %v1513_v37 = vmul.f32 %v1505_v38, %v1459_v25 }
 0x835   : > { %v1514_v20 = vmul.f32 %v1506_v17, %v1463_v18 }
 0x837   : > { %v1518_v11 = vpack.c.bf16 %v1514_v20, %v1513_v37 }
 0x839   : > { %7177 = vmatmul.mubr.bf16.gmra.mrb[36].mxu0 %v1518_v11 }
 0x83a   : > { %2108 = vmatprep.mubr.bf16.mxu0 %v10539_v4 }
 0x8fc   : > { %v7174_v54 = vpop.f32.mrb[32].mxu0 }
 0x8fd   : > { %v1614_v58 = vadd.f32 %v7174_v54, %v1522_v26  ;;  %v1605_v28 = vpop.f32.mrb[33].mxu0 }
 0x8fe   : > { %v7175_v5 = vpop.f32.mrb[34].mxu0  ;;  %v1606_v57 = vadd.f32 %v1605_v28, %v1522_v26 }
 0x8ff   : > { %v8701_v32 = vadd.f32 %v1614_v58, %v8527_v51  ;;  %v1617_v36 = vadd.f32 %v7175_v5, %v1522_v26  ;;  %v1608_v59 = vpop.f32.mrb[35].mxu0 }
 0x900   : > { %v1609_v0 = vadd.f32 %v1608_v59, %v1522_v26  ;;  %v8727_v3 = vadd.f32 %v1606_v57, %v8519_v45  ;;  %v1784_v57 = vld [vmem:[%s10531_s7 + $0x60] sm:$0xff] }
 0x901   : > { %10628 = vst [vmem:[#allocation6_spill] sm:$0xff] %v8701_v32  ;;  %v8704_v35 = vadd.f32 %v1617_v36, %v8533_v22  ;;  %v1650_v39 = vsel %vm479_vm0, %v8701_v32, 0.0 }
 0x902   : > { %1651 = vadd.xlane.f32.xlu0 %v1650_v39  ;;  %10634 = vst [vmem:[#allocation12_spill] sm:$0xff] %v8727_v3 }
 0x903   : > { %10629 = vst [vmem:[#allocation7_spill] sm:$0xff] %v8704_v35  ;;  %v1653_v40 = vsel %vm479_vm0, %v8704_v35, 0.0 }
 0x904   : > { %1654 = vadd.xlane.f32.xlu1 %v1653_v40 }
 0x90c   : > { %v7178_v42 = vpop.f32.mrb[36].mxu0 }
 0x90d   : > { %v1621_v46 = vpop.f32.mrb[37].mxu0  ;;  %v1630_v47 = vadd.f32 %v7178_v42, %v1522_v26 }
 0x90e   : > { %v1622_v49 = vadd.f32 %v1621_v46, %v1522_v26  ;;  %v7179_v50 = vpop.f32.mrb[38].mxu0 }
 0x90f   : > { %v1624_v51 = vpop.f32.mrb[39].mxu0  ;;  %v1633_v56 = vadd.f32 %v7179_v50, %v1522_v26  ;;  %v8714_v60 = vadd.f32 %v1630_v47, %v8555_v29 }
 0x910   : > { %v8711_v55 = vadd.f32 %v1622_v49, %v8545_v1  ;;  %v1625_v22 = vadd.f32 %v1624_v51, %v1522_v26 }
 0x911   : > { %10631 = vst [vmem:[#allocation9_spill] sm:$0xff] %v8714_v60  ;;  %v8722_v2 = vadd.f32 %v1633_v56, %v8561_v9  ;;  %v1662_v29 = vsel %vm479_vm0, %v8714_v60, 0.0  ;;  %v1644_v9 = vsel %vm479_vm0, %v8727_v3, 0.0 }
 0x912   : > { %10630 = vst [vmem:[#allocation8_spill] sm:$0xff] %v8711_v55  ;;  %v8717_v61 = vadd.f32 %v1625_v22, %v8557_v8  ;;  %v1656_v63 = vsel %vm479_vm0, %v8711_v55, 0.0  ;;  %v8732_v8 = vadd.f32 %v1609_v0, %v8529_v53  ;;  %v1772_v22 = vld [vmem:[%s10531_s7] sm:$0xff] }
 0x913   : > { %1657 = vadd.xlane.f32.xlu0 %v1656_v63  ;;  %10633 = vst [vmem:[#allocation11_spill] sm:$0xff] %v8722_v2  ;;  %v1665_v23 = vsel %vm479_vm0, %v8722_v2, 0.0  ;;  %v6614_v63 = vcombine.high %v1772_v22, %v1784_v57  ;;  %v6613_v0 = vcombine.low %v1772_v22, %v1784_v57 }
 0x914   : > { %10632 = vst [vmem:[#allocation10_spill] sm:$0xff] %v8717_v61  ;;  %v1659_v1 = vsel %vm479_vm0, %v8717_v61, 0.0  ;;  %10635 = vst [vmem:[#allocation13_spill] sm:$0xff] %v8732_v8  ;;  %v1647_v43 = vsel %vm479_vm0, %v8732_v8, 0.0 }
 0x915   : > { %1660 = vadd.xlane.f32.xlu1 %v1659_v1  ;;  %7652 = vmatprep.subr.bf16.mxu1 %v6614_v63  ;;  %v1796_v1 = vld [vmem:[%s10531_s7 + $0xc0] sm:$0xff] }
 0x916   : > { %2076 = vmatprep.subr.bf16.mxu0 %v6614_v63  ;;  %7654 = vmatpush1.bf16.msra.mxu1 %v6613_v0 }
 0x917   : > { %1663 = vadd.xlane.f32.xlu0 %v1662_v29  ;;  %v1808_v29 = vld [vmem:[%s10531_s7 + $0x120] sm:$0xff]  ;;  %2077 = vmatpush1.bf16.msra.mxu0 %v6613_v0 }
 0x919   : > { %1666 = vadd.xlane.f32.xlu1 %v1665_v23  ;;  %v6638_v23 = vcombine.high %v1796_v1, %v1808_v29 }
 0x91b   : > { %1645 = vadd.xlane.f32.xlu0 %v1644_v9  ;;  %v6637_v9 = vcombine.low %v1796_v1, %v1808_v29  ;;  %7653 = vmatprep.subr.bf16.mxu1 %v6638_v23  ;;  %v8845_v29 = vld [vmem:[%s10531_s7 + $0x20] sm:$0xff] }
 0x91c   : > { %2078 = vmatprep.subr.bf16.mxu0 %v6638_v23  ;;  %v8850_v23 = vld [vmem:[%s10531_s7 + $0x80] sm:$0xff] }
 0x91d   : > { %1648 = vadd.xlane.f32.xlu1 %v1647_v43  ;;  %7655 = vmatpush1.bf16.msra.mxu1 %v6637_v9  ;;  %v1774_v43 = vld [vmem:[%s10531_s7 + $0x10] sm:$0xff] }
 0x91e   : > { %2079 = vmatpush1.bf16.msra.mxu0 %v6637_v9 }
 0x98f   : > { %v1652_v45 = vpop.xlane.xlu0 %1651 }
 0x990   : > { %v1670_v27 = vmul.f32 0.03125, %v1652_v45  ;;  %v1786_v45 = vld [vmem:[%s10531_s7 + $0x70] sm:$0xff] }
 0x991   : > { %v1655_v6 = vpop.xlane.xlu1 %1654 }
 0x992   : > { %v8741_v7 = vsub.f32 %v8701_v32, %v1670_v27  ;;  %v1671_v53 = vmul.f32 0.03125, %v1655_v6  ;;  %v6617_v27 = vcombine.low %v1774_v43, %v1786_v45  ;;  %v6618_v6 = vcombine.high %v1774_v43, %v1786_v45 }
 0x994   : > { %v8744_v41 = vsub.f32 %v8704_v35, %v1671_v53  ;;  %v1686_v34 = vmul.f32 %v8741_v7, %v8741_v7  ;;  %v8809_v53 = vld [vmem:[%s10531_s7 + $0x8] sm:$0xff]  ;;  %2222 = vmatprep.subr.bf16.mxu1 %v6618_v6 }
 0x996   : > { %v1698_v62 = vsel %vm479_vm0, %v1686_v34, 0.0  ;;  %v1687_v10 = vmul.f32 %v8744_v41, %v8744_v41  ;;  %v8814_v34 = vld [vmem:[%s10531_s7 + $0x68] sm:$0xff] }
 0x997   : > { %1699 = vadd.xlane.f32.xlu0 %v1698_v62  ;;  %v6615_v62 = vcombine.low %v8809_v53, %v8814_v34 }
 0x998   : > { %v1701_v31 = vsel %vm479_vm0, %v1687_v10, 0.0  ;;  %v6616_v10 = vcombine.high %v8809_v53, %v8814_v34  ;;  %v6621_v53 = vcombine.low %v8845_v29, %v8850_v23  ;;  %v1799_v34 = vld [vmem:[%s10531_s7 + $0xd8] sm:$0xff] }
 0x999   : > { %1702 = vadd.xlane.f32.xlu1 %v1701_v31 }
 0x99a   : > { %2149 = vmatprep.subr.bf16.mxu0 %v6616_v10 }
 0x9a0   : > { %v1658_v12 = vpop.xlane.xlu0 %1657 }
 0x9a1   : > { %v1672_v13 = vmul.f32 0.03125, %v1658_v12 }
 0x9a2   : > { %v1661_v14 = vpop.xlane.xlu1 %1660 }
 0x9a3   : > { %v8753_v16 = vsub.f32 %v8711_v55, %v1672_v13  ;;  %v1673_v25 = vmul.f32 0.03125, %v1661_v14 }
 0x9a4   : > { %v1664_v38 = vpop.xlane.xlu0 %1663 }
 0x9a5   : > { %v8756_v19 = vsub.f32 %v8717_v61, %v1673_v25  ;;  %v1674_v44 = vmul.f32 0.03125, %v1664_v38  ;;  %v1688_v18 = vmul.f32 %v8753_v16, %v8753_v16 }
 0x9a6   : > { %v1667_v17 = vpop.xlane.xlu1 %1666 }
 0x9a7   : > { %v8761_v37 = vsub.f32 %v8714_v60, %v1674_v44  ;;  %v1675_v20 = vmul.f32 0.03125, %v1667_v17  ;;  %v1704_v11 = vsel %vm479_vm0, %v1688_v18, 0.0  ;;  %v1689_v21 = vmul.f32 %v8756_v19, %v8756_v19 }
 0x9a8   : > { %1705 = vadd.xlane.f32.xlu0 %v1704_v11  ;;  %v1646_v26 = vpop.xlane.xlu0 %1645  ;;  %v1750_v44 = vsub.s32 6, %v8406_v15  ;;  %v1762_v18 = vsub.s32 7, %v8406_v15 }
 0x9a9   : > { %v8767_v54 = vsub.f32 %v8722_v2, %v1675_v20  ;;  %v1668_v58 = vmul.f32 0.03125, %v1646_v26  ;;  %v1707_v28 = vsel %vm479_vm0, %v1689_v21, 0.0  ;;  %v1690_v5 = vmul.f32 %v8761_v37, %v8761_v37 }
 0x9aa   : > { %1708 = vadd.xlane.f32.xlu1 %v1707_v28  ;;  %v1649_v36 = vpop.xlane.xlu1 %1648  ;;  %v8823_v17 = vrot.slane %v8697_v48, %v1750_v44  ;;  %v8827_v26 = vrot.slane %v8697_v48, %v1762_v18  ;;  %v1810_v48 = vld [vmem:[%s10531_s7 + $0x130] sm:$0xff] }
 0x9ab   : > { %v8773_v59 = vsub.f32 %v8727_v3, %v1668_v58  ;;  %v1669_v39 = vmul.f32 0.03125, %v1649_v36  ;;  %v1710_v40 = vsel %vm479_vm0, %v1690_v5, 0.0  ;;  %v1691_v42 = vmul.f32 %v8767_v54, %v8767_v54 }
 0x9ac   : > { %1711 = vadd.xlane.f32.xlu0 %v1710_v40 }
 0x9ad   : > { %v8779_v46 = vsub.f32 %v8732_v8, %v1669_v39  ;;  %v1713_v47 = vsel %vm479_vm0, %v1691_v42, 0.0  ;;  %v1684_v49 = vmul.f32 %v8773_v59, %v8773_v59 }
 0x9ae   : > { %1714 = vadd.xlane.f32.xlu1 %v1713_v47  ;;  %v1798_v47 = vld [vmem:[%s10531_s7 + $0xd0] sm:$0xff] }
 0x9af   : > { %v1692_v50 = vsel %vm479_vm0, %v1684_v49, 0.0  ;;  %v1685_v51 = vmul.f32 %v8779_v46, %v8779_v46  ;;  %v6642_v22 = vcombine.high %v1798_v47, %v1810_v48  ;;  %v6641_v6 = vcombine.low %v1798_v47, %v1810_v48  ;;  %v1809_v48 = vld [vmem:[%s10531_s7 + $0x128] sm:$0xff] }
 0x9b0   : > { %1693 = vadd.xlane.f32.xlu0 %v1692_v50 }
 0x9b1   : > { %v1695_v56 = vsel %vm479_vm0, %v1685_v51, 0.0 }
 0x9b2   : > { %1696 = vadd.xlane.f32.xlu1 %v1695_v56 }
 0xa24   : > { %v1700_v31 = vpop.xlane.xlu0 %1699 }
 0xa25   : > { %v1718_v12 = vmul.f32 0.03125, %v1700_v31 }
 0xa26   : > { %v1703_v13 = vpop.xlane.xlu1 %1702 }
 0xa27   : > { %v1726_v14 = vadd.f32 1e-05, %v1718_v12  ;;  %v1719_v25 = vmul.f32 0.03125, %v1703_v13  ;;  %v6622_v12 = vcombine.high %v8845_v29, %v8850_v23 }
 0xa29   : > { %7906 = vrsqrt.f32 %v1726_v14  ;;  %v1727_v38 = vadd.f32 1e-05, %v1719_v25 }
 0xa2b   : > { %7908 = vrsqrt.f32 %v1727_v38 }
 0xa33   : > { %v7907_v20 = vpop.eup %7906 }
 0xa34   : > { %v1742_v11 = vmul.f32 %v7907_v20, %v8741_v7 }
 0xa35   : > { %v7909_v21 = vpop.eup %7908  ;;  %v1706_v58 = vpop.xlane.xlu0 %1705 }
 0xa36   : > { %v1754_v28 = vmul.f32 %v8823_v17, %v1742_v11  ;;  %v1743_v5 = vmul.f32 %v7909_v21, %v8744_v41  ;;  %v1720_v36 = vmul.f32 0.03125, %v1706_v58 }
 0xa37   : > { %v1709_v39 = vpop.xlane.xlu1 %1708 }
 0xa38   : > { %v1755_v40 = vmul.f32 %v8823_v17, %v1743_v5  ;;  %v1728_v15 = vadd.f32 1e-05, %v1720_v36  ;;  %v1721_v42 = vmul.f32 0.03125, %v1709_v39  ;;  %v1766_v7 = vadd.f32 %v8827_v26, %v1754_v28 }
 0xa39   : > { %v1712_v49 = vpop.xlane.xlu0 %1711 }
 0xa3a   : > { %v1767_v50 = vadd.f32 %v8827_v26, %v1755_v40  ;;  %7910 = vrsqrt.f32 %v1728_v15  ;;  %v1729_v41 = vadd.f32 1e-05, %v1721_v42  ;;  %v1722_v51 = vmul.f32 0.03125, %v1712_v49 }
 0xa3b   : > { %v1715_v56 = vpop.xlane.xlu1 %1714 }
 0xa3c   : > { %v8840_v57 = vpack.c.bf16 %v1767_v50, %v1766_v7  ;;  %7912 = vrsqrt.f32 %v1729_v41  ;;  %v1730_v63 = vadd.f32 1e-05, %v1722_v51  ;;  %v1723_v0 = vmul.f32 0.03125, %v1715_v56  ;;  %v1787_v56 = vld [vmem:[%s10531_s7 + $0x78] sm:$0xff] }
 0xa3d   : > { %v1694_v1 = vpop.xlane.xlu0 %1693 }
 0xa3e   : > { %7914 = vrsqrt.f32 %v1730_v63  ;;  %v1731_v9 = vadd.f32 1e-05, %v1723_v0  ;;  %v1716_v43 = vmul.f32 0.03125, %v1694_v1  ;;  %6662 = vmatmul.mubr.msk.bf16.vlgmr.msra.gmra.mrb[20].mxu1 %vm479_vm0, %v8840_v57  ;;  %v1800_v63 = vld [vmem:[%s10531_s7 + $0xe0] sm:$0xff] }
 0xa3f   : > { %v1697_v45 = vpop.xlane.xlu1 %1696  ;;  %2223 = vmatpush1.bf16.msra.mxu1 %v6617_v27  ;;  %2128 = vmatprep.mubr.bf16.mxu1 %v10539_v4  ;;  %v1812_v0 = vld [vmem:[%s10531_s7 + $0x140] sm:$0xff] }
 0xa40   : > { %7916 = vrsqrt.f32 %v1731_v9  ;;  %v1724_v10 = vadd.f32 1e-05, %v1716_v43  ;;  %v1717_v31 = vmul.f32 0.03125, %v1697_v45  ;;  %2224 = vmatprep.subr.bf16.mxu1 %v6642_v22  ;;  %v6646_v1 = vcombine.high %v1800_v63, %v1812_v0  ;;  %v1778_v43 = vld [vmem:[%s10531_s7 + $0x30] sm:$0xff] }
 0xa41   : > { %v1790_v45 = vld [vmem:[%s10531_s7 + $0x90] sm:$0xff]  ;;  %v6645_v23 = vcombine.low %v1800_v63, %v1812_v0  ;;  %v1805_v0 = vld [vmem:[%s10531_s7 + $0x108] sm:$0xff] }
 0xa42   : > { %7918 = vrsqrt.f32 %v1724_v10  ;;  %v1725_v13 = vadd.f32 1e-05, %v1717_v31  ;;  %v1777_v31 = vld [vmem:[%s10531_s7 + $0x28] sm:$0xff] }
 0xa43   : > { %2225 = vmatpush1.bf16.msra.mxu1 %v6641_v6  ;;  %v6626_v6 = vcombine.high %v1778_v43, %v1790_v45 }
 0xa44   : > { %v7911_v14 = vpop.eup %7910  ;;  %7920 = vrsqrt.f32 %v1725_v13  ;;  %2368 = vmatprep.subr.bf16.mxu1 %v6622_v12  ;;  %v1789_v12 = vld [vmem:[%s10531_s7 + $0x88] sm:$0xff] }
 0xa45   : > { %v1744_v25 = vmul.f32 %v7911_v14, %v8753_v16  ;;  %v6624_v13 = vcombine.high %v1777_v31, %v1789_v12  ;;  %v1801_v14 = vld [vmem:[%s10531_s7 + $0xe8] sm:$0xff] }
 0xa46   : > { %v7913_v38 = vpop.eup %7912 }
 0xa47   : > { %v1756_v27 = vmul.f32 %v8823_v17, %v1744_v25  ;;  %v1745_v44 = vmul.f32 %v7913_v38, %v8756_v19  ;;  %v1813_v25 = vld [vmem:[%s10531_s7 + $0x148] sm:$0xff]  ;;  %v1802_v38 = vld [vmem:[%s10531_s7 + $0xf0] sm:$0xff] }
 0xa48   : > { %v7915_v18 = vpop.eup %7914 }
 0xa49   : > { %v1757_v20 = vmul.f32 %v8823_v17, %v1745_v44  ;;  %v1768_v21 = vadd.f32 %v8827_v26, %v1756_v27  ;;  %v1746_v28 = vmul.f32 %v7915_v18, %v8761_v37  ;;  %v1814_v27 = vld [vmem:[%s10531_s7 + $0x150] sm:$0xff]  ;;  %v6623_v44 = vcombine.low %v1777_v31, %v1789_v12  ;;  %v1807_v12 = vld [vmem:[%s10531_s7 + $0x118] sm:$0xff] }
 0xa4a   : > { %v7917_v11 = vpop.eup %7916  ;;  %v6625_v18 = vcombine.low %v1778_v43, %v1790_v45 }
 0xa4b   : > { %v1769_v58 = vadd.f32 %v8827_v26, %v1757_v20  ;;  %v1747_v5 = vmul.f32 %v7917_v11, %v8767_v54  ;;  %v1758_v15 = vmul.f32 %v8823_v17, %v1746_v28  ;;  %v6648_v20 = vcombine.high %v1801_v14, %v1813_v25  ;;  %v1780_v28 = vld [vmem:[%s10531_s7 + $0x40] sm:$0xff] }
 0xa4c   : > { %v7919_v36 = vpop.eup %7918  ;;  %v6650_v11 = vcombine.high %v1802_v38, %v1814_v27 }
 0xa4d   : > { %v8865_v39 = vpack.c.bf16 %v1769_v58, %v1768_v21  ;;  %v1759_v16 = vmul.f32 %v8823_v17, %v1747_v5  ;;  %v1740_v40 = vmul.f32 %v7919_v36, %v8773_v59  ;;  %v1797_v59 = vld [vmem:[%s10531_s7 + $0xc8] sm:$0xff]  ;;  %v1770_v7 = vadd.f32 %v8827_v26, %v1758_v15  ;;  %v1779_v21 = vld [vmem:[%s10531_s7 + $0x38] sm:$0xff]  ;;  %v1792_v5 = vld [vmem:[%s10531_s7 + $0xa0] sm:$0xff] }
 0xa4e   : > { %v7921_v19 = vpop.eup %7920  ;;  %v6640_v51 = vcombine.high %v1797_v59, %v1809_v48  ;;  %v1791_v58 = vld [vmem:[%s10531_s7 + $0x98] sm:$0xff]  ;;  %v6647_v36 = vcombine.low %v1801_v14, %v1813_v25 }
 0xa4f   : > { %v1752_v42 = vmul.f32 %v8823_v17, %v1740_v40  ;;  %v1741_v47 = vmul.f32 %v7921_v19, %v8779_v46  ;;  %6663 = vmatmul.mubr.msk.bf16.gmra.mrb[24].mxu1 %vm479_vm0, %v8865_v39  ;;  %v1771_v37 = vadd.f32 %v8827_v26, %v1759_v16  ;;  %v6649_v16 = vcombine.low %v1802_v38, %v1814_v27  ;;  %v1803_v15 = vld [vmem:[%s10531_s7 + $0xf8] sm:$0xff] }
 0xa50   : > { %2138 = vmatprep.mubr.bf16.mxu1 %v10539_v4  ;;  %v6628_v40 = vcombine.high %v1779_v21, %v1791_v58  ;;  %v6630_v19 = vcombine.high %v1780_v28, %v1792_v5 }
 0xa51   : > { %v1753_v54 = vmul.f32 %v8823_v17, %v1741_v47  ;;  %v1764_v46 = vadd.f32 %v8827_v26, %v1752_v42  ;;  %v8886_v50 = vpack.c.bf16 %v1771_v37, %v1770_v7  ;;  %v1775_v17 = vld [vmem:[%s10531_s7 + $0x18] sm:$0xff]  ;;  %v1804_v47 = vld [vmem:[%s10531_s7 + $0x100] sm:$0xff] }
 0xa52   : > { %v6620_v22 = vcombine.high %v1775_v17, %v1787_v56  ;;  %v6619_v9 = vcombine.low %v1775_v17, %v1787_v56  ;;  %v1815_v42 = vld [vmem:[%s10531_s7 + $0x158] sm:$0xff]  ;;  %v1816_v37 = vld [vmem:[%s10531_s7 + $0x160] sm:$0xff]  ;;  %v1794_v17 = vld [vmem:[%s10531_s7 + $0xb0] sm:$0xff] }
 0xa53   : > { %v1765_v49 = vadd.f32 %v8827_v26, %v1753_v54  ;;  %v6639_v26 = vcombine.low %v1797_v59, %v1809_v48  ;;  %v6627_v54 = vcombine.low %v1779_v21, %v1791_v58  ;;  %v6629_v59 = vcombine.low %v1780_v28, %v1792_v5 }
 0xa54   : > { %v6652_v48 = vcombine.high %v1803_v15, %v1815_v42  ;;  %v6654_v7 = vcombine.high %v1804_v47, %v1816_v37  ;;  %v6651_v56 = vcombine.low %v1803_v15, %v1815_v42 }
 0xa55   : > { %v8888_v41 = vpack.c.bf16 %v1765_v49, %v1764_v46  ;;  %v1781_v46 = vld [vmem:[%s10531_s7 + $0x48] sm:$0xff] }
 0xa56   : > { %v1793_v49 = vld [vmem:[%s10531_s7 + $0xa8] sm:$0xff] }
 0xa57   : > { %6661 = vmatmul.mubr.msk.bf16.vlgmr.msra.gmra.mrb[40].mxu0 %vm479_vm0, %v8888_v41  ;;  %6664 = vmatmul.mubr.msk.bf16.gmra.mrb[28].mxu1 %vm479_vm0, %v8886_v50 }
 0xa58   : > { %2150 = vmatpush1.bf16.msra.mxu0 %v6615_v62  ;;  %2181 = vmatprep.mubr.bf16.mxu0 %v10539_v4  ;;  %v1811_v62 = vld [vmem:[%s10531_s7 + $0x138] sm:$0xff] }
 0xa59   : > { %2151 = vmatprep.subr.bf16.mxu0 %v6640_v51  ;;  %2254 = vmatprep.mubr.bf16.mxu1 %v10539_v4  ;;  %v6644_v29 = vcombine.high %v1799_v34, %v1811_v62  ;;  %v6643_v10 = vcombine.low %v1799_v34, %v1811_v62  ;;  %v1782_v51 = vld [vmem:[%s10531_s7 + $0x50] sm:$0xff] }
 0xa5a   : > { %v6634_v63 = vcombine.high %v1782_v51, %v1794_v17  ;;  %v1806_v34 = vld [vmem:[%s10531_s7 + $0x110] sm:$0xff] }
 0xa5b   : > { %v1818_v62 = vld [vmem:[%s10531_s7 + $0x170] sm:$0xff] }
 0xa5c   : > { %2152 = vmatpush1.bf16.msra.mxu0 %v6639_v26  ;;  %v6653_v26 = vcombine.low %v1804_v47, %v1816_v37  ;;  %v6658_v45 = vcombine.high %v1806_v34, %v1818_v62 }
 0xa5d   : > { %2295 = vmatprep.subr.bf16.mxu0 %v6620_v22  ;;  %v6632_v22 = vcombine.high %v1781_v46, %v1793_v49 }
 0xa5f   : > { %6665 = vmatmul.mubr.msk.bf16.vlgmr.msra.gmra.mrb[44].mxu0 %vm479_vm0, %v8888_v41  ;;  %6669 = vmatmul.mubr.msk.bf16.vlgmr.msra.gmra.mrb[32].mxu1 %vm479_vm0, %v8888_v41 }
 0xa60   : > { %2369 = vmatpush1.bf16.msra.mxu1 %v6621_v53  ;;  %2191 = vmatprep.mubr.bf16.mxu0 %v10539_v4  ;;  %v1817_v53 = vld [vmem:[%s10531_s7 + $0x168] sm:$0xff] }
 0xa61   : > { %2264 = vmatprep.mubr.bf16.mxu1 %v10539_v4  ;;  %2370 = vmatprep.subr.bf16.mxu1 %v6646_v1  ;;  %v6631_v1 = vcombine.low %v1781_v46, %v1793_v49  ;;  %v6656_v43 = vcombine.high %v1805_v0, %v1817_v53 }
 0xa62   : > { %2296 = vmatpush1.bf16.msra.mxu0 %v6619_v9  ;;  %v6633_v9 = vcombine.low %v1782_v51, %v1794_v17 }
 0xa63   : > { %2297 = vmatprep.subr.bf16.mxu0 %v6644_v29  ;;  %v1783_v29 = vld [vmem:[%s10531_s7 + $0x58] sm:$0xff] }
 0xa64   : > { %2371 = vmatpush1.bf16.msra.mxu1 %v6645_v23  ;;  %v1795_v23 = vld [vmem:[%s10531_s7 + $0xb8] sm:$0xff] }
 0xa65   : > { %2514 = vmatprep.subr.bf16.mxu1 %v6626_v6  ;;  %v6655_v6 = vcombine.low %v1805_v0, %v1817_v53  ;;  %v6636_v31 = vcombine.high %v1783_v29, %v1795_v23  ;;  %v6635_v14 = vcombine.low %v1783_v29, %v1795_v23 }
 0xa66   : > { %2298 = vmatpush1.bf16.msra.mxu0 %v6643_v10  ;;  %v6657_v10 = vcombine.low %v1806_v34, %v1818_v62 }
 0xa67   : > { %6666 = vmatmul.mubr.msk.bf16.gmra.mrb[48].mxu0 %vm479_vm0, %v8840_v57  ;;  %6670 = vmatmul.mubr.msk.bf16.gmra.mrb[36].mxu1 %vm479_vm0, %v8840_v57 }
 0xa68   : > { %2201 = vmatprep.mubr.bf16.mxu0 %v10539_v4  ;;  %2274 = vmatprep.mubr.bf16.mxu1 %v10539_v4 }
 0xa69   : > { %2441 = vmatprep.subr.bf16.mxu0 %v6624_v13  ;;  %v1819_v13 = vld [vmem:[%s10531_s7 + $0x178] sm:$0xff] }
 0xa6a   : > { %v6660_v25 = vcombine.high %v1807_v12, %v1819_v13  ;;  %v6659_v38 = vcombine.low %v1807_v12, %v1819_v13 }
 0xa6f   : > { %6667 = vmatmul.mubr.msk.bf16.gmra.mrb[52].mxu0 %vm479_vm0, %v8865_v39  ;;  %6671 = vmatmul.mubr.msk.bf16.gmra.mrb[40].mxu1 %vm479_vm0, %v8865_v39 }
 0xa70   : > { %2211 = vmatprep.mubr.bf16.mxu0 %v10539_v4  ;;  %2284 = vmatprep.mubr.bf16.mxu1 %v10539_v4 }
 0xa77   : > { %6668 = vmatmul.mubr.msk.bf16.gmra.mrb[56].mxu0 %vm479_vm0, %v8886_v50  ;;  %6672 = vmatmul.mubr.msk.bf16.gmra.mrb[44].mxu1 %vm479_vm0, %v8886_v50 }
 0xa78   : > { %2327 = vmatprep.mubr.bf16.mxu0 %v10539_v4  ;;  %2400 = vmatprep.mubr.bf16.mxu1 %v10539_v4 }
 0xa7f   : > { %6673 = vmatmul.mubr.msk.bf16.vlgmr.msra.gmra.mrb[60].mxu0 %vm479_vm0, %v8888_v41  ;;  %6677 = vmatmul.mubr.msk.bf16.vlgmr.msra.gmra.mrb[48].mxu1 %vm479_vm0, %v8888_v41 }
 0xa80   : > { %2337 = vmatprep.mubr.bf16.mxu0 %v10539_v4  ;;  %2410 = vmatprep.mubr.bf16.mxu1 %v10539_v4 }
 0xa81   : > { %2442 = vmatpush1.bf16.msra.mxu0 %v6623_v44  ;;  %2515 = vmatpush1.bf16.msra.mxu1 %v6625_v18 }
 0xa82   : > { %2443 = vmatprep.subr.bf16.mxu0 %v6648_v20  ;;  %2516 = vmatprep.subr.bf16.mxu1 %v6650_v11 }
 0xa85   : > { %2444 = vmatpush1.bf16.msra.mxu0 %v6647_v36  ;;  %2517 = vmatpush1.bf16.msra.mxu1 %v6649_v16 }
 0xa86   : > { %2587 = vmatprep.subr.bf16.mxu0 %v6628_v40  ;;  %2660 = vmatprep.subr.bf16.mxu1 %v6630_v19 }
 0xa87   : > { %6674 = vmatmul.mubr.msk.bf16.gmra.mrb[64].mxu0 %vm479_vm0, %v8840_v57  ;;  %6678 = vmatmul.mubr.msk.bf16.gmra.mrb[52].mxu1 %vm479_vm0, %v8840_v57 }
 0xa88   : > { %2347 = vmatprep.mubr.bf16.mxu0 %v10539_v4  ;;  %2420 = vmatprep.mubr.bf16.mxu1 %v10539_v4 }
 0xa8f   : > { %6675 = vmatmul.mubr.msk.bf16.gmra.mrb[68].mxu0 %vm479_vm0, %v8865_v39  ;;  %6679 = vmatmul.mubr.msk.bf16.gmra.mrb[56].mxu1 %vm479_vm0, %v8865_v39 }
 0xa90   : > { %2357 = vmatprep.mubr.bf16.mxu0 %v10539_v4  ;;  %2430 = vmatprep.mubr.bf16.mxu1 %v10539_v4 }
 0xa97   : > { %6676 = vmatmul.mubr.msk.bf16.gmra.mrb[72].mxu0 %vm479_vm0, %v8886_v50  ;;  %6680 = vmatmul.mubr.msk.bf16.gmra.mrb[60].mxu1 %vm479_vm0, %v8886_v50 }
 0xa98   : > { %2473 = vmatprep.mubr.bf16.mxu0 %v10539_v4  ;;  %2546 = vmatprep.mubr.bf16.mxu1 %v10539_v4 }
 0xa9f   : > { %6681 = vmatmul.mubr.msk.bf16.vlgmr.msra.gmra.mrb[76].mxu0 %vm479_vm0, %v8888_v41  ;;  %6685 = vmatmul.mubr.msk.bf16.vlgmr.msra.gmra.mrb[64].mxu1 %vm479_vm0, %v8888_v41 }
 0xaa0   : > { %2483 = vmatprep.mubr.bf16.mxu0 %v10539_v4  ;;  %2556 = vmatprep.mubr.bf16.mxu1 %v10539_v4 }
 0xaa1   : > { %2588 = vmatpush1.bf16.msra.mxu0 %v6627_v54  ;;  %2661 = vmatpush1.bf16.msra.mxu1 %v6629_v59 }
 0xaa2   : > { %2589 = vmatprep.subr.bf16.mxu0 %v6652_v48  ;;  %2662 = vmatprep.subr.bf16.mxu1 %v6654_v7 }
 0xaa5   : > { %2590 = vmatpush1.bf16.msra.mxu0 %v6651_v56  ;;  %2663 = vmatpush1.bf16.msra.mxu1 %v6653_v26 }
 0xaa6   : > { %2733 = vmatprep.subr.bf16.mxu0 %v6632_v22  ;;  %2806 = vmatprep.subr.bf16.mxu1 %v6634_v63 }
 0xaa7   : > { %6682 = vmatmul.mubr.msk.bf16.gmra.mrb[80].mxu0 %vm479_vm0, %v8840_v57  ;;  %6686 = vmatmul.mubr.msk.bf16.gmra.mrb[68].mxu1 %vm479_vm0, %v8840_v57 }
 0xaa8   : > { %2493 = vmatprep.mubr.bf16.mxu0 %v10539_v4  ;;  %2566 = vmatprep.mubr.bf16.mxu1 %v10539_v4 }
 0xaaf   : > { %6683 = vmatmul.mubr.msk.bf16.gmra.mrb[84].mxu0 %vm479_vm0, %v8865_v39  ;;  %6687 = vmatmul.mubr.msk.bf16.gmra.mrb[72].mxu1 %vm479_vm0, %v8865_v39 }
 0xab0   : > { %2503 = vmatprep.mubr.bf16.mxu0 %v10539_v4  ;;  %2576 = vmatprep.mubr.bf16.mxu1 %v10539_v4 }
 0xab7   : > { %6684 = vmatmul.mubr.msk.bf16.gmra.mrb[88].mxu0 %vm479_vm0, %v8886_v50  ;;  %6688 = vmatmul.mubr.msk.bf16.gmra.mrb[76].mxu1 %vm479_vm0, %v8886_v50 }
 0xab8   : > { %2619 = vmatprep.mubr.bf16.mxu0 %v10539_v4  ;;  %2692 = vmatprep.mubr.bf16.mxu1 %v10539_v4 }
 0xabf   : > { %6689 = vmatmul.mubr.msk.bf16.vlgmr.msra.gmra.mrb[92].mxu0 %vm479_vm0, %v8888_v41  ;;  %6693 = vmatmul.mubr.msk.bf16.vlgmr.msra.gmra.mrb[80].mxu1 %vm479_vm0, %v8888_v41 }
 0xac0   : > { %2629 = vmatprep.mubr.bf16.mxu0 %v10539_v4  ;;  %2702 = vmatprep.mubr.bf16.mxu1 %v10539_v4 }
 0xac1   : > { %2734 = vmatpush1.bf16.msra.mxu0 %v6631_v1  ;;  %2807 = vmatpush1.bf16.msra.mxu1 %v6633_v9 }
 0xac2   : > { %2735 = vmatprep.subr.bf16.mxu0 %v6656_v43  ;;  %2808 = vmatprep.subr.bf16.mxu1 %v6658_v45 }
 0xac5   : > { %2736 = vmatpush1.bf16.msra.mxu0 %v6655_v6  ;;  %2809 = vmatpush1.bf16.msra.mxu1 %v6657_v10 }
 0xac6   : > { %2879 = vmatprep.subr.bf16.mxu0 %v6636_v31 }
 0xac7   : > { %6690 = vmatmul.mubr.msk.bf16.gmra.mrb[96].mxu0 %vm479_vm0, %v8840_v57  ;;  %6694 = vmatmul.mubr.msk.bf16.gmra.mrb[84].mxu1 %vm479_vm0, %v8840_v57 }
 0xac8   : > { %2639 = vmatprep.mubr.bf16.mxu0 %v10539_v4  ;;  %2712 = vmatprep.mubr.bf16.mxu1 %v10539_v4 }
 0xacf   : > { %6691 = vmatmul.mubr.msk.bf16.gmra.mrb[100].mxu0 %vm479_vm0, %v8865_v39  ;;  %6695 = vmatmul.mubr.msk.bf16.gmra.mrb[88].mxu1 %vm479_vm0, %v8865_v39 }
 0xad0   : > { %2649 = vmatprep.mubr.bf16.mxu0 %v10539_v4  ;;  %2722 = vmatprep.mubr.bf16.mxu1 %v10539_v4 }
 0xad7   : > { %6692 = vmatmul.mubr.msk.bf16.gmra.mrb[104].mxu0 %vm479_vm0, %v8886_v50  ;;  %6696 = vmatmul.mubr.msk.bf16.gmra.mrb[92].mxu1 %vm479_vm0, %v8886_v50 }
 0xad8   : > { %2765 = vmatprep.mubr.bf16.mxu0 %v10539_v4  ;;  %2838 = vmatprep.mubr.bf16.mxu1 %v10539_v4 }
 0xadf   : > { %6697 = vmatmul.mubr.msk.bf16.vlgmr.msra.gmra.mrb[108].mxu0 %vm479_vm0, %v8888_v41  ;;  %6701 = vmatmul.mubr.msk.bf16.vlgmr.msra.gmra.mrb[96].mxu1 %vm479_vm0, %v8888_v41 }
 0xae0   : > { %2775 = vmatprep.mubr.bf16.mxu0 %v10539_v4  ;;  %2848 = vmatprep.mubr.bf16.mxu1 %v10539_v4 }
 0xae1   : > { %2880 = vmatpush1.bf16.msra.mxu0 %v6635_v14 }
 0xae2   : > { %2881 = vmatprep.subr.bf16.mxu0 %v6660_v25 }
 0xae5   : > { %2882 = vmatpush1.bf16.msra.mxu0 %v6659_v38 }
 0xae7   : > { %6698 = vmatmul.mubr.msk.bf16.gmra.mrb[112].mxu0 %vm479_vm0, %v8840_v57  ;;  %6702 = vmatmul.mubr.msk.bf16.gmra.mrb[100].mxu1 %vm479_vm0, %v8840_v57 }
 0xae8   : > { %2785 = vmatprep.mubr.bf16.mxu0 %v10539_v4  ;;  %2858 = vmatprep.mubr.bf16.mxu1 %v10539_v4 }
 0xaef   : > { %6699 = vmatmul.mubr.msk.bf16.gmra.mrb[116].mxu0 %vm479_vm0, %v8865_v39  ;;  %6703 = vmatmul.mubr.msk.bf16.gmra.mrb[104].mxu1 %vm479_vm0, %v8865_v39 }
 0xaf0   : > { %2795 = vmatprep.mubr.bf16.mxu0 %v10539_v4  ;;  %2868 = vmatprep.mubr.bf16.mxu1 %v10539_v4 }
 0xaf7   : > { %6700 = vmatmul.mubr.msk.bf16.gmra.mrb[120].mxu0 %vm479_vm0, %v8886_v50  ;;  %6704 = vmatmul.mubr.msk.bf16.gmra.mrb[108].mxu1 %vm479_vm0, %v8886_v50 }
 0xaf8   : > { %2911 = vmatprep.mubr.bf16.mxu0 %v10539_v4 }
 0xaff   : > { %6705 = vmatmul.mubr.msk.bf16.vlgmr.msra.gmra.mrb[124].mxu0 %vm479_vm0, %v8888_v41 }
 0xb00   : > { %2921 = vmatprep.mubr.bf16.mxu0 %v10539_v4 }
 0xb07   : > { %6706 = vmatmul.mubr.msk.bf16.gmra.mrb[128].mxu0 %vm479_vm0, %v8840_v57 }
 0xb08   : > { %2931 = vmatprep.mubr.bf16.mxu0 %v10539_v4 }
 0xb0f   : > { %6707 = vmatmul.mubr.msk.bf16.gmra.mrb[132].mxu0 %vm479_vm0, %v8865_v39 }
 0xb10   : > { %2941 = vmatprep.mubr.bf16.mxu0 %v10539_v4 }
 0xb11   : > { %v9131_v27 = vpop.f32.mrb[20].mxu1 }
 0xb12   : > { %v9133_v44 = vpop.f32.mrb[21].mxu1 }
 0xb13   : > { %v9135_v18 = vpop.f32.mrb[22].mxu1 }
 0xb14   : > { %v9139_v20 = vpop.f32.mrb[23].mxu1 }
 0xb17   : > { %6708 = vmatmul.mubr.msk.bf16.gmra.mrb[136].mxu0 %vm479_vm0, %v8886_v50 }
 0xb22   : > { %v9145_v39 = vpop.f32.mrb[24].mxu1 }
 0xb23   : > { %v9147_v11 = vpop.f32.mrb[25].mxu1 }
 0xb24   : > { %v9149_v21 = vpop.f32.mrb[26].mxu1 }
 0xb25   : > { %v9153_v28 = vpop.f32.mrb[27].mxu1 }
 0xb2a   : > { %v2110_v36 = vpop.f32.mrb[40].mxu0  ;;  %v9157_v16 = vpop.f32.mrb[28].mxu1 }
 0xb2b   : > { %v2112_v40 = vpop.f32.mrb[41].mxu0  ;;  %v9159_v19 = vpop.f32.mrb[29].mxu1 }
 0xb2c   : > { %v2114_v50 = vpop.f32.mrb[42].mxu0  ;;  %v9161_v15 = vpop.f32.mrb[30].mxu1 }
 0xb2d   : > { %v2952_v42 = vpack.c.bf16 %v2114_v50, %v2110_v36  ;;  %v2116_v37 = vpop.f32.mrb[43].mxu0  ;;  %v9165_v54 = vpop.f32.mrb[31].mxu1 }
 0xb2e   : > { %v2953_v59 = vpack.c.bf16 %v2116_v37, %v2112_v40 }
 0xb2f   : > { %7188 = vmatprep.mubr.bf16.mxu1 %v2952_v42 }
 0xb30   : > { %7220 = vmatprep.mubr.bf16.mxu0 %v2953_v59 }
 0xb32   : > { %v9169_v7 = vpop.f32.mrb[44].mxu0  ;;  %v9171_v46 = vpop.f32.mrb[32].mxu1 }
 0xb33   : > { %10636 = vst [vmem:[#allocation14_spill] sm:$0xff] %v9171_v46  ;;  %v9173_v49 = vpop.f32.mrb[45].mxu0  ;;  %v9175_v51 = vpop.f32.mrb[33].mxu1 }
 0xb34   : > { %10637 = vst [vmem:[#allocation15_spill] sm:$0xff] %v9175_v51  ;;  %v9177_v17 = vpop.f32.mrb[46].mxu0  ;;  %v9179_v56 = vpop.f32.mrb[34].mxu1 }
 0xb35   : > { %10638 = vst [vmem:[#allocation16_spill] sm:$0xff] %v9179_v56  ;;  %v9185_v63 = vpop.f32.mrb[47].mxu0  ;;  %v9187_v0 = vpop.f32.mrb[35].mxu1 }
 0xb36   : > { %10639 = vst [vmem:[#allocation17_spill] sm:$0xff] %v9187_v0 }
 0xb3a   : > { %v9193_v62 = vpop.f32.mrb[48].mxu0  ;;  %v9195_v1 = vpop.f32.mrb[36].mxu1 }
 0xb3b   : > { %10640 = vst [vmem:[#allocation18_spill] sm:$0xff] %v9195_v1  ;;  %v9197_v9 = vpop.f32.mrb[49].mxu0  ;;  %v9199_v43 = vpop.f32.mrb[37].mxu1 }
 0xb3c   : > { %10641 = vst [vmem:[#allocation19_spill] sm:$0xff] %v9199_v43  ;;  %v9201_v45 = vpop.f32.mrb[50].mxu0  ;;  %v9203_v29 = vpop.f32.mrb[38].mxu1 }
 0xb3d   : > { %10642 = vst [vmem:[#allocation20_spill] sm:$0xff] %v9203_v29  ;;  %v9209_v10 = vpop.f32.mrb[51].mxu0  ;;  %v9211_v31 = vpop.f32.mrb[39].mxu1 }
 0xb3e   : > { %10643 = vst [vmem:[#allocation21_spill] sm:$0xff] %v9211_v31 }
 0xb42   : > { %v9217_v14 = vpop.f32.mrb[52].mxu0  ;;  %v9219_v25 = vpop.f32.mrb[40].mxu1 }
 0xb43   : > { %10644 = vst [vmem:[#allocation22_spill] sm:$0xff] %v9219_v25  ;;  %v9221_v38 = vpop.f32.mrb[53].mxu0  ;;  %v9223_v36 = vpop.f32.mrb[41].mxu1 }
 0xb44   : > { %10645 = vst [vmem:[#allocation23_spill] sm:$0xff] %v9223_v36  ;;  %v9225_v40 = vpop.f32.mrb[54].mxu0  ;;  %v9227_v50 = vpop.f32.mrb[42].mxu1 }
 0xb45   : > { %10646 = vst [vmem:[#allocation24_spill] sm:$0xff] %v9227_v50  ;;  %v9233_v59 = vpop.f32.mrb[55].mxu0  ;;  %v9235_v4 = vpop.f32.mrb[43].mxu1 }
 0xb46   : > { %10647 = vst [vmem:[#allocation25_spill] sm:$0xff] %v9235_v4 }
 0xb4a   : > { %v9241_v6 = vpop.f32.mrb[56].mxu0  ;;  %v9243_v22 = vpop.f32.mrb[44].mxu1 }
 0xb4b   : > { %10648 = vst [vmem:[#allocation26_spill] sm:$0xff] %v9243_v22  ;;  %v9245_v12 = vpop.f32.mrb[57].mxu0  ;;  %v9247_v53 = vpop.f32.mrb[45].mxu1 }
 0xb4c   : > { %10649 = vst [vmem:[#allocation27_spill] sm:$0xff] %v9245_v12  ;;  %10650 = vst [vmem:[#allocation28_spill] sm:$0xff] %v9247_v53  ;;  %v9249_v42 = vpop.f32.mrb[58].mxu0  ;;  %v9251_v37 = vpop.f32.mrb[46].mxu1 }
 0xb4d   : > { %10651 = vst [vmem:[#allocation29_spill] sm:$0xff] %v9251_v37  ;;  %v9257_v26 = vpop.f32.mrb[59].mxu0  ;;  %v9259_v34 = vpop.f32.mrb[47].mxu1 }
 0xb4e   : > { %10652 = vst [vmem:[#allocation30_spill] sm:$0xff] %v9257_v26  ;;  %10653 = vst [vmem:[#allocation31_spill] sm:$0xff] %v9259_v34 }
 0xb52   : > { %v9265_v5 = vpop.f32.mrb[60].mxu0  ;;  %v2402_v57 = vpop.f32.mrb[48].mxu1 }
 0xb53   : > { %10654 = vst [vmem:[#allocation32_spill] sm:$0xff] %v9265_v5  ;;  %v9267_v58 = vpop.f32.mrb[61].mxu0  ;;  %v2404_v41 = vpop.f32.mrb[49].mxu1 }
 0xb54   : > { %10655 = vst [vmem:[#allocation33_spill] sm:$0xff] %v9267_v58  ;;  %v9269_v23 = vpop.f32.mrb[62].mxu0  ;;  %v2406_v52 = vpop.f32.mrb[50].mxu1 }
 0xb55   : > { %10656 = vst [vmem:[#allocation34_spill] sm:$0xff] %v9269_v23  ;;  %v2960_v33 = vpack.c.bf16 %v2406_v52, %v2402_v57  ;;  %v9273_v30 = vpop.f32.mrb[63].mxu0  ;;  %v2408_v61 = vpop.f32.mrb[51].mxu1 }
 0xb56   : > { %10657 = vst [vmem:[#allocation35_spill] sm:$0xff] %v9273_v30  ;;  %v2961_v47 = vpack.c.bf16 %v2408_v61, %v2404_v41 }
 0xb57   : > { %7180 = vmatprep.subr.bf16.mxu1 %v2960_v33 }
 0xb58   : > { %7181 = vmatpush3.bf16.xpose.msra.mxu1 %v2960_v33  ;;  %7212 = vmatprep.subr.bf16.mxu0 %v2961_v47 }
 0xb59   : > { %7213 = vmatpush3.bf16.xpose.msra.mxu0 %v2961_v47 }
 0xb5a   : > { %v9277_v2 = vpop.f32.mrb[64].mxu0  ;;  %v2412_v55 = vpop.f32.mrb[52].mxu1 }
 0xb5b   : > { %10658 = vst [vmem:[#allocation36_spill] sm:$0xff] %v9277_v2  ;;  %v9279_v60 = vpop.f32.mrb[65].mxu0  ;;  %v2414_v8 = vpop.f32.mrb[53].mxu1 }
 0xb5c   : > { %10659 = vst [vmem:[#allocation37_spill] sm:$0xff] %v9279_v60  ;;  %v9281_v35 = vpop.f32.mrb[66].mxu0  ;;  %v2416_v52 = vpop.f32.mrb[54].mxu1 }
 0xb5d   : > { %10660 = vst [vmem:[#allocation38_spill] sm:$0xff] %v9281_v35  ;;  %v2984_v13 = vpack.c.bf16 %v2416_v52, %v2412_v55  ;;  %v9285_v3 = vpop.f32.mrb[67].mxu0  ;;  %v2418_v61 = vpop.f32.mrb[55].mxu1 }
 0xb5e   : > { %10661 = vst [vmem:[#allocation39_spill] sm:$0xff] %v9285_v3  ;;  %v2985_v41 = vpack.c.bf16 %v2418_v61, %v2414_v8 }
 0xb5f   : > { %7182 = vmatprep.subr.bf16.mxu1 %v2984_v13 }
 0xb60   : > { %7183 = vmatpush3.bf16.xpose.msra.mxu1 %v2984_v13  ;;  %7214 = vmatprep.subr.bf16.mxu0 %v2985_v41 }
 0xb61   : > { %7215 = vmatpush3.bf16.xpose.msra.mxu0 %v2985_v41 }
 0xb62   : > { %v9289_v47 = vpop.f32.mrb[68].mxu0  ;;  %v2422_v48 = vpop.f32.mrb[56].mxu1 }
 0xb63   : > { %10662 = vst [vmem:[#allocation40_spill] sm:$0xff] %v9289_v47  ;;  %v9291_v32 = vpop.f32.mrb[69].mxu0  ;;  %v2424_v24 = vpop.f32.mrb[57].mxu1 }
 0xb64   : > { %10663 = vst [vmem:[#allocation41_spill] sm:$0xff] %v9291_v32  ;;  %v9293_v58 = vpop.f32.mrb[70].mxu0  ;;  %v2426_v55 = vpop.f32.mrb[58].mxu1 }
 0xb65   : > { %10664 = vst [vmem:[#allocation42_spill] sm:$0xff] %v9293_v58  ;;  %v3008_v57 = vpack.c.bf16 %v2426_v55, %v2422_v48  ;;  %v9297_v30 = vpop.f32.mrb[71].mxu0  ;;  %v2428_v8 = vpop.f32.mrb[59].mxu1 }
 0xb66   : > { %10665 = vst [vmem:[#allocation43_spill] sm:$0xff] %v9297_v30  ;;  %v3009_v61 = vpack.c.bf16 %v2428_v8, %v2424_v24 }
 0xb67   : > { %7184 = vmatprep.subr.bf16.mxu1 %v3008_v57 }
 0xb68   : > { %7185 = vmatpush3.bf16.xpose.msra.mxu1 %v3008_v57  ;;  %7216 = vmatprep.subr.bf16.mxu0 %v3009_v61 }
 0xb69   : > { %7217 = vmatpush3.bf16.xpose.msra.mxu0 %v3009_v61 }
 0xb6a   : > { %v9301_v41 = vpop.f32.mrb[72].mxu0  ;;  %v2432_v33 = vpop.f32.mrb[60].mxu1 }
 0xb6b   : > { %10666 = vst [vmem:[#allocation44_spill] sm:$0xff] %v9301_v41  ;;  %v9303_v60 = vpop.f32.mrb[73].mxu0  ;;  %v2434_v3 = vpop.f32.mrb[61].mxu1 }
 0xb6c   : > { %10667 = vst [vmem:[#allocation45_spill] sm:$0xff] %v9303_v60  ;;  %v9305_v2 = vpop.f32.mrb[74].mxu0  ;;  %v2436_v48 = vpop.f32.mrb[62].mxu1 }
 0xb6d   : > { %10668 = vst [vmem:[#allocation46_spill] sm:$0xff] %v9305_v2  ;;  %v3032_v52 = vpack.c.bf16 %v2436_v48, %v2432_v33  ;;  %v9309_v47 = vpop.f32.mrb[75].mxu0  ;;  %v2438_v24 = vpop.f32.mrb[63].mxu1 }
 0xb6e   : > { %10669 = vst [vmem:[#allocation47_spill] sm:$0xff] %v9309_v47  ;;  %v3033_v8 = vpack.c.bf16 %v2438_v24, %v2434_v3  ;;  %v10672_v3 = vpack.c.bf16 %v9135_v18, %v9131_v27 }
 0xb6f   : > { %7186 = vmatprep.subr.bf16.mxu1 %v3032_v52 }
 0xb70   : > { %7187 = vmatpush3.bf16.xpose.msra.mxu1 %v3032_v52  ;;  %7218 = vmatprep.subr.bf16.mxu0 %v3033_v8  ;;  %v10673_v52 = vpack.c.bf16 %v9149_v21, %v9145_v39 }
 0xb71   : > { %7219 = vmatpush3.bf16.xpose.msra.mxu0 %v3033_v8 }
 0xb72   : > { %v2475_v61 = vpop.f32.mrb[76].mxu0  ;;  %v2548_v13 = vpop.f32.mrb[64].mxu1 }
 0xb73   : > { %v2477_v32 = vpop.f32.mrb[77].mxu0  ;;  %v2550_v30 = vpop.f32.mrb[65].mxu1 }
 0xb74   : > { %v2479_v58 = vpop.f32.mrb[78].mxu0  ;;  %v2552_v35 = vpop.f32.mrb[66].mxu1 }
 0xb75   : > { %v9313_v5 = vpack.c.bf16 %v2479_v58, %v2475_v61  ;;  %v9315_v33 = vpack.c.bf16 %v2552_v35, %v2548_v13  ;;  %v2481_v48 = vpop.f32.mrb[79].mxu0  ;;  %v2554_v55 = vpop.f32.mrb[67].mxu1  ;;  %v10674_v58 = vpack.c.bf16 %v9139_v20, %v9133_v44  ;;  %v10675_v35 = vpack.c.bf16 %v9153_v28, %v9147_v11 }
 0xb76   : > { %v9317_v41 = vpack.c.bf16 %v2481_v48, %v2477_v32  ;;  %v9319_v57 = vpack.c.bf16 %v2554_v55, %v2550_v30  ;;  %v10678_v20 = vpack.c.bf16 %v9161_v15, %v9157_v16  ;;  %v10679_v11 = vpack.c.bf16 %v9165_v54, %v9159_v19 }
 0xb77   : > { %10670 = vst [vmem:[#allocation48_spill] sm:$0xff] %v9315_v33  ;;  %7189 = vmatmul.mubr.bf16.vlgmr.msra.gmra.mrb[112].mxu1 %v10672_v3 }
 0xb78   : > { %10671 = vst [vmem:[#allocation49_spill] sm:$0xff] %v9319_v57  ;;  %7192 = vmatprep.mubr.bf16.mxu1 %v10673_v52  ;;  %7221 = vmatmul.mubr.bf16.vlgmr.msra.gmra.mrb[140].mxu0 %v10674_v58 }
 0xb79   : > { %7224 = vmatprep.mubr.bf16.mxu0 %v10675_v35 }
 0xb7a   : > { %v2485_v32 = vpop.f32.mrb[80].mxu0  ;;  %v2558_v13 = vpop.f32.mrb[68].mxu1 }
 0xb7b   : > { %v2487_v30 = vpop.f32.mrb[81].mxu0  ;;  %v2560_v55 = vpop.f32.mrb[69].mxu1 }
 0xb7c   : > { %v2489_v24 = vpop.f32.mrb[82].mxu0  ;;  %v2562_v8 = vpop.f32.mrb[70].mxu1 }
 0xb7d   : > { %v9333_v27 = vpack.c.bf16 %v2489_v24, %v2485_v32  ;;  %v9335_v18 = vpack.c.bf16 %v2562_v8, %v2558_v13  ;;  %v2491_v39 = vpop.f32.mrb[83].mxu0  ;;  %v2564_v21 = vpop.f32.mrb[71].mxu1 }
 0xb7e   : > { %v9337_v61 = vpack.c.bf16 %v2491_v39, %v2487_v30  ;;  %v9339_v44 = vpack.c.bf16 %v2564_v21, %v2560_v55 }
 0xb7f   : > { %10676 = vst [vmem:[#allocation50_spill] sm:$0xff] %v9335_v18  ;;  %7193 = vmatmul.mubr.bf16.gmra.mrb[116].mxu1 %v10678_v20 }
 0xb80   : > { %10677 = vst [vmem:[#allocation51_spill] sm:$0xff] %v9339_v44  ;;  %7225 = vmatmul.mubr.bf16.gmra.mrb[144].mxu0 %v10679_v11 }
 0xb82   : > { %v2495_v28 = vpop.f32.mrb[84].mxu0  ;;  %v2568_v48 = vpop.f32.mrb[72].mxu1 }
 0xb83   : > { %v2497_v3 = vpop.f32.mrb[85].mxu0  ;;  %v2570_v52 = vpop.f32.mrb[73].mxu1 }
 0xb84   : > { %v2499_v58 = vpop.f32.mrb[86].mxu0  ;;  %v2572_v35 = vpop.f32.mrb[74].mxu1 }
 0xb85   : > { %v9347_v32 = vpack.c.bf16 %v2499_v58, %v2495_v28  ;;  %v9349_v13 = vpack.c.bf16 %v2572_v35, %v2568_v48  ;;  %v2501_v30 = vpop.f32.mrb[87].mxu0  ;;  %v2574_v55 = vpop.f32.mrb[75].mxu1 }
 0xb86   : > { %v9351_v24 = vpack.c.bf16 %v2501_v30, %v2497_v3  ;;  %v9353_v16 = vpack.c.bf16 %v2574_v55, %v2570_v52 }
 0xb87   : > { %10680 = vst [vmem:[#allocation52_spill] sm:$0xff] %v9349_v13 }
 0xb88   : > { %10681 = vst [vmem:[#allocation53_spill] sm:$0xff] %v9353_v16 }
 0xb8a   : > { %v2505_v15 = vpop.f32.mrb[88].mxu0  ;;  %v2578_v8 = vpop.f32.mrb[76].mxu1 }
 0xb8b   : > { %v2507_v19 = vpop.f32.mrb[89].mxu0  ;;  %v2580_v54 = vpop.f32.mrb[77].mxu1 }
 0xb8c   : > { %v2509_v39 = vpop.f32.mrb[90].mxu0  ;;  %v2582_v21 = vpop.f32.mrb[78].mxu1 }
 0xb8d   : > { %v9355_v20 = vpack.c.bf16 %v2509_v39, %v2505_v15  ;;  %v9357_v11 = vpack.c.bf16 %v2582_v21, %v2578_v8  ;;  %v2511_v28 = vpop.f32.mrb[91].mxu0  ;;  %v2584_v58 = vpop.f32.mrb[79].mxu1 }
 0xb8e   : > { %v9359_v48 = vpack.c.bf16 %v2511_v28, %v2507_v19  ;;  %v9361_v35 = vpack.c.bf16 %v2584_v58, %v2580_v54 }
 0xb8f   : > { %10682 = vst [vmem:[#allocation54_spill] sm:$0xff] %v9357_v11 }
 0xb90   : > { %10683 = vst [vmem:[#allocation55_spill] sm:$0xff] %v9361_v35 }
 0xb92   : > { %v2621_v3 = vpop.f32.mrb[92].mxu0  ;;  %v2694_v30 = vpop.f32.mrb[80].mxu1 }
 0xb93   : > { %v2623_v52 = vpop.f32.mrb[93].mxu0  ;;  %v2696_v55 = vpop.f32.mrb[81].mxu1 }
 0xb94   : > { %v2625_v60 = vpop.f32.mrb[94].mxu0  ;;  %v2698_v47 = vpop.f32.mrb[82].mxu1 }
 0xb95   : > { %v9363_v2 = vpack.c.bf16 %v2625_v60, %v2621_v3  ;;  %v2968_v23 = vpack.c.bf16 %v2698_v47, %v2694_v30  ;;  %v2627_v53 = vpop.f32.mrb[95].mxu0  ;;  %v2700_v15 = vpop.f32.mrb[83].mxu1 }
 0xb96   : > { %v9365_v39 = vpack.c.bf16 %v2627_v53, %v2623_v52  ;;  %v9367_v8 = vpack.c.bf16 %v2700_v15, %v2696_v55 }
 0xb97   : > { %10684 = vst [vmem:[#allocation56_spill] sm:$0xff] %v9363_v2  ;;  %7196 = vmatprep.subr.bf16.mxu1 %v2968_v23 }
 0xb98   : > { %10685 = vst [vmem:[#allocation57_spill] sm:$0xff] %v9365_v39  ;;  %7197 = vmatpush3.bf16.msra.mxu1 %v2968_v23 }
 0xb9a   : > { %v2631_v19 = vpop.f32.mrb[96].mxu0  ;;  %v2704_v54 = vpop.f32.mrb[84].mxu1 }
 0xb9b   : > { %v2633_v21 = vpop.f32.mrb[97].mxu0  ;;  %v2706_v28 = vpop.f32.mrb[85].mxu1 }
 0xb9c   : > { %v2635_v58 = vpop.f32.mrb[98].mxu0  ;;  %v2708_v34 = vpop.f32.mrb[86].mxu1 }
 0xb9d   : > { %v9369_v36 = vpack.c.bf16 %v2635_v58, %v2631_v19  ;;  %v2992_v4 = vpack.c.bf16 %v2708_v34, %v2704_v54  ;;  %v2637_v60 = vpop.f32.mrb[99].mxu0  ;;  %v2710_v3 = vpop.f32.mrb[87].mxu1 }
 0xb9e   : > { %v9371_v47 = vpack.c.bf16 %v2637_v60, %v2633_v21  ;;  %v9373_v30 = vpack.c.bf16 %v2710_v3, %v2706_v28 }
 0xb9f   : > { %10686 = vst [vmem:[#allocation58_spill] sm:$0xff] %v9369_v36  ;;  %7198 = vmatprep.subr.bf16.mxu1 %v2992_v4 }
 0xba0   : > { %10687 = vst [vmem:[#allocation59_spill] sm:$0xff] %v9371_v47  ;;  %7199 = vmatpush3.bf16.msra.mxu1 %v2992_v4 }
 0xba2   : > { %v2641_v53 = vpop.f32.mrb[100].mxu0  ;;  %v2714_v52 = vpop.f32.mrb[88].mxu1 }
 0xba3   : > { %v2643_v23 = vpop.f32.mrb[101].mxu0  ;;  %v2716_v55 = vpop.f32.mrb[89].mxu1 }
 0xba4   : > { %v2645_v15 = vpop.f32.mrb[102].mxu0  ;;  %v2718_v39 = vpop.f32.mrb[90].mxu1 }
 0xba5   : > { %v9375_v2 = vpack.c.bf16 %v2645_v15, %v2641_v53  ;;  %v3016_v43 = vpack.c.bf16 %v2718_v39, %v2714_v52  ;;  %v2647_v19 = vpop.f32.mrb[103].mxu0  ;;  %v2720_v58 = vpop.f32.mrb[91].mxu1 }
 0xba6   : > { %v9377_v34 = vpack.c.bf16 %v2647_v19, %v2643_v23  ;;  %v9379_v54 = vpack.c.bf16 %v2720_v58, %v2716_v55 }
 0xba7   : > { %10688 = vst [vmem:[#allocation60_spill] sm:$0xff] %v9375_v2  ;;  %7200 = vmatprep.subr.bf16.mxu1 %v3016_v43 }
 0xba8   : > { %10689 = vst [vmem:[#allocation61_spill] sm:$0xff] %v9377_v34  ;;  %7201 = vmatpush3.bf16.msra.mxu1 %v3016_v43 }
 0xbaa   : > { %v2651_v21 = vpop.f32.mrb[104].mxu0  ;;  %v2724_v28 = vpop.f32.mrb[92].mxu1 }
 0xbab   : > { %v2653_v4 = vpop.f32.mrb[105].mxu0  ;;  %v2726_v60 = vpop.f32.mrb[93].mxu1 }
 0xbac   : > { %v2655_v3 = vpop.f32.mrb[106].mxu0  ;;  %v2728_v47 = vpop.f32.mrb[94].mxu1 }
 0xbad   : > { %v9381_v36 = vpack.c.bf16 %v2655_v3, %v2651_v21  ;;  %v3040_v31 = vpack.c.bf16 %v2728_v47, %v2724_v28  ;;  %v2657_v53 = vpop.f32.mrb[107].mxu0  ;;  %v2730_v15 = vpop.f32.mrb[95].mxu1 }
 0xbae   : > { %v9383_v39 = vpack.c.bf16 %v2657_v53, %v2653_v4  ;;  %v9385_v52 = vpack.c.bf16 %v2730_v15, %v2726_v60 }
 0xbaf   : > { %10690 = vst [vmem:[#allocation62_spill] sm:$0xff] %v9381_v36  ;;  %7202 = vmatprep.subr.bf16.mxu1 %v3040_v31 }
 0xbb0   : > { %10691 = vst [vmem:[#allocation63_spill] sm:$0xff] %v9383_v39  ;;  %7203 = vmatpush3.bf16.msra.mxu1 %v3040_v31 }
 0xbb1   : > { %7228 = vmatprep.subr.bf16.mxu1 %v9367_v8 }
 0xbb2   : > { %v2767_v43 = vpop.f32.mrb[108].mxu0  ;;  %v2840_v23 = vpop.f32.mrb[96].mxu1 }
 0xbb3   : > { %v2769_v55 = vpop.f32.mrb[109].mxu0  ;;  %v2842_v19 = vpop.f32.mrb[97].mxu1 }
 0xbb4   : > { %v2771_v58 = vpop.f32.mrb[110].mxu0  ;;  %v2844_v34 = vpop.f32.mrb[98].mxu1 }
 0xbb5   : > { %v9388_v2 = vpack.c.bf16 %v2771_v58, %v2767_v43  ;;  %v9390_v21 = vpack.c.bf16 %v2844_v34, %v2840_v23  ;;  %v2773_v47 = vpop.f32.mrb[111].mxu0  ;;  %v2846_v28 = vpop.f32.mrb[99].mxu1 }
 0xbb6   : > { %v9392_v4 = vpack.c.bf16 %v2773_v47, %v2769_v55  ;;  %v9394_v60 = vpack.c.bf16 %v2846_v28, %v2842_v19 }
 0xbb7   : > { %10692 = vst [vmem:[#allocation64_spill] sm:$0xff] %v9390_v21 }
 0xbb8   : > { %10693 = vst [vmem:[#allocation65_spill] sm:$0xff] %v9394_v60 }
 0xbba   : > { %v2777_v3 = vpop.f32.mrb[112].mxu0  ;;  %v2850_v31 = vpop.f32.mrb[100].mxu1 }
 0xbbb   : > { %v2779_v53 = vpop.f32.mrb[113].mxu0  ;;  %v2852_v15 = vpop.f32.mrb[101].mxu1 }
 0xbbc   : > { %v2781_v39 = vpop.f32.mrb[114].mxu0  ;;  %v2854_v36 = vpop.f32.mrb[102].mxu1 }
 0xbbd   : > { %v9396_v35 = vpack.c.bf16 %v2781_v39, %v2777_v3  ;;  %v9398_v16 = vpack.c.bf16 %v2854_v36, %v2850_v31  ;;  %v2783_v43 = vpop.f32.mrb[115].mxu0  ;;  %v2856_v58 = vpop.f32.mrb[103].mxu1 }
 0xbbe   : > { %v9400_v34 = vpack.c.bf16 %v2783_v43, %v2779_v53  ;;  %v9402_v23 = vpack.c.bf16 %v2856_v58, %v2852_v15 }
 0xbbf   : > { %10694 = vst [vmem:[#allocation66_spill] sm:$0xff] %v9398_v16 }
 0xbc0   : > { %10695 = vst [vmem:[#allocation67_spill] sm:$0xff] %v9400_v34  ;;  %10696 = vst [vmem:[#allocation68_spill] sm:$0xff] %v9402_v23 }
 0xbc2   : > { %v2787_v55 = vpop.f32.mrb[116].mxu0  ;;  %v2860_v47 = vpop.f32.mrb[104].mxu1 }
 0xbc3   : > { %v2789_v19 = vpop.f32.mrb[117].mxu0  ;;  %v2862_v28 = vpop.f32.mrb[105].mxu1 }
 0xbc4   : > { %v2791_v60 = vpop.f32.mrb[118].mxu0  ;;  %v2864_v51 = vpop.f32.mrb[106].mxu1 }
 0xbc5   : > { %v9404_v0 = vpack.c.bf16 %v2791_v60, %v2787_v55  ;;  %v9406_v22 = vpack.c.bf16 %v2864_v51, %v2860_v47  ;;  %v2793_v39 = vpop.f32.mrb[119].mxu0  ;;  %v2866_v3 = vpop.f32.mrb[107].mxu1 }
 0xbc6   : > { %v9408_v36 = vpack.c.bf16 %v2793_v39, %v2789_v19  ;;  %v9410_v31 = vpack.c.bf16 %v2866_v3, %v2862_v28 }
 0xbc7   : > { %10697 = vst [vmem:[#allocation69_spill] sm:$0xff] %v9406_v22 }
 0xbc8   : > { %10698 = vst [vmem:[#allocation70_spill] sm:$0xff] %v9408_v36  ;;  %10699 = vst [vmem:[#allocation71_spill] sm:$0xff] %v9410_v31 }
 0xbca   : > { %v2797_v53 = vpop.f32.mrb[120].mxu0  ;;  %v2870_v43 = vpop.f32.mrb[108].mxu1 }
 0xbcb   : > { %v2799_v15 = vpop.f32.mrb[121].mxu0  ;;  %v2872_v58 = vpop.f32.mrb[109].mxu1 }
 0xbcc   : > { %v2801_v16 = vpop.f32.mrb[122].mxu0  ;;  %v2874_v23 = vpop.f32.mrb[110].mxu1 }
 0xbcd   : > { %v9412_v37 = vpack.c.bf16 %v2801_v16, %v2797_v53  ;;  %v9414_v44 = vpack.c.bf16 %v2874_v23, %v2870_v43  ;;  %v2803_v60 = vpop.f32.mrb[123].mxu0  ;;  %v2876_v55 = vpop.f32.mrb[111].mxu1 }
 0xbce   : > { %v9416_v51 = vpack.c.bf16 %v2803_v60, %v2799_v15  ;;  %v9418_v47 = vpack.c.bf16 %v2876_v55, %v2872_v58 }
 0xbcf   : > { %10700 = vst [vmem:[#allocation72_spill] sm:$0xff] %v9414_v44 }
 0xbd0   : > { %10701 = vst [vmem:[#allocation73_spill] sm:$0xff] %v9416_v51  ;;  %10702 = vst [vmem:[#allocation74_spill] sm:$0xff] %v9418_v47 }
 0xbd2   : > { %v2913_v19 = vpop.f32.mrb[124].mxu0 }
 0xbd3   : > { %v2915_v39 = vpop.f32.mrb[125].mxu0 }
 0xbd4   : > { %v2917_v28 = vpop.f32.mrb[126].mxu0 }
 0xbd5   : > { %v9420_v3 = vpack.c.bf16 %v2917_v28, %v2913_v19  ;;  %v2919_v22 = vpop.f32.mrb[127].mxu0 }
 0xbd6   : > { %v9422_v31 = vpack.c.bf16 %v2919_v22, %v2915_v39 }
 0xbd7   : > { %10703 = vst [vmem:[#allocation75_spill] sm:$0xff] %v9420_v3 }
 0xbd8   : > { %10704 = vst [vmem:[#allocation76_spill] sm:$0xff] %v9422_v31 }
 0xbda   : > { %v2923_v25 = vpop.f32.mrb[128].mxu0 }
 0xbdb   : > { %v2925_v50 = vpop.f32.mrb[129].mxu0 }
 0xbdc   : > { %v2927_v16 = vpop.f32.mrb[130].mxu0 }
 0xbdd   : > { %v9424_v53 = vpack.c.bf16 %v2927_v16, %v2923_v25  ;;  %v2929_v23 = vpop.f32.mrb[131].mxu0 }
 0xbde   : > { %v9426_v43 = vpack.c.bf16 %v2929_v23, %v2925_v50 }
 0xbdf   : > { %10705 = vst [vmem:[#allocation77_spill] sm:$0xff] %v9424_v53 }
 0xbe0   : > { %10706 = vst [vmem:[#allocation78_spill] sm:$0xff] %v9426_v43 }
 0xbe2   : > { %v2933_v15 = vpop.f32.mrb[132].mxu0 }
 0xbe3   : > { %v2935_v60 = vpop.f32.mrb[133].mxu0 }
 0xbe4   : > { %v2937_v58 = vpop.f32.mrb[134].mxu0 }
 0xbe5   : > { %v9428_v55 = vpack.c.bf16 %v2937_v58, %v2933_v15  ;;  %v2939_v44 = vpop.f32.mrb[135].mxu0 }
 0xbe6   : > { %v9430_v47 = vpack.c.bf16 %v2939_v44, %v2935_v60 }
 0xbe7   : > { %10707 = vst [vmem:[#allocation79_spill] sm:$0xff] %v9428_v55 }
 0xbe8   : > { %10708 = vst [vmem:[#allocation80_spill] sm:$0xff] %v9430_v47 }
 0xbea   : > { %v2943_v19 = vpop.f32.mrb[136].mxu0 }
 0xbeb   : > { %v2945_v28 = vpop.f32.mrb[137].mxu0 }
 0xbec   : > { %v2947_v22 = vpop.f32.mrb[138].mxu0 }
 0xbed   : > { %v9432_v39 = vpack.c.bf16 %v2947_v22, %v2943_v19  ;;  %v2949_v3 = vpop.f32.mrb[139].mxu0 }
 0xbee   : > { %v9434_v31 = vpack.c.bf16 %v2949_v3, %v2945_v28 }
 0xbef   : > { %10709 = vst [vmem:[#allocation81_spill] sm:$0xff] %v9432_v39 }
 0xbf0   : > { %10710 = vst [vmem:[#allocation82_spill] sm:$0xff] %v9434_v31 }
 0xc4a   : > { %v7190_v25 = vpop.f32.mrb[112].mxu1 }
 0xc4b   : > { %v3210_v50 = vpop.f32.mrb[113].mxu1  ;;  %v9436_v16 = vpop.f32.mrb[140].mxu0  ;;  %v3248_v3 = vsel %vm3241_vm5, %v7190_v25, -inf }
 0xc4c   : > { %v7191_v23 = vpop.f32.mrb[114].mxu1  ;;  %v9438_v53 = vpop.f32.mrb[141].mxu0  ;;  %v3242_v15 = vsel %vm3241_vm5, %v3210_v50, -inf  ;;  %v3486_v11 = vsel %vm3241_vm5, %v9436_v16, -inf }
 0xc4d   : > { %3243 = vmax.xlane.f32.xlu0 %v3242_v15  ;;  %v3213_v44 = vpop.f32.mrb[115].mxu1  ;;  %v9441_v60 = vpop.f32.mrb[142].mxu0  ;;  %v3251_v22 = vsel %vm3241_vm5, %v7191_v23, -inf  ;;  %v3480_v57 = vsel %vm3241_vm5, %v9438_v53, -inf }
 0xc4e   : > { %v9443_v58 = vpop.f32.mrb[143].mxu0  ;;  %v3245_v19 = vsel %vm3241_vm5, %v3213_v44, -inf }
 0xc4f   : > { %3246 = vmax.xlane.f32.xlu1 %v3245_v19 }
 0xc51   : > { %3249 = vmax.xlane.f32.xlu0 %v3248_v3 }
 0xc52   : > { %v7194_v28 = vpop.f32.mrb[116].mxu1 }
 0xc53   : > { %3252 = vmax.xlane.f32.xlu1 %v3251_v22  ;;  %v3226_v39 = vpop.f32.mrb[117].mxu1  ;;  %v9448_v55 = vpop.f32.mrb[144].mxu0  ;;  %v3260_v22 = vsel %vm3241_vm5, %v7194_v28, -inf }
 0xc54   : > { %v9450_v31 = vpop.f32.mrb[118].mxu1  ;;  %v9452_v15 = vpop.f32.mrb[145].mxu0  ;;  %v3254_v47 = vsel %vm3241_vm5, %v3226_v39, -inf }
 0xc55   : > { %3255 = vmax.xlane.f32.xlu0 %v3254_v47  ;;  %v3229_v43 = vpop.f32.mrb[119].mxu1  ;;  %v9455_v1 = vpop.f32.mrb[146].mxu0  ;;  %v3263_v29 = vsel %vm3241_vm5, %v9450_v31, -inf  ;;  %v3483_v47 = vsel %vm3241_vm5, %v9443_v58, -inf }
 0xc56   : > { %v9457_v19 = vpop.f32.mrb[147].mxu0  ;;  %v3257_v3 = vsel %vm3241_vm5, %v3229_v43, -inf }
 0xc57   : > { %3258 = vmax.xlane.f32.xlu1 %v3257_v3  ;;  %v3489_v3 = vsel %vm3241_vm5, %v9441_v60, -inf }
 0xc59   : > { %3261 = vmax.xlane.f32.xlu0 %v3260_v22  ;;  %v3492_v22 = vsel %vm3241_vm5, %v9452_v15, -inf }
 0xc5b   : > { %3264 = vmax.xlane.f32.xlu1 %v3263_v29  ;;  %v3495_v29 = vsel %vm3241_vm5, %v9457_v19, -inf }
 0xc5d   : > { %3481 = vmax.xlane.f32.xlu0 %v3480_v57  ;;  %v3498_v57 = vsel %vm3241_vm5, %v9448_v55, -inf }
 0xc5f   : > { %3484 = vmax.xlane.f32.xlu1 %v3483_v47  ;;  %v3501_v47 = vsel %vm3241_vm5, %v9455_v1, -inf }
 0xc61   : > { %3487 = vmax.xlane.f32.xlu0 %v3486_v11 }
 0xc63   : > { %3490 = vmax.xlane.f32.xlu1 %v3489_v3 }
 0xc65   : > { %3493 = vmax.xlane.f32.xlu0 %v3492_v22 }
 0xc67   : > { %3496 = vmax.xlane.f32.xlu1 %v3495_v29 }
 0xc69   : > { %3499 = vmax.xlane.f32.xlu0 %v3498_v57 }
 0xc6b   : > { %3502 = vmax.xlane.f32.xlu1 %v3501_v47 }
 0xcda   : > { %v3244_v11 = vpop.xlane.xlu0 %3243 }
 0xcdb   : > { %v3266_v13 = vsub.f32 %v3210_v50, %v3244_v11 }
 0xcdc   : > { %v3247_v46 = vpop.xlane.xlu1 %3246 }
 0xcdd   : > { %v3274_v3 = vmul.f32 1.442695, %v3266_v13  ;;  %v3267_v56 = vsub.f32 %v3213_v44, %v3247_v46 }
 0xcde   : > { %v3250_v18 = vpop.xlane.xlu0 %3249 }
 0xcdf   : > { %7922 = vpow2.f32 %v3274_v3  ;;  %v3276_v22 = vmul.f32 1.442695, %v3267_v56  ;;  %v3268_v21 = vsub.f32 %v7190_v25, %v3250_v18 }
 0xce0   : > { %v3253_v33 = vpop.xlane.xlu1 %3252 }
 0xce1   : > { %7924 = vpow2.f32 %v3276_v22  ;;  %v3278_v29 = vmul.f32 1.442695, %v3268_v21  ;;  %v3269_v51 = vsub.f32 %v7191_v23, %v3253_v33 }
 0xce2   : > { %v3256_v12 = vpop.xlane.xlu0 %3255 }
 0xce3   : > { %7926 = vpow2.f32 %v3278_v29  ;;  %v3280_v57 = vmul.f32 1.442695, %v3269_v51  ;;  %v3270_v26 = vsub.f32 %v3226_v39, %v3256_v12 }
 0xce4   : > { %v3259_v36 = vpop.xlane.xlu1 %3258 }
 0xce5   : > { %7928 = vpow2.f32 %v3280_v57  ;;  %v3282_v47 = vmul.f32 1.442695, %v3270_v26  ;;  %v3271_v34 = vsub.f32 %v3229_v43, %v3259_v36 }
 0xce6   : > { %v3262_v50 = vpop.xlane.xlu0 %3261 }
 0xce7   : > { %7930 = vpow2.f32 %v3282_v47  ;;  %v3284_v13 = vmul.f32 1.442695, %v3271_v34  ;;  %v3272_v46 = vsub.f32 %v7194_v28, %v3262_v50 }
 0xce8   : > { %v3265_v44 = vpop.xlane.xlu1 %3264 }
 0xce9   : > { %v9479_v11 = vpop.eup %7922  ;;  %7932 = vpow2.f32 %v3284_v13  ;;  %v3286_v56 = vmul.f32 1.442695, %v3272_v46  ;;  %v3273_v18 = vsub.f32 %v9450_v31, %v3265_v44 }
 0xcea   : > { %v3482_v33 = vpop.xlane.xlu0 %3481  ;;  %v3290_v21 = vsel %vm3241_vm5, %v9479_v11, 0.0 }
 0xceb   : > { %v9484_v12 = vpop.eup %7924  ;;  %7934 = vpow2.f32 %v3286_v56  ;;  %v3288_v26 = vmul.f32 1.442695, %v3273_v18  ;;  %v3504_v36 = vsub.f32 %v9438_v53, %v3482_v33  ;;  %3291 = vadd.xlane.f32.xlu0 %v3290_v21 }
 0xcec   : > { %v3485_v34 = vpop.xlane.xlu1 %3484  ;;  %v3293_v51 = vsel %vm3241_vm5, %v9484_v12, 0.0 }
 0xced   : > { %v9489_v43 = vpop.eup %7926  ;;  %7936 = vpow2.f32 %v3288_v26  ;;  %v3512_v39 = vmul.f32 1.442695, %v3504_v36  ;;  %v3505_v31 = vsub.f32 %v9443_v58, %v3485_v34  ;;  %3294 = vadd.xlane.f32.xlu1 %v3293_v51 }
 0xcee   : > { %v3488_v25 = vpop.xlane.xlu0 %3487  ;;  %v3296_v23 = vsel %vm3241_vm5, %v9489_v43, 0.0 }
 0xcef   : > { %v9494_v28 = vpop.eup %7928  ;;  %7938 = vpow2.f32 %v3512_v39  ;;  %v3514_v53 = vmul.f32 1.442695, %v3505_v31  ;;  %v3506_v3 = vsub.f32 %v9436_v16, %v3488_v25  ;;  %3297 = vadd.xlane.f32.xlu0 %v3296_v23 }
 0xcf0   : > { %v3491_v22 = vpop.xlane.xlu1 %3490  ;;  %v3299_v29 = vsel %vm3241_vm5, %v9494_v28, 0.0 }
 0xcf1   : > { %v9499_v57 = vpop.eup %7930  ;;  %7940 = vpow2.f32 %v3514_v53  ;;  %v3516_v58 = vmul.f32 1.442695, %v3506_v3  ;;  %v3507_v47 = vsub.f32 %v9441_v60, %v3491_v22  ;;  %3300 = vadd.xlane.f32.xlu1 %v3299_v29 }
 0xcf2   : > { %v3494_v50 = vpop.xlane.xlu0 %3493  ;;  %v3302_v13 = vsel %vm3241_vm5, %v9499_v57, 0.0 }
 0xcf3   : > { %v9504_v46 = vpop.eup %7932  ;;  %7942 = vpow2.f32 %v3516_v58  ;;  %v3518_v16 = vmul.f32 1.442695, %v3507_v47  ;;  %v3508_v44 = vsub.f32 %v9452_v15, %v3494_v50  ;;  %3303 = vadd.xlane.f32.xlu0 %v3302_v13 }
 0xcf4   : > { %v3497_v56 = vpop.xlane.xlu1 %3496  ;;  %v3305_v18 = vsel %vm3241_vm5, %v9504_v46, 0.0 }
 0xcf5   : > { %v9509_v33 = vpop.eup %7934  ;;  %7944 = vpow2.f32 %v3518_v16  ;;  %v3520_v60 = vmul.f32 1.442695, %v3508_v44  ;;  %v3509_v21 = vsub.f32 %v9457_v19, %v3497_v56  ;;  %3306 = vadd.xlane.f32.xlu1 %v3305_v18 }
 0xcf6   : > { %v3500_v26 = vpop.xlane.xlu0 %3499  ;;  %v3308_v36 = vsel %vm3241_vm5, %v9509_v33, 0.0 }
 0xcf7   : > { %v9514_v34 = vpop.eup %7936  ;;  %7946 = vpow2.f32 %v3520_v60  ;;  %v3522_v15 = vmul.f32 1.442695, %v3509_v21  ;;  %v3510_v51 = vsub.f32 %v9448_v55, %v3500_v26  ;;  %3309 = vadd.xlane.f32.xlu0 %v3308_v36  ;;  %v7746_v26 = vld [vmem:[%s10532_s8 + $0x40] sm:$0xff]   ;;  %v7747_v36 = vld [vmem:[%s10532_s8 + $0x48] sm:$0xff]  }
 0xcf8   : > { %v3503_v39 = vpop.xlane.xlu1 %3502  ;;  %v3311_v31 = vsel %vm3241_vm5, %v9514_v34, 0.0  ;;  %7244 = vmatprep.subr.bf16.mxu0 %v7746_v26 }
 0xcf9   : > { %v9519_v25 = vpop.eup %7938  ;;  %7948 = vpow2.f32 %v3522_v15  ;;  %v3524_v19 = vmul.f32 1.442695, %v3510_v51  ;;  %v3511_v23 = vsub.f32 %v9455_v1, %v3503_v39  ;;  %3312 = vadd.xlane.f32.xlu1 %v3311_v31  ;;  %7245 = vmatpush3.bf16.msra.mxu0 %v7746_v26  ;;  %v7748_v15 = vld [vmem:[%s10532_s8 + $0x50] sm:$0xff]  }
 0xcfa   : > { %v3528_v53 = vsel %vm3241_vm5, %v9519_v25, 0.0  ;;  %7246 = vmatprep.subr.bf16.mxu0 %v7747_v36 }
 0xcfb   : > { %v9524_v3 = vpop.eup %7940  ;;  %7950 = vpow2.f32 %v3524_v19  ;;  %v3526_v22 = vmul.f32 1.442695, %v3511_v23  ;;  %3529 = vadd.xlane.f32.xlu0 %v3528_v53 }
 0xcfc   : > { %v3531_v55 = vsel %vm3241_vm5, %v9524_v3, 0.0 }
 0xcfd   : > { %v9528_v29 = vpop.eup %7942  ;;  %7952 = vpow2.f32 %v3526_v22  ;;  %3532 = vadd.xlane.f32.xlu1 %v3531_v55  ;;  %7247 = vmatpush3.bf16.msra.mxu0 %v7747_v36 }
 0xcfe   : > { %v3534_v58 = vsel %vm3241_vm5, %v9528_v29, 0.0  ;;  %7248 = vmatprep.subr.bf16.mxu0 %v7748_v15 }
 0xcff   : > { %v9532_v1 = vpop.eup %7944  ;;  %3535 = vadd.xlane.f32.xlu0 %v3534_v58 }
 0xd00   : > { %v3537_v47 = vsel %vm3241_vm5, %v9532_v1, 0.0 }
 0xd01   : > { %v9536_v50 = vpop.eup %7946  ;;  %3538 = vadd.xlane.f32.xlu1 %v3537_v47  ;;  %7249 = vmatpush3.bf16.msra.mxu0 %v7748_v15 }
 0xd02   : > { %v3540_v13 = vsel %vm3241_vm5, %v9536_v50, 0.0 }
 0xd03   : > { %v9540_v16 = vpop.eup %7948  ;;  %3541 = vadd.xlane.f32.xlu0 %v3540_v13 }
 0xd04   : > { %v3543_v44 = vsel %vm3241_vm5, %v9540_v16, 0.0 }
 0xd05   : > { %v9544_v56 = vpop.eup %7950  ;;  %3544 = vadd.xlane.f32.xlu1 %v3543_v44 }
 0xd06   : > { %v3546_v18 = vsel %vm3241_vm5, %v9544_v56, 0.0 }
 0xd07   : > { %v9548_v60 = vpop.eup %7952  ;;  %3547 = vadd.xlane.f32.xlu0 %v3546_v18 }
 0xd08   : > { %v3549_v21 = vsel %vm3241_vm5, %v9548_v60, 0.0 }
 0xd09   : > { %3550 = vadd.xlane.f32.xlu1 %v3549_v21 }
 0xd78   : > { %v3292_v51 = vpop.xlane.xlu0 %3291 }
 0xd79   : > { %7954 = vrcp.f32 %v3292_v51 }
 0xd7a   : > { %v3295_v39 = vpop.xlane.xlu1 %3294 }
 0xd7b   : > { %7956 = vrcp.f32 %v3295_v39 }
 0xd7c   : > { %v3298_v31 = vpop.xlane.xlu0 %3297 }
 0xd7d   : > { %7958 = vrcp.f32 %v3298_v31 }
 0xd7e   : > { %v3301_v19 = vpop.xlane.xlu1 %3300 }
 0xd7f   : > { %7960 = vrcp.f32 %v3301_v19 }
 0xd80   : > { %v3304_v23 = vpop.xlane.xlu0 %3303 }
 0xd81   : > { %7962 = vrcp.f32 %v3304_v23 }
 0xd82   : > { %v3307_v53 = vpop.xlane.xlu1 %3306 }
 0xd83   : > { %v7955_v22 = vpop.eup %7954  ;;  %7964 = vrcp.f32 %v3307_v53 }
 0xd84   : > { %v3310_v55 = vpop.xlane.xlu0 %3309  ;;  %v3322_v13 = vmul.f32 %v7955_v22, %v9479_v11 }
 0xd85   : > { %v7957_v58 = vpop.eup %7956  ;;  %7966 = vrcp.f32 %v3310_v55 }
 0xd86   : > { %v3313_v47 = vpop.xlane.xlu1 %3312  ;;  %v3323_v44 = vmul.f32 %v7957_v58, %v9484_v12 }
 0xd87   : > { %v7959_v18 = vpop.eup %7958  ;;  %7968 = vrcp.f32 %v3313_v47 }
 0xd88   : > { %v3530_v21 = vpop.xlane.xlu0 %3529  ;;  %v3330_v26 = vpack.c.bf16 %v3323_v44, %v3322_v13  ;;  %v3324_v15 = vmul.f32 %v7959_v18, %v9489_v43 }
 0xd89   : > { %v7961_v36 = vpop.eup %7960  ;;  %7970 = vrcp.f32 %v3530_v21 }
 0xd8a   : > { %v3325_v51 = vmul.f32 %v7961_v36, %v9494_v28  ;;  %7204 = vmatprep.mubr.msk.bf16.mxu1 %vm3241_vm5, %v3330_v26  ;;  %v3533_v39 = vpop.xlane.xlu1 %3532 }
 0xd8b   : > { %v7963_v31 = vpop.eup %7962  ;;  %7972 = vrcp.f32 %v3533_v39 }
 0xd8c   : > { %v3331_v19 = vpack.c.bf16 %v3325_v51, %v3324_v15  ;;  %v3536_v23 = vpop.xlane.xlu0 %3535  ;;  %v3326_v53 = vmul.f32 %v7963_v31, %v9499_v57 }
 0xd8d   : > { %v7965_v11 = vpop.eup %7964  ;;  %7974 = vrcp.f32 %v3536_v23 }
 0xd8e   : > { %7205 = vmatmul.mubr.msk.bf16.vlgmr.msra.gmra.mrb[120].mxu1 %vm3241_vm5, %v3331_v19  ;;  %v3539_v12 = vpop.xlane.xlu1 %3538  ;;  %v3327_v22 = vmul.f32 %v7965_v11, %v9504_v46 }
 0xd8f   : > { %v7967_v55 = vpop.eup %7966  ;;  %7229 = vmatpush3.bf16.msra.mxu1 %v9367_v8  ;;  %7976 = vrcp.f32 %v3539_v12 }
 0xd90   : > { %7230 = vmatprep.subr.bf16.mxu1 %v9373_v30  ;;  %v3542_v43 = vpop.xlane.xlu0 %3541  ;;  %v3332_v28 = vpack.c.bf16 %v3327_v22, %v3326_v53  ;;  %v3328_v13 = vmul.f32 %v7967_v55, %v9509_v33 }
 0xd91   : > { %v7969_v58 = vpop.eup %7968  ;;  %7978 = vrcp.f32 %v3542_v43 }
 0xd92   : > { %7208 = vmatprep.mubr.msk.bf16.mxu1 %vm3241_vm5, %v3332_v28  ;;  %v3545_v47 = vpop.xlane.xlu1 %3544  ;;  %v3329_v44 = vmul.f32 %v7969_v58, %v9514_v34 }
 0xd93   : > { %v7971_v57 = vpop.eup %7970  ;;  %7231 = vmatpush3.bf16.msra.mxu1 %v9373_v30  ;;  %7980 = vrcp.f32 %v3545_v47 }
 0xd94   : > { %7232 = vmatprep.subr.bf16.mxu1 %v9379_v54  ;;  %v3548_v8 = vpop.xlane.xlu0 %3547  ;;  %v3333_v46 = vpack.c.bf16 %v3329_v44, %v3328_v13  ;;  %v3560_v26 = vmul.f32 %v7971_v57, %v9519_v25  ;;  %v7755_v13 = vld [vmem:[%s10532_s8 + $0x8] sm:$0xff]  }
 0xd95   : > { %v7973_v18 = vpop.eup %7972  ;;  %7982 = vrcp.f32 %v3548_v8  ;;  %v7756_v8 = vld [vmem:[%s10532_s8 + $0x10] sm:$0xff]  }
 0xd96   : > { %7209 = vmatmul.mubr.msk.bf16.gmra.mrb[124].mxu1 %vm3241_vm5, %v3333_v46  ;;  %v3551_v21 = vpop.xlane.xlu1 %3550  ;;  %v3561_v36 = vmul.f32 %v7973_v18, %v9524_v3 }
 0xd97   : > { %v7975_v33 = vpop.eup %7974  ;;  %7233 = vmatpush3.bf16.msra.mxu1 %v9379_v54  ;;  %7984 = vrcp.f32 %v3551_v21 }
 0xd98   : > { %7234 = vmatprep.subr.bf16.mxu1 %v9385_v52  ;;  %v3568_v30 = vpack.c.bf16 %v3561_v36, %v3560_v26  ;;  %v3562_v15 = vmul.f32 %v7975_v33, %v9528_v29  ;;  %v7757_v36 = vld [vmem:[%s10532_s8 + $0x18] sm:$0xff]   ;;  %v7758_v33 = vld [vmem:[%s10532_s8 + $0x20] sm:$0xff]  }
 0xd99   : > { %v7977_v34 = vpop.eup %7976 }
 0xd9a   : > { %v3563_v51 = vmul.f32 %v7977_v34, %v9532_v1  ;;  %7236 = vmatprep.mubr.msk.bf16.mxu1 %vm3241_vm5, %v3568_v30  ;;  %v7759_v30 = vld [vmem:[%s10532_s8 + $0x28] sm:$0xff]   ;;  %v7760_v34 = vld [vmem:[%s10532_s8 + $0x30] sm:$0xff]  }
 0xd9b   : > { %v7979_v39 = vpop.eup %7978  ;;  %7235 = vmatpush3.bf16.msra.mxu1 %v9385_v52 }
 0xd9c   : > { %v3569_v25 = vpack.c.bf16 %v3563_v51, %v3562_v15  ;;  %7292 = vmatprep.subr.bf16.mxu1 %v9313_v5  ;;  %v3564_v54 = vmul.f32 %v7979_v39, %v9536_v50  ;;  %v10711_v50 = vpack.c.bf16 %v9177_v17, %v9169_v7  ;;  %v10713_v7 = vpack.c.bf16 %v9225_v40, %v9217_v14  ;;  %v7754_v14 = vld [vmem:[%s10532_s8] sm:$0xff]   ;;  %v7761_v15 = vld [vmem:[%s10532_s8 + $0x38] sm:$0xff]  }
 0xd9d   : > { %v7981_v3 = vpop.eup %7980  ;;  %v10714_v17 = vpack.c.bf16 %v9249_v42, %v9241_v6  ;;  %v7753_v6 = vld [vmem:[%s10532_s8 + $0x78] sm:$0xff]  }
 0xd9e   : > { %7237 = vmatmul.mubr.msk.bf16.vlgmr.msra.gmra.mrb[128].mxu1 %vm3241_vm5, %v3569_v25  ;;  %v3565_v31 = vmul.f32 %v7981_v3, %v9540_v16 }
 0xd9f   : > { %v7983_v19 = vpop.eup %7982 }
 0xda0   : > { %v3570_v23 = vpack.c.bf16 %v3565_v31, %v3564_v54  ;;  %v3566_v1 = vmul.f32 %v7983_v19, %v9544_v56 }
 0xda1   : > { %v7985_v29 = vpop.eup %7984 }
 0xda2   : > { %7240 = vmatprep.mubr.msk.bf16.mxu1 %vm3241_vm5, %v3570_v23  ;;  %v3567_v11 = vmul.f32 %v7985_v29, %v9548_v60 }
 0xda4   : > { %7293 = vmatpush3.bf16.xpose.msra.mxu1 %v9313_v5  ;;  %v3571_v52 = vpack.c.bf16 %v3567_v11, %v3566_v1  ;;  %v10712_v5 = vpack.c.bf16 %v9201_v45, %v9193_v62  ;;  %v7750_v62 = vld [vmem:[%s10532_s8 + $0x60] sm:$0xff]   ;;  %v7752_v45 = vld [vmem:[%s10532_s8 + $0x70] sm:$0xff]  }
 0xda5   : > { %7294 = vmatprep.subr.bf16.mxu1 %v9333_v27 }
 0xda6   : > { %7241 = vmatmul.mubr.msk.bf16.gmra.mrb[132].mxu1 %vm3241_vm5, %v3571_v52 }
 0xda7   : > { %7300 = vmatprep.mubr.bf16.mxu1 %v10711_v50 }
 0xdac   : > { %7295 = vmatpush3.bf16.xpose.msra.mxu1 %v9333_v27 }
 0xdad   : > { %7296 = vmatprep.subr.bf16.mxu1 %v9347_v32 }
 0xdb4   : > { %7297 = vmatpush3.bf16.xpose.msra.mxu1 %v9347_v32 }
 0xdb5   : > { %7298 = vmatprep.subr.bf16.mxu1 %v9355_v20 }
 0xdbc   : > { %7299 = vmatpush3.bf16.xpose.msra.mxu1 %v9355_v20 }
 0xdbd   : > { %7308 = vmatprep.subr.bf16.mxu1 %v9388_v2 }
 0xdc3   : > { %7301 = vmatmul.mubr.bf16.vlgmr.msra.gmra.mrb[136].mxu1 %v10712_v5 }
 0xdc4   : > { %7304 = vmatprep.mubr.bf16.mxu1 %v10713_v7  ;;  %7309 = vmatpush3.bf16.msra.mxu1 %v9388_v2  ;;  %v7749_v2 = vld [vmem:[%s10532_s8 + $0x58] sm:$0xff]  }
 0xdc5   : > { %7310 = vmatprep.subr.bf16.mxu1 %v9396_v35  ;;  %7250 = vmatprep.subr.bf16.mxu0 %v7749_v2 }
 0xdc6   : > { %7251 = vmatpush3.bf16.msra.mxu0 %v7749_v2 }
 0xdc7   : > { %7252 = vmatprep.subr.bf16.mxu0 %v7750_v62 }
 0xdc8   : > { %7311 = vmatpush3.bf16.msra.mxu1 %v9396_v35 }
 0xdc9   : > { %7312 = vmatprep.subr.bf16.mxu1 %v9404_v0 }
 0xdca   : > { %7253 = vmatpush3.bf16.msra.mxu0 %v7750_v62 }
 0xdcb   : > { %7305 = vmatmul.mubr.bf16.gmra.mrb[140].mxu1 %v10714_v17 }
 0xdcc   : > { %7313 = vmatpush3.bf16.msra.mxu1 %v9404_v0  ;;  %v7751_v0 = vld [vmem:[%s10532_s8 + $0x68] sm:$0xff]  }
 0xdcd   : > { %7314 = vmatprep.subr.bf16.mxu1 %v9412_v37  ;;  %7254 = vmatprep.subr.bf16.mxu0 %v7751_v0 }
 0xdce   : > { %7255 = vmatpush3.bf16.msra.mxu0 %v7751_v0 }
 0xdcf   : > { %7256 = vmatprep.subr.bf16.mxu0 %v7752_v45 }
 0xdd0   : > { %7315 = vmatpush3.bf16.msra.mxu1 %v9412_v37 }
 0xdd1   : > { %7348 = vmatprep.subr.bf16.mxu1 %v9317_v41 }
 0xdd2   : > { %7257 = vmatpush3.bf16.msra.mxu0 %v7752_v45 }
 0xdd3   : > { %7258 = vmatprep.subr.bf16.mxu0 %v7753_v6 }
 0xdd6   : > { %7259 = vmatpush3.bf16.msra.mxu0 %v7753_v6 }
 0xdd7   : > { %7268 = vmatprep.subr.bf16.mxu0 %v7754_v14 }
 0xe61   : > { %v7206_v40 = vpop.f32.mrb[120].mxu1 }
 0xe62   : > { %v3380_v42 = vpop.f32.mrb[121].mxu1 }
 0xe63   : > { %v7207_v37 = vpop.f32.mrb[122].mxu1 }
 0xe64   : > { %v3412_v27 = vpack.c.bf16 %v7207_v37, %v7206_v40  ;;  %v3383_v32 = vpop.f32.mrb[123].mxu1 }
 0xe65   : > { %v3411_v20 = vpack.c.bf16 %v3383_v32, %v3380_v42 }
 0xe69   : > { %v7210_v35 = vpop.f32.mrb[124].mxu1 }
 0xe6a   : > { %v3396_v16 = vpop.f32.mrb[125].mxu1 }
 0xe6b   : > { %v7211_v56 = vpop.f32.mrb[126].mxu1 }
 0xe6c   : > { %v3414_v60 = vpack.c.bf16 %v7211_v56, %v7210_v35  ;;  %v3399_v12 = vpop.f32.mrb[127].mxu1 }
 0xe6d   : > { %v3413_v53 = vpack.c.bf16 %v3399_v12, %v3396_v16 }
 0xe71   : > { %v7238_v22 = vpop.f32.mrb[128].mxu1 }
 0xe72   : > { %v3618_v55 = vpop.f32.mrb[129].mxu1 }
 0xe73   : > { %v7239_v43 = vpop.f32.mrb[130].mxu1 }
 0xe74   : > { %v3650_v28 = vpack.c.bf16 %v7239_v43, %v7238_v22  ;;  %v3621_v58 = vpop.f32.mrb[131].mxu1 }
 0xe75   : > { %v3649_v47 = vpack.c.bf16 %v3621_v58, %v3618_v55 }
 0xe77   : > { %7260 = vmatprep.mubr.bf16.mxu0 %v3649_v47 }
 0xe78   : > { %7261 = vmatmul.mubr.bf16.vlgmr.msra.gmra.mrb[148].mxu0 %v3650_v28 }
 0xe79   : > { %7269 = vmatpush3.bf16.msra.mxu0 %v7754_v14  ;;  %v7242_v44 = vpop.f32.mrb[132].mxu1 }
 0xe7a   : > { %v3634_v57 = vpop.f32.mrb[133].mxu1  ;;  %7270 = vmatprep.subr.bf16.mxu0 %v7755_v13 }
 0xe7b   : > { %v7243_v46 = vpop.f32.mrb[134].mxu1 }
 0xe7c   : > { %v3652_v18 = vpack.c.bf16 %v7243_v46, %v7242_v44  ;;  %v3637_v21 = vpop.f32.mrb[135].mxu1 }
 0xe7d   : > { %v3651_v26 = vpack.c.bf16 %v3637_v21, %v3634_v57  ;;  %7271 = vmatpush3.bf16.msra.mxu0 %v7755_v13 }
 0xe7e   : > { %7272 = vmatprep.subr.bf16.mxu0 %v7756_v8 }
 0xe7f   : > { %7264 = vmatprep.mubr.bf16.mxu0 %v3651_v26 }
 0xe80   : > { %7265 = vmatmul.mubr.bf16.gmra.mrb[152].mxu0 %v3652_v18 }
 0xe81   : > { %7273 = vmatpush3.bf16.msra.mxu0 %v7756_v8  ;;  %7284 = vmatprep.mubr.bf16.mxu0 %v3411_v20 }
 0xe82   : > { %7274 = vmatprep.subr.bf16.mxu0 %v7757_v36 }
 0xe85   : > { %7275 = vmatpush3.bf16.msra.mxu0 %v7757_v36 }
 0xe86   : > { %7276 = vmatprep.subr.bf16.mxu0 %v7758_v33 }
 0xe89   : > { %7277 = vmatpush3.bf16.msra.mxu0 %v7758_v33 }
 0xe8a   : > { %7278 = vmatprep.subr.bf16.mxu0 %v7759_v30 }
 0xe8d   : > { %7279 = vmatpush3.bf16.msra.mxu0 %v7759_v30 }
 0xe8e   : > { %7280 = vmatprep.subr.bf16.mxu0 %v7760_v34 }
 0xe91   : > { %7281 = vmatpush3.bf16.msra.mxu0 %v7760_v34 }
 0xe92   : > { %7282 = vmatprep.subr.bf16.mxu0 %v7761_v15 }
 0xe95   : > { %7283 = vmatpush3.bf16.msra.mxu0 %v7761_v15 }
 0xe96   : > { %v7302_v51 = vpop.f32.mrb[136].mxu1 }
 0xe97   : > { %v3913_v39 = vpop.f32.mrb[137].mxu1  ;;  %v3950_v19 = vsel %vm3241_vm5, %v7302_v51, -inf }
 0xe98   : > { %7285 = vmatmul.mubr.bf16.vlgmr.msra.gmra.mrb[148].mxu0 %v3412_v27  ;;  %v7303_v25 = vpop.f32.mrb[138].mxu1  ;;  %v3944_v3 = vsel %vm3241_vm5, %v3913_v39, -inf }
 0xe99   : > { %3945 = vmax.xlane.f32.xlu0 %v3944_v3  ;;  %7288 = vmatprep.mubr.bf16.mxu0 %v3413_v53  ;;  %v3916_v54 = vpop.f32.mrb[139].mxu1  ;;  %v3953_v29 = vsel %vm3241_vm5, %v7303_v25, -inf  ;;  %v7762_v3 = vld [vmem:[%s10532_s8 + $0x80] sm:$0xff]  }
 0xe9a   : > { %v3947_v31 = vsel %vm3241_vm5, %v3916_v54, -inf  ;;  %7324 = vmatprep.subr.bf16.mxu0 %v7762_v3 }
 0xe9b   : > { %3948 = vmax.xlane.f32.xlu1 %v3947_v31  ;;  %7325 = vmatpush3.bf16.msra.mxu0 %v7762_v3  ;;  %v7764_v31 = vld [vmem:[%s10532_s8 + $0x90] sm:$0xff]  }
 0xe9c   : > { %v7776_v3 = vld [vmem:[%s10532_s8 + $0xf0] sm:$0xff]  }
 0xe9d   : > { %3951 = vmax.xlane.f32.xlu0 %v3950_v19  ;;  %v7765_v19 = vld [vmem:[%s10532_s8 + $0x98] sm:$0xff]  }
 0xe9e   : > { %v7306_v23 = vpop.f32.mrb[140].mxu1 }
 0xe9f   : > { %3954 = vmax.xlane.f32.xlu1 %v3953_v29  ;;  %v3929_v1 = vpop.f32.mrb[141].mxu1  ;;  %v3962_v7 = vsel %vm3241_vm5, %v7306_v23, -inf  ;;  %v7767_v29 = vld [vmem:[%s10532_s8 + $0xa8] sm:$0xff]  }
 0xea0   : > { %7289 = vmatmul.mubr.bf16.gmra.mrb[152].mxu0 %v3414_v60  ;;  %v7307_v11 = vpop.f32.mrb[142].mxu1  ;;  %v3956_v52 = vsel %vm3241_vm5, %v3929_v1, -inf }
 0xea1   : > { %3957 = vmax.xlane.f32.xlu0 %v3956_v52  ;;  %v3932_v50 = vpop.f32.mrb[143].mxu1  ;;  %v3965_v17 = vsel %vm3241_vm5, %v7307_v11, -inf }
 0xea2   : > { %v3959_v5 = vsel %vm3241_vm5, %v3932_v50, -inf }
 0xea3   : > { %3960 = vmax.xlane.f32.xlu1 %v3959_v5 }
 0xea5   : > { %3963 = vmax.xlane.f32.xlu0 %v3962_v7 }
 0xea7   : > { %3966 = vmax.xlane.f32.xlu1 %v3965_v17 }
 0xf26   : > { %v3946_v2 = vpop.xlane.xlu0 %3945 }
 0xf27   : > { %v3968_v62 = vsub.f32 %v3913_v39, %v3946_v2 }
 0xf28   : > { %v3949_v0 = vpop.xlane.xlu1 %3948 }
 0xf29   : > { %v3976_v45 = vmul.f32 1.442695, %v3968_v62  ;;  %v3969_v6 = vsub.f32 %v3916_v54, %v3949_v0  ;;  %v7763_v54 = vld [vmem:[%s10532_s8 + $0x88] sm:$0xff]  }
 0xf2a   : > { %v3952_v14 = vpop.xlane.xlu0 %3951  ;;  %7326 = vmatprep.subr.bf16.mxu0 %v7763_v54 }
 0xf2b   : > { %7986 = vpow2.f32 %v3976_v45  ;;  %v3978_v40 = vmul.f32 1.442695, %v3969_v6  ;;  %v3970_v42 = vsub.f32 %v7302_v51, %v3952_v14  ;;  %7327 = vmatpush3.bf16.msra.mxu0 %v7763_v54  ;;  %v7777_v54 = vld [vmem:[%s10532_s8 + $0xf8] sm:$0xff]  }
 0xf2c   : > { %v3955_v37 = vpop.xlane.xlu1 %3954  ;;  %7328 = vmatprep.subr.bf16.mxu0 %v7764_v31 }
 0xf2d   : > { %7988 = vpow2.f32 %v3978_v40  ;;  %v3980_v27 = vmul.f32 1.442695, %v3970_v42  ;;  %v3971_v32 = vsub.f32 %v7303_v25, %v3955_v37 }
 0xf2e   : > { %v3958_v20 = vpop.xlane.xlu0 %3957 }
 0xf2f   : > { %7990 = vpow2.f32 %v3980_v27  ;;  %v3982_v35 = vmul.f32 1.442695, %v3971_v32  ;;  %v3972_v16 = vsub.f32 %v3929_v1, %v3958_v20  ;;  %7329 = vmatpush3.bf16.msra.mxu0 %v7764_v31  ;;  %v7768_v1 = vld [vmem:[%s10532_s8 + $0xb0] sm:$0xff]  }
 0xf30   : > { %v3961_v56 = vpop.xlane.xlu1 %3960  ;;  %7330 = vmatprep.subr.bf16.mxu0 %v7765_v19 }
 0xf31   : > { %7992 = vpow2.f32 %v3982_v35  ;;  %v3984_v60 = vmul.f32 1.442695, %v3972_v16  ;;  %v3973_v12 = vsub.f32 %v3932_v50, %v3961_v56 }
 0xf32   : > { %v3964_v53 = vpop.xlane.xlu0 %3963 }
 0xf33   : > { %7994 = vpow2.f32 %v3984_v60  ;;  %v3986_v22 = vmul.f32 1.442695, %v3973_v12  ;;  %v3974_v55 = vsub.f32 %v7306_v23, %v3964_v53  ;;  %v7766_v23 = vld [vmem:[%s10532_s8 + $0xa0] sm:$0xff]   ;;  %7331 = vmatpush3.bf16.msra.mxu0 %v7765_v19 }
 0xf34   : > { %v3967_v43 = vpop.xlane.xlu1 %3966  ;;  %7332 = vmatprep.subr.bf16.mxu0 %v7766_v23 }
 0xf35   : > { %v9668_v28 = vpop.eup %7986  ;;  %7996 = vpow2.f32 %v3986_v22  ;;  %v3988_v58 = vmul.f32 1.442695, %v3974_v55  ;;  %v3975_v47 = vsub.f32 %v7307_v11, %v3967_v43 }
 0xf36   : > { %v3992_v13 = vsel %vm3241_vm5, %v9668_v28, 0.0 }
 0xf37   : > { %v9672_v44 = vpop.eup %7988  ;;  %7998 = vpow2.f32 %v3988_v58  ;;  %v3990_v57 = vmul.f32 1.442695, %v3975_v47  ;;  %3993 = vadd.xlane.f32.xlu0 %v3992_v13  ;;  %7333 = vmatpush3.bf16.msra.mxu0 %v7766_v23  ;;  %v10715_v58 = vpack.c.bf16 %v9185_v63, %v9173_v49  ;;  %v10718_v49 = vld [vmem:[#allocation67_spill] sm:$0xff]  ;;  %v10719_v63 = vld [vmem:[#allocation70_spill] sm:$0xff] }
 0xf38   : > { %v3995_v8 = vsel %vm3241_vm5, %v9672_v44, 0.0  ;;  %7334 = vmatprep.subr.bf16.mxu0 %v7767_v29 }
 0xf39   : > { %v9676_v46 = vpop.eup %7990  ;;  %8000 = vpow2.f32 %v3990_v57  ;;  %3996 = vadd.xlane.f32.xlu1 %v3995_v8 }
 0xf3a   : > { %v3998_v18 = vsel %vm3241_vm5, %v9676_v46, 0.0 }
 0xf3b   : > { %v7993_v21 = vpop.eup %7992  ;;  %3999 = vadd.xlane.f32.xlu0 %v3998_v18  ;;  %7335 = vmatpush3.bf16.msra.mxu0 %v7767_v29  ;;  %v7771_v18 = vld [vmem:[%s10532_s8 + $0xc8] sm:$0xff]  }
 0xf3c   : > { %v4001_v26 = vsel %vm3241_vm5, %v7993_v21, 0.0  ;;  %7336 = vmatprep.subr.bf16.mxu0 %v7768_v1 }
 0xf3d   : > { %v9681_v36 = vpop.eup %7994  ;;  %4002 = vadd.xlane.f32.xlu1 %v4001_v26 }
 0xf3e   : > { %v4004_v33 = vsel %vm3241_vm5, %v9681_v36, 0.0 }
 0xf3f   : > { %v7997_v30 = vpop.eup %7996  ;;  %4005 = vadd.xlane.f32.xlu0 %v4004_v33  ;;  %7337 = vmatpush3.bf16.msra.mxu0 %v7768_v1 }
 0xf40   : > { %v4007_v34 = vsel %vm3241_vm5, %v7997_v30, 0.0 }
 0xf41   : > { %v9686_v15 = vpop.eup %7998  ;;  %4008 = vadd.xlane.f32.xlu1 %v4007_v34 }
 0xf42   : > { %v4010_v51 = vsel %vm3241_vm5, %v9686_v15, 0.0 }
 0xf43   : > { %v9690_v39 = vpop.eup %8000  ;;  %4011 = vadd.xlane.f32.xlu0 %v4010_v51  ;;  %v7773_v51 = vld [vmem:[%s10532_s8 + $0xd8] sm:$0xff]  }
 0xf44   : > { %v4013_v25 = vsel %vm3241_vm5, %v9690_v39, 0.0 }
 0xf45   : > { %4014 = vadd.xlane.f32.xlu1 %v4013_v25  ;;  %v7775_v25 = vld [vmem:[%s10532_s8 + $0xe8] sm:$0xff]  }
 0xfc4   : > { %v3994_v11 = vpop.xlane.xlu0 %3993 }
 0xfc5   : > { %8002 = vrcp.f32 %v3994_v11 }
 0xfc6   : > { %v3997_v52 = vpop.xlane.xlu1 %3996 }
 0xfc7   : > { %8004 = vrcp.f32 %v3997_v52  ;;  %v10725_v52 = vld [vmem:[#allocation64_spill] sm:$0xff] }
 0xfc8   : > { %v4000_v50 = vpop.xlane.xlu0 %3999 }
 0xfc9   : > { %8006 = vrcp.f32 %v4000_v50 }
 0xfca   : > { %v4003_v5 = vpop.xlane.xlu1 %4002 }
 0xfcb   : > { %8008 = vrcp.f32 %v4003_v5 }
 0xfcc   : > { %v4006_v7 = vpop.xlane.xlu0 %4005 }
 0xfcd   : > { %8010 = vrcp.f32 %v4006_v7 }
 0xfce   : > { %v4009_v17 = vpop.xlane.xlu1 %4008 }
 0xfcf   : > { %v8003_v2 = vpop.eup %8002  ;;  %8012 = vrcp.f32 %v4009_v17 }
 0xfd0   : > { %v4012_v62 = vpop.xlane.xlu0 %4011  ;;  %v4024_v6 = vmul.f32 %v8003_v2, %v9668_v28 }
 0xfd1   : > { %v8005_v0 = vpop.eup %8004  ;;  %8014 = vrcp.f32 %v4012_v62 }
 0xfd2   : > { %v4015_v45 = vpop.xlane.xlu1 %4014  ;;  %v4025_v14 = vmul.f32 %v8005_v0, %v9672_v44 }
 0xfd3   : > { %v8007_v40 = vpop.eup %8006  ;;  %8016 = vrcp.f32 %v4015_v45 }
 0xfd4   : > { %v4032_v42 = vpack.c.bf16 %v4025_v14, %v4024_v6  ;;  %v4026_v27 = vmul.f32 %v8007_v40, %v9676_v46 }
 0xfd5   : > { %v8009_v37 = vpop.eup %8008 }
 0xfd6   : > { %v4027_v32 = vmul.f32 %v8009_v37, %v7993_v21  ;;  %7316 = vmatprep.mubr.msk.bf16.mxu1 %vm3241_vm5, %v4032_v42 }
 0xfd7   : > { %v8011_v20 = vpop.eup %8010 }
 0xfd8   : > { %v4033_v35 = vpack.c.bf16 %v4027_v32, %v4026_v27  ;;  %v4028_v56 = vmul.f32 %v8011_v20, %v9681_v36  ;;  %v7772_v36 = vld [vmem:[%s10532_s8 + $0xd0] sm:$0xff]  }
 0xfd9   : > { %v8013_v16 = vpop.eup %8012 }
 0xfda   : > { %7317 = vmatmul.mubr.msk.bf16.vlgmr.msra.gmra.mrb[144].mxu1 %vm3241_vm5, %v4033_v35  ;;  %v4029_v60 = vmul.f32 %v8013_v16, %v7997_v30 }
 0xfdb   : > { %v8015_v12 = vpop.eup %8014  ;;  %7349 = vmatpush3.bf16.xpose.msra.mxu1 %v9317_v41  ;;  %v10716_v41 = vpack.c.bf16 %v9209_v10, %v9197_v9  ;;  %v10723_v9 = vld [vmem:[#allocation73_spill] sm:$0xff]  ;;  %v10724_v10 = vld [vmem:[#allocation48_spill] sm:$0xff] }
 0xfdc   : > { %7350 = vmatprep.subr.bf16.mxu1 %v9337_v61  ;;  %v4034_v53 = vpack.c.bf16 %v4029_v60, %v4028_v56  ;;  %v4030_v55 = vmul.f32 %v8015_v12, %v9686_v15 }
 0xfdd   : > { %v8017_v22 = vpop.eup %8016 }
 0xfde   : > { %7320 = vmatprep.mubr.msk.bf16.mxu1 %vm3241_vm5, %v4034_v53  ;;  %v4031_v43 = vmul.f32 %v8017_v22, %v9690_v39  ;;  %v7774_v39 = vld [vmem:[%s10532_s8 + $0xe0] sm:$0xff]  }
 0xfe0   : > { %v4035_v28 = vpack.c.bf16 %v4031_v43, %v4030_v55 }
 0xfe2   : > { %7321 = vmatmul.mubr.msk.bf16.gmra.mrb[148].mxu1 %vm3241_vm5, %v4035_v28 }
 0xfe3   : > { %7351 = vmatpush3.bf16.xpose.msra.mxu1 %v9337_v61  ;;  %7356 = vmatprep.mubr.bf16.mxu1 %v10715_v58  ;;  %v10717_v61 = vpack.c.bf16 %v9233_v59, %v9221_v38  ;;  %v7769_v38 = vld [vmem:[%s10532_s8 + $0xb8] sm:$0xff]   ;;  %v7770_v59 = vld [vmem:[%s10532_s8 + $0xc0] sm:$0xff]  }
 0xfe4   : > { %7352 = vmatprep.subr.bf16.mxu1 %v9351_v24  ;;  %7338 = vmatprep.subr.bf16.mxu0 %v7769_v38 }
 0xfe5   : > { %7339 = vmatpush3.bf16.msra.mxu0 %v7769_v38 }
 0xfe6   : > { %7380 = vmatprep.subr.bf16.mxu0 %v7770_v59 }
 0xfeb   : > { %7353 = vmatpush3.bf16.xpose.msra.mxu1 %v9351_v24  ;;  %v10720_v24 = vld [vmem:[#allocation30_spill] sm:$0xff] }
 0xfec   : > { %7354 = vmatprep.subr.bf16.mxu1 %v9359_v48 }
 0xff3   : > { %7355 = vmatpush3.bf16.xpose.msra.mxu1 %v9359_v48  ;;  %v10721_v48 = vld [vmem:[#allocation27_spill] sm:$0xff] }
 0xff4   : > { %7364 = vmatprep.subr.bf16.mxu1 %v9392_v4  ;;  %v10722_v47 = vpack.c.bf16 %v10720_v24, %v10721_v48 }
 0xffa   : > { %7357 = vmatmul.mubr.bf16.vlgmr.msra.gmra.mrb[152].mxu1 %v10716_v41 }
 0xffb   : > { %7360 = vmatprep.mubr.bf16.mxu1 %v10717_v61  ;;  %7365 = vmatpush3.bf16.msra.mxu1 %v9392_v4 }
 0xffc   : > { %7366 = vmatprep.subr.bf16.mxu1 %v10718_v49 }
 0xfff   : > { %7367 = vmatpush3.bf16.msra.mxu1 %v10718_v49 }
0x1000   : > { %7368 = vmatprep.subr.bf16.mxu1 %v10719_v63 }
0x1002   : > { %7361 = vmatmul.mubr.bf16.gmra.mrb[156].mxu1 %v10722_v47 }
0x1003   : > { %7369 = vmatpush3.bf16.msra.mxu1 %v10719_v63 }
0x1004   : > { %7370 = vmatprep.subr.bf16.mxu1 %v10723_v9 }
0x1007   : > { %7371 = vmatpush3.bf16.msra.mxu1 %v10723_v9 }
0x1008   : > { %7404 = vmatprep.subr.bf16.mxu1 %v10724_v10 }
0x10ad   : > { %v7318_v4 = vpop.f32.mrb[144].mxu1 }
0x10ae   : > { %v4082_v13 = vpop.f32.mrb[145].mxu1 }
0x10af   : > { %v7319_v44 = vpop.f32.mrb[146].mxu1 }
0x10b0   : > { %v4114_v57 = vpack.c.bf16 %v7319_v44, %v7318_v4  ;;  %v4085_v8 = vpop.f32.mrb[147].mxu1 }
0x10b1   : > { %v4113_v46 = vpack.c.bf16 %v4085_v8, %v4082_v13 }
0x10b3   : > { %7340 = vmatprep.mubr.bf16.mxu0 %v4113_v46 }
0x10b4   : > { %7341 = vmatmul.mubr.bf16.vlgmr.msra.gmra.mrb[148].mxu0 %v4114_v57 }
0x10b5   : > { %7381 = vmatpush3.bf16.msra.mxu0 %v7770_v59  ;;  %v7322_v21 = vpop.f32.mrb[148].mxu1 }
0x10b6   : > { %v4098_v26 = vpop.f32.mrb[149].mxu1  ;;  %7382 = vmatprep.subr.bf16.mxu0 %v7771_v18 }
0x10b7   : > { %v7323_v33 = vpop.f32.mrb[150].mxu1 }
0x10b8   : > { %v4116_v30 = vpack.c.bf16 %v7323_v33, %v7322_v21  ;;  %v4101_v34 = vpop.f32.mrb[151].mxu1 }
0x10b9   : > { %v4115_v15 = vpack.c.bf16 %v4101_v34, %v4098_v26  ;;  %7383 = vmatpush3.bf16.msra.mxu0 %v7771_v18 }
0x10ba   : > { %7384 = vmatprep.subr.bf16.mxu0 %v7772_v36 }
0x10bb   : > { %7344 = vmatprep.mubr.bf16.mxu0 %v4115_v15 }
0x10bc   : > { %7345 = vmatmul.mubr.bf16.gmra.mrb[152].mxu0 %v4116_v30 }
0x10bd   : > { %7385 = vmatpush3.bf16.msra.mxu0 %v7772_v36 }
0x10be   : > { %7386 = vmatprep.subr.bf16.mxu0 %v7773_v51 }
0x10c1   : > { %7387 = vmatpush3.bf16.msra.mxu0 %v7773_v51 }
0x10c2   : > { %7388 = vmatprep.subr.bf16.mxu0 %v7774_v39 }
0x10c5   : > { %7389 = vmatpush3.bf16.msra.mxu0 %v7774_v39 }
0x10c6   : > { %7390 = vmatprep.subr.bf16.mxu0 %v7775_v25 }
0x10c9   : > { %7391 = vmatpush3.bf16.msra.mxu0 %v7775_v25 }
0x10ca   : > { %7392 = vmatprep.subr.bf16.mxu0 %v7776_v3 }
0x10cd   : > { %v7358_v31 = vpop.f32.mrb[152].mxu1  ;;  %7393 = vmatpush3.bf16.msra.mxu0 %v7776_v3 }
0x10ce   : > { %v4272_v19 = vpop.f32.mrb[153].mxu1  ;;  %7394 = vmatprep.subr.bf16.mxu0 %v7777_v54  ;;  %v4309_v50 = vsel %vm3241_vm5, %v7358_v31, -inf }
0x10cf   : > { %v7359_v23 = vpop.f32.mrb[154].mxu1  ;;  %v4303_v29 = vsel %vm3241_vm5, %v4272_v19, -inf }
0x10d0   : > { %4304 = vmax.xlane.f32.xlu0 %v4303_v29  ;;  %v4275_v1 = vpop.f32.mrb[155].mxu1  ;;  %v4312_v7 = vsel %vm3241_vm5, %v7359_v23, -inf }
0x10d1   : > { %7395 = vmatpush3.bf16.msra.mxu0 %v7777_v54  ;;  %v4306_v11 = vsel %vm3241_vm5, %v4275_v1, -inf }
0x10d2   : > { %4307 = vmax.xlane.f32.xlu1 %v4306_v11  ;;  %7420 = vmatprep.subr.bf16.mxu0 %v10725_v52 }
0x10d4   : > { %4310 = vmax.xlane.f32.xlu0 %v4309_v50 }
0x10d5   : > { %v7362_v5 = vpop.f32.mrb[156].mxu1 }
0x10d6   : > { %4313 = vmax.xlane.f32.xlu1 %v4312_v7  ;;  %v4288_v17 = vpop.f32.mrb[157].mxu1  ;;  %v4321_v6 = vsel %vm3241_vm5, %v7362_v5, -inf }
0x10d7   : > { %v7363_v2 = vpop.f32.mrb[158].mxu1  ;;  %v4315_v62 = vsel %vm3241_vm5, %v4288_v17, -inf }
0x10d8   : > { %4316 = vmax.xlane.f32.xlu0 %v4315_v62  ;;  %v4291_v0 = vpop.f32.mrb[159].mxu1  ;;  %v4324_v14 = vsel %vm3241_vm5, %v7363_v2, -inf }
0x10d9   : > { %v4318_v45 = vsel %vm3241_vm5, %v4291_v0, -inf }
0x10da   : > { %4319 = vmax.xlane.f32.xlu1 %v4318_v45 }
0x10dc   : > { %4322 = vmax.xlane.f32.xlu0 %v4321_v6 }
0x10de   : > { %4325 = vmax.xlane.f32.xlu1 %v4324_v14 }
0x115d   : > { %v4305_v40 = vpop.xlane.xlu0 %4304 }
0x115e   : > { %v4327_v42 = vsub.f32 %v4272_v19, %v4305_v40 }
0x115f   : > { %v4308_v37 = vpop.xlane.xlu1 %4307 }
0x1160   : > { %v4335_v27 = vmul.f32 1.442695, %v4327_v42  ;;  %v4328_v32 = vsub.f32 %v4275_v1, %v4308_v37  ;;  %v10726_v42 = vld [vmem:[#allocation50_spill] sm:$0xff] }
0x1161   : > { %v4311_v20 = vpop.xlane.xlu0 %4310 }
0x1162   : > { %8018 = vpow2.f32 %v4335_v27  ;;  %v4337_v35 = vmul.f32 1.442695, %v4328_v32  ;;  %v4329_v16 = vsub.f32 %v7358_v31, %v4311_v20 }
0x1163   : > { %v4314_v56 = vpop.xlane.xlu1 %4313 }
0x1164   : > { %8020 = vpow2.f32 %v4337_v35  ;;  %v4339_v60 = vmul.f32 1.442695, %v4329_v16  ;;  %v4330_v12 = vsub.f32 %v7359_v23, %v4314_v56  ;;  %v10727_v16 = vld [vmem:[#allocation16_spill] sm:$0xff]  ;;  %v10728_v56 = vld [vmem:[#allocation14_spill] sm:$0xff] }
0x1165   : > { %v4317_v53 = vpop.xlane.xlu0 %4316 }
0x1166   : > { %8022 = vpow2.f32 %v4339_v60  ;;  %v4341_v22 = vmul.f32 1.442695, %v4330_v12  ;;  %v4331_v55 = vsub.f32 %v4288_v17, %v4317_v53  ;;  %v10729_v60 = vpack.c.bf16 %v10727_v16, %v10728_v56  ;;  %v10730_v12 = vld [vmem:[#allocation52_spill] sm:$0xff]  ;;  %v10732_v53 = vld [vmem:[#allocation49_spill] sm:$0xff] }
0x1167   : > { %v4320_v43 = vpop.xlane.xlu1 %4319 }
0x1168   : > { %8024 = vpow2.f32 %v4341_v22  ;;  %v4343_v28 = vmul.f32 1.442695, %v4331_v55  ;;  %v4332_v58 = vsub.f32 %v4291_v0, %v4320_v43  ;;  %v10733_v22 = vld [vmem:[#allocation20_spill] sm:$0xff]  ;;  %v10734_v55 = vld [vmem:[#allocation18_spill] sm:$0xff] }
0x1169   : > { %v4323_v41 = vpop.xlane.xlu0 %4322  ;;  %v10735_v43 = vpack.c.bf16 %v10733_v22, %v10734_v55 }
0x116a   : > { %8026 = vpow2.f32 %v4343_v28  ;;  %v4345_v61 = vmul.f32 1.442695, %v4332_v58  ;;  %v4333_v49 = vsub.f32 %v7362_v5, %v4323_v41  ;;  %v10736_v28 = vld [vmem:[#allocation24_spill] sm:$0xff]  ;;  %v10737_v58 = vld [vmem:[#allocation22_spill] sm:$0xff] }
0x116b   : > { %v4326_v63 = vpop.xlane.xlu1 %4325  ;;  %v10738_v41 = vpack.c.bf16 %v10736_v28, %v10737_v58 }
0x116c   : > { %v8019_v24 = vpop.eup %8018  ;;  %8028 = vpow2.f32 %v4345_v61  ;;  %v4347_v48 = vmul.f32 1.442695, %v4333_v49  ;;  %v4334_v47 = vsub.f32 %v7363_v2, %v4326_v63  ;;  %v10739_v61 = vld [vmem:[#allocation51_spill] sm:$0xff]  ;;  %v10740_v49 = vld [vmem:[#allocation29_spill] sm:$0xff]  ;;  %v10741_v63 = vld [vmem:[#allocation26_spill] sm:$0xff] }
0x116d   : > { %v4351_v9 = vsel %vm3241_vm5, %v8019_v24, 0.0 }
0x116e   : > { %v8021_v38 = vpop.eup %8020  ;;  %8030 = vpow2.f32 %v4347_v48  ;;  %v4349_v59 = vmul.f32 1.442695, %v4334_v47  ;;  %4352 = vadd.xlane.f32.xlu0 %v4351_v9  ;;  %v10743_v48 = vld [vmem:[#allocation17_spill] sm:$0xff]  ;;  %v10744_v47 = vld [vmem:[#allocation15_spill] sm:$0xff] }
0x116f   : > { %v4354_v4 = vsel %vm3241_vm5, %v8021_v38, 0.0  ;;  %v10745_v9 = vpack.c.bf16 %v10743_v48, %v10744_v47 }
0x1170   : > { %v8023_v13 = vpop.eup %8022  ;;  %8032 = vpow2.f32 %v4349_v59  ;;  %4355 = vadd.xlane.f32.xlu1 %v4354_v4  ;;  %v10747_v59 = vld [vmem:[#allocation55_spill] sm:$0xff]  ;;  %v10748_v4 = vld [vmem:[#allocation65_spill] sm:$0xff] }
0x1171   : > { %v4357_v44 = vsel %vm3241_vm5, %v8023_v13, 0.0 }
0x1172   : > { %v8025_v57 = vpop.eup %8024  ;;  %4358 = vadd.xlane.f32.xlu0 %v4357_v44  ;;  %v10750_v44 = vld [vmem:[#allocation19_spill] sm:$0xff] }
0x1173   : > { %v4360_v8 = vsel %vm3241_vm5, %v8025_v57, 0.0 }
0x1174   : > { %v8027_v46 = vpop.eup %8026  ;;  %4361 = vadd.xlane.f32.xlu1 %v4360_v8  ;;  %v10752_v8 = vld [vmem:[#allocation25_spill] sm:$0xff] }
0x1175   : > { %v4363_v18 = vsel %vm3241_vm5, %v8027_v46, 0.0 }
0x1176   : > { %v8029_v21 = vpop.eup %8028  ;;  %4364 = vadd.xlane.f32.xlu0 %v4363_v18 }
0x1177   : > { %v4366_v26 = vsel %vm3241_vm5, %v8029_v21, 0.0 }
0x1178   : > { %v8031_v36 = vpop.eup %8030  ;;  %4367 = vadd.xlane.f32.xlu1 %v4366_v26  ;;  %v10756_v26 = vld [vmem:[#allocation71_spill] sm:$0xff] }
0x1179   : > { %v4369_v33 = vsel %vm3241_vm5, %v8031_v36, 0.0 }
0x117a   : > { %v8033_v30 = vpop.eup %8032  ;;  %4370 = vadd.xlane.f32.xlu0 %v4369_v33  ;;  %v10758_v33 = vld [vmem:[#allocation28_spill] sm:$0xff] }
0x117b   : > { %v4372_v34 = vsel %vm3241_vm5, %v8033_v30, 0.0 }
0x117c   : > { %4373 = vadd.xlane.f32.xlu1 %v4372_v34  ;;  %v10760_v34 = vld [vmem:[#allocation74_spill] sm:$0xff] }
0x11fb   : > { %v4353_v15 = vpop.xlane.xlu0 %4352 }
0x11fc   : > { %8034 = vrcp.f32 %v4353_v15  ;;  %v10761_v15 = vld [vmem:[#allocation56_spill] sm:$0xff] }
0x11fd   : > { %v4356_v51 = vpop.xlane.xlu1 %4355 }
0x11fe   : > { %8036 = vrcp.f32 %v4356_v51 }
0x11ff   : > { %v4359_v39 = vpop.xlane.xlu0 %4358 }
0x1200   : > { %8038 = vrcp.f32 %v4359_v39 }
0x1201   : > { %v4362_v25 = vpop.xlane.xlu1 %4361 }
0x1202   : > { %8040 = vrcp.f32 %v4362_v25 }
0x1203   : > { %v4365_v3 = vpop.xlane.xlu0 %4364 }
0x1204   : > { %8042 = vrcp.f32 %v4365_v3 }
0x1205   : > { %v4368_v54 = vpop.xlane.xlu1 %4367 }
0x1206   : > { %v8035_v31 = vpop.eup %8034  ;;  %8044 = vrcp.f32 %v4368_v54 }
0x1207   : > { %v4371_v19 = vpop.xlane.xlu0 %4370  ;;  %v4383_v1 = vmul.f32 %v8035_v31, %v8019_v24  ;;  %v10742_v24 = vpack.c.bf16 %v10740_v49, %v10741_v63 }
0x1208   : > { %v8037_v23 = vpop.eup %8036  ;;  %8046 = vrcp.f32 %v4371_v19 }
0x1209   : > { %v4374_v29 = vpop.xlane.xlu1 %4373  ;;  %v4384_v11 = vmul.f32 %v8037_v23, %v8021_v38  ;;  %v10746_v38 = vld [vmem:[#allocation53_spill] sm:$0xff]  ;;  %v10762_v23 = vld [vmem:[#allocation66_spill] sm:$0xff] }
0x120a   : > { %v8039_v50 = vpop.eup %8038  ;;  %8048 = vrcp.f32 %v4374_v29 }
0x120b   : > { %v4391_v5 = vpack.c.bf16 %v4384_v11, %v4383_v1  ;;  %v4385_v17 = vmul.f32 %v8039_v50, %v8023_v13  ;;  %v10749_v13 = vld [vmem:[#allocation21_spill] sm:$0xff] }
0x120c   : > { %v8041_v7 = vpop.eup %8040 }
0x120d   : > { %v4386_v2 = vmul.f32 %v8041_v7, %v8025_v57  ;;  %7372 = vmatprep.mubr.msk.bf16.mxu1 %vm3241_vm5, %v4391_v5  ;;  %v10751_v57 = vpack.c.bf16 %v10749_v13, %v10750_v44  ;;  %v10763_v7 = vld [vmem:[#allocation69_spill] sm:$0xff] }
0x120e   : > { %v8043_v62 = vpop.eup %8042 }
0x120f   : > { %v4392_v0 = vpack.c.bf16 %v4386_v2, %v4385_v17  ;;  %v4387_v6 = vmul.f32 %v8043_v62, %v8027_v46  ;;  %v10753_v46 = vld [vmem:[#allocation23_spill] sm:$0xff]  ;;  %v10764_v17 = vld [vmem:[#allocation72_spill] sm:$0xff] }
0x1210   : > { %v8045_v45 = vpop.eup %8044  ;;  %v10754_v18 = vpack.c.bf16 %v10752_v8, %v10753_v46 }
0x1211   : > { %7373 = vmatmul.mubr.msk.bf16.vlgmr.msra.gmra.mrb[160].mxu1 %vm3241_vm5, %v4392_v0  ;;  %v4388_v14 = vmul.f32 %v8045_v45, %v8029_v21  ;;  %v10755_v21 = vld [vmem:[#allocation68_spill] sm:$0xff] }
0x1212   : > { %v8047_v40 = vpop.eup %8046  ;;  %7405 = vmatpush3.bf16.xpose.msra.mxu1 %v10724_v10  ;;  %v10731_v10 = vld [vmem:[#allocation54_spill] sm:$0xff] }
0x1213   : > { %7406 = vmatprep.subr.bf16.mxu1 %v10726_v42  ;;  %v4393_v37 = vpack.c.bf16 %v4388_v14, %v4387_v6  ;;  %v4389_v32 = vmul.f32 %v8047_v40, %v8031_v36  ;;  %v10757_v36 = vld [vmem:[#allocation31_spill] sm:$0xff] }
0x1214   : > { %v8049_v27 = vpop.eup %8048 }
0x1215   : > { %7376 = vmatprep.mubr.msk.bf16.mxu1 %vm3241_vm5, %v4393_v37  ;;  %v4390_v20 = vmul.f32 %v8049_v27, %v8033_v30  ;;  %v10759_v30 = vpack.c.bf16 %v10757_v36, %v10758_v33 }
0x1217   : > { %v4394_v35 = vpack.c.bf16 %v4390_v20, %v4389_v32 }
0x1219   : > { %7377 = vmatmul.mubr.msk.bf16.gmra.mrb[164].mxu1 %vm3241_vm5, %v4394_v35 }
0x121a   : > { %7407 = vmatpush3.bf16.xpose.msra.mxu1 %v10726_v42  ;;  %7412 = vmatprep.mubr.bf16.mxu1 %v10729_v60 }
0x121b   : > { %7408 = vmatprep.subr.bf16.mxu1 %v10730_v12 }
0x1222   : > { %7409 = vmatpush3.bf16.xpose.msra.mxu1 %v10730_v12 }
0x1223   : > { %7410 = vmatprep.subr.bf16.mxu1 %v10731_v10 }
0x122a   : > { %7411 = vmatpush3.bf16.xpose.msra.mxu1 %v10731_v10 }
0x122b   : > { %7460 = vmatprep.subr.bf16.mxu1 %v10732_v53 }
0x1231   : > { %7413 = vmatmul.mubr.bf16.vlgmr.msra.gmra.mrb[168].mxu1 %v10735_v43 }
0x1232   : > { %7416 = vmatprep.mubr.bf16.mxu1 %v10738_v41  ;;  %7461 = vmatpush3.bf16.xpose.msra.mxu1 %v10732_v53 }
0x1233   : > { %7462 = vmatprep.subr.bf16.mxu1 %v10739_v61 }
0x1239   : > { %7417 = vmatmul.mubr.bf16.gmra.mrb[172].mxu1 %v10742_v24 }
0x123a   : > { %7463 = vmatpush3.bf16.xpose.msra.mxu1 %v10739_v61  ;;  %7468 = vmatprep.mubr.bf16.mxu1 %v10745_v9 }
0x123b   : > { %7464 = vmatprep.subr.bf16.mxu1 %v10746_v38 }
0x1242   : > { %7465 = vmatpush3.bf16.xpose.msra.mxu1 %v10746_v38 }
0x1243   : > { %7466 = vmatprep.subr.bf16.mxu1 %v10747_v59 }
0x124a   : > { %7467 = vmatpush3.bf16.xpose.msra.mxu1 %v10747_v59 }
0x124b   : > { %7476 = vmatprep.subr.bf16.mxu1 %v10748_v4 }
0x1251   : > { %7469 = vmatmul.mubr.bf16.vlgmr.msra.gmra.mrb[176].mxu1 %v10751_v57 }
0x1252   : > { %7472 = vmatprep.mubr.bf16.mxu1 %v10754_v18  ;;  %7477 = vmatpush3.bf16.msra.mxu1 %v10748_v4 }
0x1253   : > { %7478 = vmatprep.subr.bf16.mxu1 %v10755_v21 }
0x1256   : > { %7479 = vmatpush3.bf16.msra.mxu1 %v10755_v21 }
0x1257   : > { %7480 = vmatprep.subr.bf16.mxu1 %v10756_v26 }
0x1259   : > { %7473 = vmatmul.mubr.bf16.gmra.mrb[180].mxu1 %v10759_v30 }
0x125a   : > { %7481 = vmatpush3.bf16.msra.mxu1 %v10756_v26 }
0x125b   : > { %7482 = vmatprep.subr.bf16.mxu1 %v10760_v34 }
0x125e   : > { %7483 = vmatpush3.bf16.msra.mxu1 %v10760_v34 }
0x125f   : > { %7516 = vmatprep.subr.bf16.mxu1 %v10761_v15 }
0x12e4   : > { %v7374_v51 = vpop.f32.mrb[160].mxu1 }
0x12e5   : > { %v4441_v39 = vpop.f32.mrb[161].mxu1 }
0x12e6   : > { %v7375_v25 = vpop.f32.mrb[162].mxu1 }
0x12e7   : > { %v4473_v3 = vpack.c.bf16 %v7375_v25, %v7374_v51  ;;  %v4444_v54 = vpop.f32.mrb[163].mxu1 }
0x12e8   : > { %v4472_v31 = vpack.c.bf16 %v4444_v54, %v4441_v39 }
0x12ea   : > { %7396 = vmatprep.mubr.bf16.mxu0 %v4472_v31 }
0x12eb   : > { %7397 = vmatmul.mubr.bf16.vlgmr.msra.gmra.mrb[148].mxu0 %v4473_v3 }
0x12ec   : > { %7421 = vmatpush3.bf16.msra.mxu0 %v10725_v52  ;;  %v7378_v19 = vpop.f32.mrb[164].mxu1 }
0x12ed   : > { %7422 = vmatprep.subr.bf16.mxu0 %v10762_v23  ;;  %v4457_v29 = vpop.f32.mrb[165].mxu1 }
0x12ee   : > { %v7379_v1 = vpop.f32.mrb[166].mxu1 }
0x12ef   : > { %v4475_v11 = vpack.c.bf16 %v7379_v1, %v7378_v19  ;;  %v4460_v50 = vpop.f32.mrb[167].mxu1 }
0x12f0   : > { %v4474_v5 = vpack.c.bf16 %v4460_v50, %v4457_v29  ;;  %7423 = vmatpush3.bf16.msra.mxu0 %v10762_v23 }
0x12f1   : > { %7424 = vmatprep.subr.bf16.mxu0 %v10763_v7 }
0x12f2   : > { %7400 = vmatprep.mubr.bf16.mxu0 %v4474_v5 }
0x12f3   : > { %7401 = vmatmul.mubr.bf16.gmra.mrb[152].mxu0 %v4475_v11 }
0x12f4   : > { %7425 = vmatpush3.bf16.msra.mxu0 %v10763_v7 }
0x12f5   : > { %7426 = vmatprep.subr.bf16.mxu0 %v10764_v17 }
0x12f8   : > { %7427 = vmatpush3.bf16.msra.mxu0 %v10764_v17 }
0x1304   : > { %v9856_v52 = vpop.f32.mrb[168].mxu1 }
0x1305   : > { %v9858_v2 = vpop.f32.mrb[169].mxu1 }
0x1306   : > { %v9860_v62 = vpop.f32.mrb[170].mxu1 }
0x1307   : > { %v9862_v0 = vpop.f32.mrb[171].mxu1 }
0x130c   : > { %v9864_v45 = vpop.f32.mrb[172].mxu1 }
0x130d   : > { %v9866_v6 = vpop.f32.mrb[173].mxu1 }
0x130e   : > { %v9868_v14 = vpop.f32.mrb[174].mxu1 }
0x130f   : > { %v9870_v40 = vpop.f32.mrb[175].mxu1 }
0x1324   : > { %v7470_v42 = vpop.f32.mrb[176].mxu1 }
0x1325   : > { %v4990_v37 = vpop.f32.mrb[177].mxu1  ;;  %v5027_v16 = vsel %vm3241_vm5, %v7470_v42, -inf }
0x1326   : > { %v7471_v27 = vpop.f32.mrb[178].mxu1  ;;  %v5021_v32 = vsel %vm3241_vm5, %v4990_v37, -inf }
0x1327   : > { %5022 = vmax.xlane.f32.xlu0 %v5021_v32  ;;  %v4993_v20 = vpop.f32.mrb[179].mxu1  ;;  %v5030_v60 = vsel %vm3241_vm5, %v7471_v27, -inf  ;;  %v4668_v32 = vsel %vm3241_vm5, %v9856_v52, -inf }
0x1328   : > { %v5024_v35 = vsel %vm3241_vm5, %v4993_v20, -inf }
0x1329   : > { %5025 = vmax.xlane.f32.xlu1 %v5024_v35  ;;  %v4674_v35 = vsel %vm3241_vm5, %v9866_v6, -inf }
0x132b   : > { %5028 = vmax.xlane.f32.xlu0 %v5027_v16  ;;  %v4677_v16 = vsel %vm3241_vm5, %v9870_v40, -inf }
0x132c   : > { %v7474_v56 = vpop.f32.mrb[180].mxu1 }
0x132d   : > { %5031 = vmax.xlane.f32.xlu1 %v5030_v60  ;;  %v5006_v12 = vpop.f32.mrb[181].mxu1  ;;  %v5039_v43 = vsel %vm3241_vm5, %v7474_v56, -inf  ;;  %v4683_v60 = vsel %vm3241_vm5, %v9868_v14, -inf }
0x132e   : > { %v7475_v10 = vpop.f32.mrb[182].mxu1  ;;  %v5033_v53 = vsel %vm3241_vm5, %v5006_v12, -inf }
0x132f   : > { %5034 = vmax.xlane.f32.xlu0 %v5033_v53  ;;  %v5009_v22 = vpop.f32.mrb[183].mxu1  ;;  %v5042_v28 = vsel %vm3241_vm5, %v7475_v10, -inf }
0x1330   : > { %v5036_v55 = vsel %vm3241_vm5, %v5009_v22, -inf }
0x1331   : > { %5037 = vmax.xlane.f32.xlu1 %v5036_v55 }
0x1333   : > { %5040 = vmax.xlane.f32.xlu0 %v5039_v43 }
0x1335   : > { %5043 = vmax.xlane.f32.xlu1 %v5042_v28 }
0x13b4   : > { %v5023_v58 = vpop.xlane.xlu0 %5022 }
0x13b5   : > { %v5045_v41 = vsub.f32 %v4990_v37, %v5023_v58  ;;  %v4662_v37 = vsel %vm3241_vm5, %v9858_v2, -inf }
0x13b6   : > { %v5026_v61 = vpop.xlane.xlu1 %5025 }
0x13b7   : > { %v5053_v49 = vmul.f32 1.442695, %v5045_v41  ;;  %v5046_v63 = vsub.f32 %v4993_v20, %v5026_v61  ;;  %v4671_v20 = vsel %vm3241_vm5, %v9860_v62, -inf }
0x13b8   : > { %v5029_v24 = vpop.xlane.xlu0 %5028 }
0x13b9   : > { %8050 = vpow2.f32 %v5053_v49  ;;  %v5055_v48 = vmul.f32 1.442695, %v5046_v63  ;;  %v5047_v47 = vsub.f32 %v7470_v42, %v5029_v24 }
0x13ba   : > { %v5032_v9 = vpop.xlane.xlu1 %5031 }
0x13bb   : > { %8052 = vpow2.f32 %v5055_v48  ;;  %v5057_v38 = vmul.f32 1.442695, %v5047_v47  ;;  %v5048_v59 = vsub.f32 %v7471_v27, %v5032_v9  ;;  %v4665_v27 = vsel %vm3241_vm5, %v9862_v0, -inf }
0x13bc   : > { %v5035_v4 = vpop.xlane.xlu0 %5034 }
0x13bd   : > { %8054 = vpow2.f32 %v5057_v38  ;;  %v5059_v13 = vmul.f32 1.442695, %v5048_v59  ;;  %v5049_v44 = vsub.f32 %v5006_v12, %v5035_v4 }
0x13be   : > { %v5038_v57 = vpop.xlane.xlu1 %5037 }
0x13bf   : > { %8056 = vpow2.f32 %v5059_v13  ;;  %v5061_v8 = vmul.f32 1.442695, %v5049_v44  ;;  %v5050_v46 = vsub.f32 %v5009_v22, %v5038_v57 }
0x13c0   : > { %v5041_v18 = vpop.xlane.xlu0 %5040 }
0x13c1   : > { %8058 = vpow2.f32 %v5061_v8  ;;  %v5063_v21 = vmul.f32 1.442695, %v5050_v46  ;;  %v5051_v26 = vsub.f32 %v7474_v56, %v5041_v18  ;;  %v4680_v56 = vsel %vm3241_vm5, %v9864_v45, -inf }
0x13c2   : > { %v5044_v36 = vpop.xlane.xlu1 %5043 }
0x13c3   : > { %v9880_v33 = vpop.eup %8050  ;;  %8060 = vpow2.f32 %v5063_v21  ;;  %v5065_v30 = vmul.f32 1.442695, %v5051_v26  ;;  %v5052_v34 = vsub.f32 %v7475_v10, %v5044_v36 }
0x13c4   : > { %v5069_v51 = vsel %vm3241_vm5, %v9880_v33, 0.0 }
0x13c5   : > { %v8053_v39 = vpop.eup %8052  ;;  %8062 = vpow2.f32 %v5065_v30  ;;  %v5067_v25 = vmul.f32 1.442695, %v5052_v34  ;;  %5070 = vadd.xlane.f32.xlu0 %v5069_v51 }
0x13c6   : > { %v5072_v3 = vsel %vm3241_vm5, %v8053_v39, 0.0 }
0x13c7   : > { %v8055_v54 = vpop.eup %8054  ;;  %8064 = vpow2.f32 %v5067_v25  ;;  %5073 = vadd.xlane.f32.xlu1 %v5072_v3 }
0x13c8   : > { %v5075_v31 = vsel %vm3241_vm5, %v8055_v54, 0.0 }
0x13c9   : > { %v8057_v19 = vpop.eup %8056  ;;  %5076 = vadd.xlane.f32.xlu0 %v5075_v31 }
0x13ca   : > { %v5078_v23 = vsel %vm3241_vm5, %v8057_v19, 0.0 }
0x13cb   : > { %v9887_v29 = vpop.eup %8058  ;;  %5079 = vadd.xlane.f32.xlu1 %v5078_v23 }
0x13cc   : > { %v5081_v1 = vsel %vm3241_vm5, %v9887_v29, 0.0 }
0x13cd   : > { %v9891_v11 = vpop.eup %8060  ;;  %5082 = vadd.xlane.f32.xlu0 %v5081_v1 }
0x13ce   : > { %v5084_v50 = vsel %vm3241_vm5, %v9891_v11, 0.0 }
0x13cf   : > { %v9895_v5 = vpop.eup %8062  ;;  %5085 = vadd.xlane.f32.xlu1 %v5084_v50 }
0x13d0   : > { %v5087_v7 = vsel %vm3241_vm5, %v9895_v5, 0.0 }
0x13d1   : > { %v9899_v17 = vpop.eup %8064  ;;  %5088 = vadd.xlane.f32.xlu0 %v5087_v7 }
0x13d2   : > { %v5090_v42 = vsel %vm3241_vm5, %v9899_v17, 0.0 }
0x13d3   : > { %5091 = vadd.xlane.f32.xlu1 %v5090_v42 }
0x13d5   : > { %4663 = vmax.xlane.f32.xlu0 %v4662_v37 }
0x13d7   : > { %4666 = vmax.xlane.f32.xlu1 %v4665_v27  ;;  %v10767_v27 = vld [vmem:[#allocation32_spill] sm:$0xff] }
0x13d9   : > { %4669 = vmax.xlane.f32.xlu0 %v4668_v32  ;;  %v10769_v32 = vld [vmem:[#allocation60_spill] sm:$0xff] }
0x13db   : > { %4672 = vmax.xlane.f32.xlu1 %v4671_v20 }
0x13dd   : > { %4675 = vmax.xlane.f32.xlu0 %v4674_v35 }
0x13df   : > { %4678 = vmax.xlane.f32.xlu1 %v4677_v16 }
0x13e1   : > { %4681 = vmax.xlane.f32.xlu0 %v4680_v56 }
0x13e3   : > { %4684 = vmax.xlane.f32.xlu1 %v4683_v60 }
0x1452   : > { %v5071_v12 = vpop.xlane.xlu0 %5070 }
0x1453   : > { %8066 = vrcp.f32 %v5071_v12 }
0x1454   : > { %v5074_v10 = vpop.xlane.xlu1 %5073 }
0x1455   : > { %8068 = vrcp.f32 %v5074_v10 }
0x1456   : > { %v5077_v53 = vpop.xlane.xlu0 %5076 }
0x1457   : > { %8070 = vrcp.f32 %v5077_v53  ;;  %v10770_v53 = vld [vmem:[#allocation62_spill] sm:$0xff] }
0x1458   : > { %v5080_v22 = vpop.xlane.xlu1 %5079 }
0x1459   : > { %8072 = vrcp.f32 %v5080_v22 }
0x145a   : > { %v5083_v55 = vpop.xlane.xlu0 %5082 }
0x145b   : > { %8074 = vrcp.f32 %v5083_v55 }
0x145c   : > { %v5086_v43 = vpop.xlane.xlu1 %5085 }
0x145d   : > { %v8067_v28 = vpop.eup %8066  ;;  %8076 = vrcp.f32 %v5086_v43 }
0x145e   : > { %v5089_v58 = vpop.xlane.xlu0 %5088  ;;  %v5101_v49 = vmul.f32 %v8067_v28, %v9880_v33 }
0x145f   : > { %v8069_v41 = vpop.eup %8068  ;;  %8078 = vrcp.f32 %v5089_v58 }
0x1460   : > { %v5092_v61 = vpop.xlane.xlu1 %5091  ;;  %v5102_v63 = vmul.f32 %v8069_v41, %v8053_v39  ;;  %v10765_v39 = vld [vmem:[#allocation58_spill] sm:$0xff] }
0x1461   : > { %v8071_v24 = vpop.eup %8070  ;;  %8080 = vrcp.f32 %v5092_v61 }
0x1462   : > { %v4664_v48 = vpop.xlane.xlu0 %4663  ;;  %v5109_v47 = vpack.c.bf16 %v5102_v63, %v5101_v49  ;;  %v5103_v59 = vmul.f32 %v8071_v24, %v8055_v54  ;;  %v10771_v49 = vld [vmem:[#allocation57_spill] sm:$0xff]  ;;  %v10772_v63 = vld [vmem:[#allocation38_spill] sm:$0xff]  ;;  %v10773_v24 = vld [vmem:[#allocation36_spill] sm:$0xff] }
0x1463   : > { %v8073_v9 = vpop.eup %8072  ;;  %v4686_v38 = vsub.f32 %v9858_v2, %v4664_v48  ;;  %v10774_v48 = vpack.c.bf16 %v10772_v63, %v10773_v24 }
0x1464   : > { %v5104_v4 = vmul.f32 %v8073_v9, %v8057_v19  ;;  %7484 = vmatprep.mubr.msk.bf16.mxu1 %vm3241_vm5, %v5109_v47  ;;  %v4667_v13 = vpop.xlane.xlu1 %4666  ;;  %v10775_v47 = vld [vmem:[#allocation42_spill] sm:$0xff]  ;;  %v10776_v9 = vld [vmem:[#allocation40_spill] sm:$0xff] }
0x1465   : > { %v8075_v44 = vpop.eup %8074  ;;  %v4694_v57 = vmul.f32 1.442695, %v4686_v38  ;;  %v4687_v8 = vsub.f32 %v9862_v0, %v4667_v13  ;;  %v10777_v38 = vpack.c.bf16 %v10775_v47, %v10776_v9  ;;  %v10780_v13 = vld [vmem:[#allocation44_spill] sm:$0xff] }
0x1466   : > { %v5110_v46 = vpack.c.bf16 %v5104_v4, %v5103_v59  ;;  %v4670_v18 = vpop.xlane.xlu0 %4669  ;;  %v5105_v2 = vmul.f32 %v8075_v44, %v9887_v29  ;;  %v10778_v59 = vld [vmem:[#allocation59_spill] sm:$0xff]  ;;  %v10779_v4 = vld [vmem:[#allocation46_spill] sm:$0xff] }
0x1467   : > { %v8077_v21 = vpop.eup %8076  ;;  %8082 = vpow2.f32 %v4694_v57  ;;  %v4696_v26 = vmul.f32 1.442695, %v4687_v8  ;;  %v4688_v36 = vsub.f32 %v9856_v52, %v4670_v18  ;;  %v10781_v44 = vpack.c.bf16 %v10779_v4, %v10780_v13  ;;  %v10782_v57 = vld [vmem:[#allocation35_spill] sm:$0xff]  ;;  %v10783_v8 = vld [vmem:[#allocation33_spill] sm:$0xff] }
0x1468   : > { %7485 = vmatmul.mubr.msk.bf16.vlgmr.msra.gmra.mrb[184].mxu1 %vm3241_vm5, %v5110_v46  ;;  %v4673_v33 = vpop.xlane.xlu1 %4672  ;;  %v5106_v30 = vmul.f32 %v8077_v21, %v9891_v11  ;;  %v10784_v46 = vpack.c.bf16 %v10782_v57, %v10783_v8  ;;  %v10785_v18 = vld [vmem:[#allocation61_spill] sm:$0xff]  ;;  %v10786_v21 = vld [vmem:[#allocation63_spill] sm:$0xff] }
0x1469   : > { %v8079_v34 = vpop.eup %8078  ;;  %8084 = vpow2.f32 %v4696_v26  ;;  %v4698_v51 = vmul.f32 1.442695, %v4688_v36  ;;  %7517 = vmatpush3.bf16.xpose.msra.mxu1 %v10761_v15  ;;  %v4689_v0 = vsub.f32 %v9860_v62, %v4673_v33  ;;  %v10787_v26 = vld [vmem:[#allocation76_spill] sm:$0xff]  ;;  %v10788_v36 = vld [vmem:[#allocation39_spill] sm:$0xff]  ;;  %v10789_v33 = vld [vmem:[#allocation37_spill] sm:$0xff] }
0x146a   : > { %7518 = vmatprep.subr.bf16.mxu1 %v10765_v39  ;;  %v4676_v25 = vpop.xlane.xlu0 %4675  ;;  %v5111_v3 = vpack.c.bf16 %v5106_v30, %v5105_v2  ;;  %v5107_v23 = vmul.f32 %v8079_v34, %v9895_v5  ;;  %v10790_v2 = vpack.c.bf16 %v10788_v36, %v10789_v33  ;;  %v10791_v30 = vld [vmem:[#allocation43_spill] sm:$0xff]  ;;  %v10792_v34 = vld [vmem:[#allocation41_spill] sm:$0xff] }
0x146b   : > { %v8081_v54 = vpop.eup %8080  ;;  %8086 = vpow2.f32 %v4698_v51  ;;  %v4700_v52 = vmul.f32 1.442695, %v4689_v0  ;;  %v4690_v31 = vsub.f32 %v9866_v6, %v4676_v25  ;;  %v10793_v51 = vpack.c.bf16 %v10791_v30, %v10792_v34  ;;  %v10794_v0 = vld [vmem:[#allocation78_spill] sm:$0xff]  ;;  %v10796_v25 = vld [vmem:[#allocation47_spill] sm:$0xff] }
0x146c   : > { %7488 = vmatprep.mubr.msk.bf16.mxu1 %vm3241_vm5, %v5111_v3  ;;  %v4679_v19 = vpop.xlane.xlu1 %4678  ;;  %v5108_v29 = vmul.f32 %v8081_v54, %v9899_v17  ;;  %v10766_v17 = vld [vmem:[#allocation34_spill] sm:$0xff]  ;;  %v10797_v3 = vld [vmem:[#allocation45_spill] sm:$0xff] }
0x146d   : > { %8088 = vpow2.f32 %v4700_v52  ;;  %v4702_v15 = vmul.f32 1.442695, %v4690_v31  ;;  %v4691_v62 = vsub.f32 %v9870_v40, %v4679_v19  ;;  %v10768_v40 = vpack.c.bf16 %v10766_v17, %v10767_v27  ;;  %v10799_v52 = vld [vmem:[#allocation82_spill] sm:$0xff] }
0x146e   : > { %v4682_v1 = vpop.xlane.xlu0 %4681  ;;  %v5112_v11 = vpack.c.bf16 %v5108_v29, %v5107_v23  ;;  %v10798_v54 = vpack.c.bf16 %v10796_v25, %v10797_v3 }
0x146f   : > { %8090 = vpow2.f32 %v4702_v15  ;;  %v4704_v50 = vmul.f32 1.442695, %v4691_v62  ;;  %v4692_v7 = vsub.f32 %v9864_v45, %v4682_v1 }
0x1470   : > { %7489 = vmatmul.mubr.msk.bf16.gmra.mrb[188].mxu1 %vm3241_vm5, %v5112_v11  ;;  %v4685_v6 = vpop.xlane.xlu1 %4684 }
0x1471   : > { %v9937_v42 = vpop.eup %8082  ;;  %8092 = vpow2.f32 %v4704_v50  ;;  %v4706_v37 = vmul.f32 1.442695, %v4692_v7  ;;  %7519 = vmatpush3.bf16.xpose.msra.mxu1 %v10765_v39  ;;  %v4693_v5 = vsub.f32 %v9868_v14, %v4685_v6  ;;  %7524 = vmatprep.mubr.bf16.mxu1 %v10768_v40  ;;  %v10795_v39 = vld [vmem:[#allocation80_spill] sm:$0xff] }
0x1472   : > { %7520 = vmatprep.subr.bf16.mxu1 %v10769_v32  ;;  %v4710_v45 = vsel %vm3241_vm5, %v9937_v42, 0.0  ;;  %v7778_v50 = vld [vmem:[%s10532_s8 + $0x100] sm:$0xff]  }
0x1473   : > { %v9947_v20 = vpop.eup %8084  ;;  %8094 = vpow2.f32 %v4706_v37  ;;  %v4708_v35 = vmul.f32 1.442695, %v4693_v5  ;;  %4711 = vadd.xlane.f32.xlu0 %v4710_v45  ;;  %7436 = vmatprep.subr.bf16.mxu0 %v7778_v50 }
0x1474   : > { %v4713_v16 = vsel %vm3241_vm5, %v9947_v20, 0.0 }
0x1475   : > { %v9951_v56 = vpop.eup %8086  ;;  %8096 = vpow2.f32 %v4708_v35  ;;  %4714 = vadd.xlane.f32.xlu1 %v4713_v16 }
0x1476   : > { %v4716_v14 = vsel %vm3241_vm5, %v9951_v56, 0.0 }
0x1477   : > { %v9955_v60 = vpop.eup %8088  ;;  %4717 = vadd.xlane.f32.xlu0 %v4716_v14  ;;  %v7779_v14 = vld [vmem:[%s10532_s8 + $0x108] sm:$0xff]  }
0x1478   : > { %v4719_v12 = vsel %vm3241_vm5, %v9955_v60, 0.0 }
0x1479   : > { %v9959_v10 = vpop.eup %8090  ;;  %7521 = vmatpush3.bf16.xpose.msra.mxu1 %v10769_v32  ;;  %4720 = vadd.xlane.f32.xlu1 %v4719_v12 }
0x147a   : > { %7522 = vmatprep.subr.bf16.mxu1 %v10770_v53  ;;  %v4722_v22 = vsel %vm3241_vm5, %v9959_v10, 0.0 }
0x147b   : > { %v9965_v55 = vpop.eup %8092  ;;  %4723 = vadd.xlane.f32.xlu0 %v4722_v22 }
0x147c   : > { %v4725_v43 = vsel %vm3241_vm5, %v9965_v55, 0.0 }
0x147d   : > { %v9969_v28 = vpop.eup %8094  ;;  %4726 = vadd.xlane.f32.xlu1 %v4725_v43 }
0x147e   : > { %v4728_v58 = vsel %vm3241_vm5, %v9969_v28, 0.0 }
0x147f   : > { %v9973_v41 = vpop.eup %8096  ;;  %4729 = vadd.xlane.f32.xlu0 %v4728_v58 }
0x1480   : > { %v4731_v61 = vsel %vm3241_vm5, %v9973_v41, 0.0 }
0x1481   : > { %7523 = vmatpush3.bf16.xpose.msra.mxu1 %v10770_v53  ;;  %4732 = vadd.xlane.f32.xlu1 %v4731_v61 }
0x1482   : > { %7572 = vmatprep.subr.bf16.mxu1 %v10771_v49 }
0x1488   : > { %7525 = vmatmul.mubr.bf16.vlgmr.msra.gmra.mrb[192].mxu1 %v10774_v48 }
0x1489   : > { %7528 = vmatprep.mubr.bf16.mxu1 %v10777_v38  ;;  %7573 = vmatpush3.bf16.xpose.msra.mxu1 %v10771_v49 }
0x148a   : > { %7574 = vmatprep.subr.bf16.mxu1 %v10778_v59 }
0x1490   : > { %7529 = vmatmul.mubr.bf16.gmra.mrb[196].mxu1 %v10781_v44 }
0x1491   : > { %7575 = vmatpush3.bf16.xpose.msra.mxu1 %v10778_v59  ;;  %7580 = vmatprep.mubr.bf16.mxu1 %v10784_v46 }
0x1492   : > { %7576 = vmatprep.subr.bf16.mxu1 %v10785_v18 }
0x1499   : > { %7577 = vmatpush3.bf16.xpose.msra.mxu1 %v10785_v18 }
0x149a   : > { %7578 = vmatprep.subr.bf16.mxu1 %v10786_v21 }
0x14a1   : > { %7579 = vmatpush3.bf16.xpose.msra.mxu1 %v10786_v21 }
0x14a2   : > { %7588 = vmatprep.subr.bf16.mxu1 %v10787_v26 }
0x14a8   : > { %7581 = vmatmul.mubr.bf16.vlgmr.msra.gmra.mrb[200].mxu1 %v10790_v2 }
0x14a9   : > { %7584 = vmatprep.mubr.bf16.mxu1 %v10793_v51  ;;  %7589 = vmatpush3.bf16.msra.mxu1 %v10787_v26 }
0x14aa   : > { %7590 = vmatprep.subr.bf16.mxu1 %v10794_v0 }
0x14ad   : > { %7591 = vmatpush3.bf16.msra.mxu1 %v10794_v0 }
0x14ae   : > { %7592 = vmatprep.subr.bf16.mxu1 %v10795_v39 }
0x14b0   : > { %7585 = vmatmul.mubr.bf16.gmra.mrb[204].mxu1 %v10798_v54  ;;  %v7785_v54 = vld [vmem:[%s10532_s8 + $0x138] sm:$0xff]  }
0x14b1   : > { %7593 = vmatpush3.bf16.msra.mxu1 %v10795_v39 }
0x14b2   : > { %7594 = vmatprep.subr.bf16.mxu1 %v10799_v52 }
0x14b5   : > { %7595 = vmatpush3.bf16.msra.mxu1 %v10799_v52 }
0x1500   : > { %v4712_v31 = vpop.xlane.xlu0 %4711 }
0x1501   : > { %8098 = vrcp.f32 %v4712_v31  ;;  %v7786_v31 = vld [vmem:[%s10532_s8 + $0x140] sm:$0xff]  }
0x1502   : > { %v4715_v19 = vpop.xlane.xlu1 %4714 }
0x1503   : > { %8100 = vrcp.f32 %v4715_v19 }
0x1504   : > { %v4718_v23 = vpop.xlane.xlu0 %4717 }
0x1505   : > { %8102 = vrcp.f32 %v4718_v23 }
0x1506   : > { %v4721_v29 = vpop.xlane.xlu1 %4720 }
0x1507   : > { %8104 = vrcp.f32 %v4721_v29 }
0x1508   : > { %v4724_v15 = vpop.xlane.xlu0 %4723 }
0x1509   : > { %8106 = vrcp.f32 %v4724_v15 }
0x150a   : > { %v4727_v62 = vpop.xlane.xlu1 %4726 }
0x150b   : > { %v8099_v1 = vpop.eup %8098  ;;  %8108 = vrcp.f32 %v4727_v62 }
0x150c   : > { %v4730_v11 = vpop.xlane.xlu0 %4729  ;;  %v4742_v37 = vmul.f32 %v8099_v1, %v9937_v42 }
0x150d   : > { %v8101_v7 = vpop.eup %8100  ;;  %8110 = vrcp.f32 %v4730_v11 }
0x150e   : > { %v4733_v6 = vpop.xlane.xlu1 %4732  ;;  %v4743_v5 = vmul.f32 %v8101_v7, %v9947_v20 }
0x150f   : > { %v8103_v17 = vpop.eup %8102  ;;  %8112 = vrcp.f32 %v4733_v6 }
0x1510   : > { %v4750_v27 = vpack.c.bf16 %v4743_v5, %v4742_v37  ;;  %v4744_v32 = vmul.f32 %v8103_v17, %v9951_v56 }
0x1511   : > { %v8105_v40 = vpop.eup %8104 }
0x1512   : > { %v4745_v45 = vmul.f32 %v8105_v40, %v9955_v60  ;;  %7428 = vmatprep.mubr.msk.bf16.mxu0 %vm3241_vm5, %v4750_v27  ;;  %v7780_v60 = vld [vmem:[%s10532_s8 + $0x110] sm:$0xff]  }
0x1513   : > { %v8107_v35 = vpop.eup %8106 }
0x1514   : > { %v4751_v16 = vpack.c.bf16 %v4745_v45, %v4744_v32  ;;  %v4746_v20 = vmul.f32 %v8107_v35, %v9959_v10  ;;  %v7781_v10 = vld [vmem:[%s10532_s8 + $0x118] sm:$0xff]  }
0x1515   : > { %v8109_v42 = vpop.eup %8108 }
0x1516   : > { %7429 = vmatmul.mubr.msk.bf16.vlgmr.msra.gmra.mrb[156].mxu0 %vm3241_vm5, %v4751_v16  ;;  %v4747_v12 = vmul.f32 %v8109_v42, %v9965_v55  ;;  %v7782_v55 = vld [vmem:[%s10532_s8 + $0x120] sm:$0xff]  }
0x1517   : > { %v8111_v53 = vpop.eup %8110  ;;  %7437 = vmatpush3.bf16.msra.mxu0 %v7778_v50 }
0x1518   : > { %v4752_v56 = vpack.c.bf16 %v4747_v12, %v4746_v20  ;;  %7438 = vmatprep.subr.bf16.mxu0 %v7779_v14  ;;  %v4748_v43 = vmul.f32 %v8111_v53, %v9969_v28  ;;  %v7783_v28 = vld [vmem:[%s10532_s8 + $0x128] sm:$0xff]  }
0x1519   : > { %v8113_v22 = vpop.eup %8112 }
0x151a   : > { %7432 = vmatprep.mubr.msk.bf16.mxu0 %vm3241_vm5, %v4752_v56  ;;  %v4749_v58 = vmul.f32 %v8113_v22, %v9973_v41  ;;  %v7784_v41 = vld [vmem:[%s10532_s8 + $0x130] sm:$0xff]  }
0x151b   : > { %7439 = vmatpush3.bf16.msra.mxu0 %v7779_v14 }
0x151c   : > { %v4753_v61 = vpack.c.bf16 %v4749_v58, %v4748_v43  ;;  %7440 = vmatprep.subr.bf16.mxu0 %v7780_v60  ;;  %v7787_v43 = vld [vmem:[%s10532_s8 + $0x148] sm:$0xff]  }
0x151e   : > { %7433 = vmatmul.mubr.msk.bf16.gmra.mrb[160].mxu0 %vm3241_vm5, %v4753_v61 }
0x151f   : > { %7441 = vmatpush3.bf16.msra.mxu0 %v7780_v60 }
0x1520   : > { %7442 = vmatprep.subr.bf16.mxu0 %v7781_v10 }
0x1523   : > { %7443 = vmatpush3.bf16.msra.mxu0 %v7781_v10 }
0x1524   : > { %7444 = vmatprep.subr.bf16.mxu0 %v7782_v55 }
0x1527   : > { %7445 = vmatpush3.bf16.msra.mxu0 %v7782_v55 }
0x1528   : > { %7446 = vmatprep.subr.bf16.mxu0 %v7783_v28 }
0x152b   : > { %7447 = vmatpush3.bf16.msra.mxu0 %v7783_v28 }
0x152c   : > { %7448 = vmatprep.subr.bf16.mxu0 %v7784_v41 }
0x152f   : > { %7449 = vmatpush3.bf16.msra.mxu0 %v7784_v41 }
0x1530   : > { %7450 = vmatprep.subr.bf16.mxu0 %v7785_v54 }
0x1533   : > { %7451 = vmatpush3.bf16.msra.mxu0 %v7785_v54 }
0x1534   : > { %7492 = vmatprep.subr.bf16.mxu0 %v7786_v31 }
0x153b   : > { %v10048_v49 = vpop.f32.mrb[184].mxu1 }
0x153c   : > { %v10050_v63 = vpop.f32.mrb[185].mxu1 }
0x153d   : > { %v10052_v24 = vpop.f32.mrb[186].mxu1 }
0x153e   : > { %v5191_v48 = vpack.c.bf16 %v10052_v24, %v10048_v49  ;;  %v10056_v47 = vpop.f32.mrb[187].mxu1 }
0x153f   : > { %v5190_v9 = vpack.c.bf16 %v10056_v47, %v10050_v63 }
0x1543   : > { %v10060_v38 = vpop.f32.mrb[188].mxu1 }
0x1544   : > { %v10062_v59 = vpop.f32.mrb[189].mxu1 }
0x1545   : > { %v10064_v4 = vpop.f32.mrb[190].mxu1 }
0x1546   : > { %v5193_v13 = vpack.c.bf16 %v10064_v4, %v10060_v38  ;;  %v10068_v44 = vpop.f32.mrb[191].mxu1 }
0x1547   : > { %v5192_v57 = vpack.c.bf16 %v10068_v44, %v10062_v59  ;;  %v10802_v59 = vld [vmem:[#allocation79_spill] sm:$0xff] }
0x155b   : > { %v10072_v8 = vpop.f32.mrb[192].mxu1 }
0x155c   : > { %v5349_v46 = vpop.f32.mrb[193].mxu1  ;;  %v5386_v33 = vsel %vm3241_vm5, %v10072_v8, -inf }
0x155d   : > { %v10074_v18 = vpop.f32.mrb[194].mxu1  ;;  %v5380_v21 = vsel %vm3241_vm5, %v5349_v46, -inf }
0x155e   : > { %5381 = vmax.xlane.f32.xlu0 %v5380_v21  ;;  %v10077_v26 = vpop.f32.mrb[195].mxu1  ;;  %v5389_v30 = vsel %vm3241_vm5, %v10074_v18, -inf }
0x155f   : > { %v5383_v36 = vsel %vm3241_vm5, %v10077_v26, -inf }
0x1560   : > { %5384 = vmax.xlane.f32.xlu1 %v5383_v36 }
0x1562   : > { %5387 = vmax.xlane.f32.xlu0 %v5386_v33 }
0x1563   : > { %v10083_v2 = vpop.f32.mrb[196].mxu1 }
0x1564   : > { %v10087_v34 = vpop.f32.mrb[197].mxu1  ;;  %5390 = vmax.xlane.f32.xlu1 %v5389_v30  ;;  %v5398_v3 = vsel %vm3241_vm5, %v10083_v2, -inf }
0x1565   : > { %v10089_v51 = vpop.f32.mrb[198].mxu1  ;;  %v5392_v0 = vsel %vm3241_vm5, %v10087_v34, -inf }
0x1566   : > { %5393 = vmax.xlane.f32.xlu0 %v5392_v0  ;;  %v10093_v39 = vpop.f32.mrb[199].mxu1  ;;  %v5401_v52 = vsel %vm3241_vm5, %v10089_v51, -inf }
0x1567   : > { %v5395_v25 = vsel %vm3241_vm5, %v10093_v39, -inf }
0x1568   : > { %5396 = vmax.xlane.f32.xlu1 %v5395_v25 }
0x156a   : > { %5399 = vmax.xlane.f32.xlu0 %v5398_v3 }
0x156c   : > { %5402 = vmax.xlane.f32.xlu1 %v5401_v52 }
0x157b   : > { %v10107_v19 = vpop.f32.mrb[200].mxu1 }
0x157c   : > { %v10109_v23 = vpop.f32.mrb[201].mxu1  ;;  %v5745_v11 = vsel %vm3241_vm5, %v10107_v19, -inf }
0x157d   : > { %v10111_v29 = vpop.f32.mrb[202].mxu1  ;;  %v5739_v15 = vsel %vm3241_vm5, %v10109_v23, -inf }
0x157e   : > { %5740 = vmax.xlane.f32.xlu0 %v5739_v15  ;;  %v10115_v62 = vpop.f32.mrb[203].mxu1  ;;  %v5748_v7 = vsel %vm3241_vm5, %v10111_v29, -inf }
0x157f   : > { %v5742_v1 = vsel %vm3241_vm5, %v10115_v62, -inf }
0x1580   : > { %5743 = vmax.xlane.f32.xlu1 %v5742_v1 }
0x1582   : > { %5746 = vmax.xlane.f32.xlu0 %v5745_v11 }
0x1583   : > { %v10121_v50 = vpop.f32.mrb[204].mxu1 }
0x1584   : > { %v10125_v6 = vpop.f32.mrb[205].mxu1  ;;  %5749 = vmax.xlane.f32.xlu1 %v5748_v7  ;;  %v5757_v40 = vsel %vm3241_vm5, %v10121_v50, -inf }
0x1585   : > { %v10127_v37 = vpop.f32.mrb[206].mxu1  ;;  %v5751_v5 = vsel %vm3241_vm5, %v10125_v6, -inf }
0x1586   : > { %5752 = vmax.xlane.f32.xlu0 %v5751_v5  ;;  %v10131_v17 = vpop.f32.mrb[207].mxu1  ;;  %v5760_v32 = vsel %vm3241_vm5, %v10127_v37, -inf }
0x1587   : > { %v5754_v27 = vsel %vm3241_vm5, %v10131_v17, -inf }
0x1588   : > { %5755 = vmax.xlane.f32.xlu1 %v5754_v27  ;;  %v7790_v27 = vld [vmem:[%s10532_s8 + $0x160] sm:$0xff]  }
0x158a   : > { %5758 = vmax.xlane.f32.xlu0 %v5757_v40 }
0x158c   : > { %5761 = vmax.xlane.f32.xlu1 %v5760_v32 }
0x15e9   : > { %v7430_v45 = vpop.f32.mrb[156].mxu0 }
0x15ea   : > { %v4800_v35 = vpop.f32.mrb[157].mxu0 }
0x15eb   : > { %v5382_v16 = vpop.xlane.xlu0 %5381  ;;  %v7431_v14 = vpop.f32.mrb[158].mxu0 }
0x15ec   : > { %v5404_v42 = vsub.f32 %v5349_v46, %v5382_v16  ;;  %v4832_v20 = vpack.c.bf16 %v7431_v14, %v7430_v45  ;;  %v4803_v12 = vpop.f32.mrb[159].mxu0  ;;  %v7792_v14 = vld [vmem:[%s10532_s8 + $0x170] sm:$0xff]  }
0x15ed   : > { %v5385_v53 = vpop.xlane.xlu1 %5384  ;;  %v4831_v56 = vpack.c.bf16 %v4803_v12, %v4800_v35 }
0x15ee   : > { %v5412_v60 = vmul.f32 1.442695, %v5404_v42  ;;  %v5405_v22 = vsub.f32 %v10077_v26, %v5385_v53  ;;  %v7788_v26 = vld [vmem:[%s10532_s8 + $0x150] sm:$0xff]  }
0x15ef   : > { %v5388_v58 = vpop.xlane.xlu0 %5387  ;;  %7452 = vmatprep.mubr.bf16.mxu0 %v4831_v56  ;;  %v7793_v56 = vld [vmem:[%s10532_s8 + $0x178] sm:$0xff]  }
0x15f0   : > { %8114 = vpow2.f32 %v5412_v60  ;;  %v5414_v61 = vmul.f32 1.442695, %v5405_v22  ;;  %v5406_v10 = vsub.f32 %v10072_v8, %v5388_v58  ;;  %7453 = vmatmul.mubr.bf16.vlgmr.msra.gmra.mrb[148].mxu0 %v4832_v20 }
0x15f1   : > { %v5391_v55 = vpop.xlane.xlu1 %5390  ;;  %7493 = vmatpush3.bf16.msra.mxu0 %v7786_v31  ;;  %v7434_v28 = vpop.f32.mrb[160].mxu0  ;;  %v7789_v31 = vld [vmem:[%s10532_s8 + $0x158] sm:$0xff]  }
0x15f2   : > { %8116 = vpow2.f32 %v5414_v61  ;;  %v5416_v41 = vmul.f32 1.442695, %v5406_v10  ;;  %v5407_v46 = vsub.f32 %v10074_v18, %v5391_v55  ;;  %v4816_v21 = vpop.f32.mrb[161].mxu0  ;;  %7494 = vmatprep.subr.bf16.mxu0 %v7787_v43 }
0x15f3   : > { %v5394_v36 = vpop.xlane.xlu0 %5393  ;;  %v7435_v33 = vpop.f32.mrb[162].mxu0 }
0x15f4   : > { %8118 = vpow2.f32 %v5416_v41  ;;  %v5418_v30 = vmul.f32 1.442695, %v5407_v46  ;;  %v5408_v8 = vsub.f32 %v10087_v34, %v5394_v36  ;;  %v4834_v0 = vpack.c.bf16 %v7435_v33, %v7434_v28  ;;  %v4819_v25 = vpop.f32.mrb[163].mxu0  ;;  %v10800_v41 = vld [vmem:[#allocation75_spill] sm:$0xff]  ;;  %v10801_v33 = vld [vmem:[#allocation77_spill] sm:$0xff] }
0x15f5   : > { %v5397_v3 = vpop.xlane.xlu1 %5396  ;;  %v4833_v54 = vpack.c.bf16 %v4819_v25, %v4816_v21  ;;  %7495 = vmatpush3.bf16.msra.mxu0 %v7787_v43 }
0x15f6   : > { %8120 = vpow2.f32 %v5418_v30  ;;  %v5420_v52 = vmul.f32 1.442695, %v5408_v8  ;;  %v5409_v18 = vsub.f32 %v10093_v39, %v5397_v3  ;;  %7496 = vmatprep.subr.bf16.mxu0 %v7788_v26  ;;  %v10803_v3 = vld [vmem:[#allocation81_spill] sm:$0xff] }
0x15f7   : > { %v5400_v15 = vpop.xlane.xlu0 %5399  ;;  %7456 = vmatprep.mubr.bf16.mxu0 %v4833_v54 }
0x15f8   : > { %8122 = vpow2.f32 %v5420_v52  ;;  %v5422_v1 = vmul.f32 1.442695, %v5409_v18  ;;  %v5410_v34 = vsub.f32 %v10083_v2, %v5400_v15  ;;  %7457 = vmatmul.mubr.bf16.gmra.mrb[152].mxu0 %v4834_v0 }
0x15f9   : > { %v5403_v11 = vpop.xlane.xlu1 %5402  ;;  %7497 = vmatpush3.bf16.msra.mxu0 %v7788_v26  ;;  %7508 = vmatprep.mubr.bf16.mxu0 %v5190_v9  ;;  %v7791_v9 = vld [vmem:[%s10532_s8 + $0x168] sm:$0xff]  }
0x15fa   : > { %v10157_v7 = vpop.eup %8114  ;;  %8124 = vpow2.f32 %v5422_v1  ;;  %v5424_v39 = vmul.f32 1.442695, %v5410_v34  ;;  %v5411_v5 = vsub.f32 %v10089_v51, %v5403_v11  ;;  %7498 = vmatprep.subr.bf16.mxu0 %v7789_v31 }
0x15fb   : > { %v5428_v2 = vsel %vm3241_vm5, %v10157_v7, 0.0 }
0x15fc   : > { %v10165_v40 = vpop.eup %8116  ;;  %8126 = vpow2.f32 %v5424_v39  ;;  %v5426_v32 = vmul.f32 1.442695, %v5411_v5  ;;  %5429 = vadd.xlane.f32.xlu0 %v5428_v2  ;;  %v7794_v2 = vld [vmem:[%s10532_s8 + $0x180] sm:$0xff]  }
0x15fd   : > { %7499 = vmatpush3.bf16.msra.mxu0 %v7789_v31  ;;  %v5431_v63 = vsel %vm3241_vm5, %v10165_v40, 0.0 }
0x15fe   : > { %v10169_v47 = vpop.eup %8118  ;;  %8128 = vpow2.f32 %v5426_v32  ;;  %5432 = vadd.xlane.f32.xlu1 %v5431_v63  ;;  %7500 = vmatprep.subr.bf16.mxu0 %v7790_v27 }
0x15ff   : > { %v5434_v51 = vsel %vm3241_vm5, %v10169_v47, 0.0 }
0x1600   : > { %v10176_v45 = vpop.eup %8120  ;;  %5435 = vadd.xlane.f32.xlu0 %v5434_v51 }
0x1601   : > { %7501 = vmatpush3.bf16.msra.mxu0 %v7790_v27  ;;  %v5437_v35 = vsel %vm3241_vm5, %v10176_v45, 0.0 }
0x1602   : > { %v10180_v16 = vpop.eup %8122  ;;  %5438 = vadd.xlane.f32.xlu1 %v5437_v35  ;;  %7502 = vmatprep.subr.bf16.mxu0 %v7791_v9 }
0x1603   : > { %v5440_v42 = vsel %vm3241_vm5, %v10180_v16, 0.0 }
0x1604   : > { %v10187_v20 = vpop.eup %8124  ;;  %5441 = vadd.xlane.f32.xlu0 %v5440_v42 }
0x1605   : > { %7503 = vmatpush3.bf16.msra.mxu0 %v7791_v9  ;;  %v5443_v12 = vsel %vm3241_vm5, %v10187_v20, 0.0 }
0x1606   : > { %v10191_v53 = vpop.eup %8126  ;;  %5444 = vadd.xlane.f32.xlu1 %v5443_v12  ;;  %7504 = vmatprep.subr.bf16.mxu0 %v7792_v14 }
0x1607   : > { %v5446_v60 = vsel %vm3241_vm5, %v10191_v53, 0.0 }
0x1608   : > { %v10198_v22 = vpop.eup %8128  ;;  %5447 = vadd.xlane.f32.xlu0 %v5446_v60 }
0x1609   : > { %7505 = vmatpush3.bf16.msra.mxu0 %v7792_v14  ;;  %v5449_v43 = vsel %vm3241_vm5, %v10198_v22, 0.0 }
0x160a   : > { %5450 = vadd.xlane.f32.xlu1 %v5449_v43  ;;  %7506 = vmatprep.subr.bf16.mxu0 %v7793_v56 }
0x160b   : > { %v5741_v58 = vpop.xlane.xlu0 %5740 }
0x160c   : > { %v5763_v61 = vsub.f32 %v10109_v23, %v5741_v58 }
0x160d   : > { %v5744_v10 = vpop.xlane.xlu1 %5743  ;;  %7507 = vmatpush3.bf16.msra.mxu0 %v7793_v56 }
0x160e   : > { %v5771_v55 = vmul.f32 1.442695, %v5763_v61  ;;  %v5764_v28 = vsub.f32 %v10115_v62, %v5744_v10  ;;  %7532 = vmatprep.subr.bf16.mxu0 %v10800_v41 }
0x160f   : > { %v5747_v46 = vpop.xlane.xlu0 %5746 }
0x1610   : > { %8130 = vpow2.f32 %v5771_v55  ;;  %v5773_v21 = vmul.f32 1.442695, %v5764_v28  ;;  %v5765_v26 = vsub.f32 %v10107_v19, %v5747_v46  ;;  %7509 = vmatmul.mubr.bf16.vlgmr.msra.gmra.mrb[148].mxu0 %v5191_v48 }
0x1611   : > { %v5750_v36 = vpop.xlane.xlu1 %5749  ;;  %7512 = vmatprep.mubr.bf16.mxu0 %v5192_v57  ;;  %7533 = vmatpush3.bf16.msra.mxu0 %v10800_v41 }
0x1612   : > { %8132 = vpow2.f32 %v5773_v21  ;;  %v5775_v23 = vmul.f32 1.442695, %v5765_v26  ;;  %v5766_v62 = vsub.f32 %v10111_v29, %v5750_v36  ;;  %7534 = vmatprep.subr.bf16.mxu0 %v10801_v33  ;;  %v7795_v26 = vld [vmem:[%s10532_s8 + $0x188] sm:$0xff]  }
0x1613   : > { %v5753_v30 = vpop.xlane.xlu0 %5752 }
0x1614   : > { %8134 = vpow2.f32 %v5775_v23  ;;  %v5777_v19 = vmul.f32 1.442695, %v5766_v62  ;;  %v5767_v8 = vsub.f32 %v10125_v6, %v5753_v30 }
0x1615   : > { %v5756_v49 = vpop.xlane.xlu1 %5755  ;;  %7535 = vmatpush3.bf16.msra.mxu0 %v10801_v33 }
0x1616   : > { %8136 = vpow2.f32 %v5777_v19  ;;  %v5779_v24 = vmul.f32 1.442695, %v5767_v8  ;;  %v5768_v48 = vsub.f32 %v10131_v17, %v5756_v49  ;;  %7536 = vmatprep.subr.bf16.mxu0 %v10802_v59  ;;  %v7798_v8 = vld [vmem:[%s10532_s8 + $0x1a0] sm:$0xff]   ;;  %v7799_v49 = vld [vmem:[%s10532_s8 + $0x1a8] sm:$0xff]  }
0x1617   : > { %v5759_v44 = vpop.xlane.xlu0 %5758 }
0x1618   : > { %8138 = vpow2.f32 %v5779_v24  ;;  %v5781_v57 = vmul.f32 1.442695, %v5768_v48  ;;  %v5769_v29 = vsub.f32 %v10121_v50, %v5759_v44  ;;  %7513 = vmatmul.mubr.bf16.gmra.mrb[152].mxu0 %v5193_v13 }
0x1619   : > { %v5762_v0 = vpop.xlane.xlu1 %5761  ;;  %7537 = vmatpush3.bf16.msra.mxu0 %v10802_v59  ;;  %v7800_v59 = vld [vmem:[%s10532_s8 + $0x1b0] sm:$0xff]  }
0x161a   : > { %v10224_v6 = vpop.eup %8130  ;;  %8140 = vpow2.f32 %v5781_v57  ;;  %v5783_v25 = vmul.f32 1.442695, %v5769_v29  ;;  %v5770_v17 = vsub.f32 %v10127_v37, %v5762_v0  ;;  %7538 = vmatprep.subr.bf16.mxu0 %v10803_v3 }
0x161b   : > { %v5787_v54 = vsel %vm3241_vm5, %v10224_v6, 0.0 }
0x161c   : > { %v10230_v52 = vpop.eup %8132  ;;  %8142 = vpow2.f32 %v5783_v25  ;;  %v5785_v50 = vmul.f32 1.442695, %v5770_v17  ;;  %5788 = vadd.xlane.f32.xlu0 %v5787_v54 }
0x161d   : > { %7539 = vmatpush3.bf16.msra.mxu0 %v10803_v3  ;;  %v5790_v38 = vsel %vm3241_vm5, %v10230_v52, 0.0 }
0x161e   : > { %v10235_v4 = vpop.eup %8134  ;;  %8144 = vpow2.f32 %v5785_v50  ;;  %5791 = vadd.xlane.f32.xlu1 %v5790_v38  ;;  %7548 = vmatprep.subr.bf16.mxu0 %v7794_v2 }
0x161f   : > { %v5793_v13 = vsel %vm3241_vm5, %v10235_v4, 0.0 }
0x1620   : > { %v10239_v37 = vpop.eup %8136  ;;  %5794 = vadd.xlane.f32.xlu0 %v5793_v13 }
0x1621   : > { %v5796_v18 = vsel %vm3241_vm5, %v10239_v37, 0.0 }
0x1622   : > { %v10243_v31 = vpop.eup %8138  ;;  %5797 = vadd.xlane.f32.xlu1 %v5796_v18 }
0x1623   : > { %v5799_v15 = vsel %vm3241_vm5, %v10243_v31, 0.0 }
0x1624   : > { %v10247_v1 = vpop.eup %8140  ;;  %5800 = vadd.xlane.f32.xlu0 %v5799_v15 }
0x1625   : > { %v5802_v34 = vsel %vm3241_vm5, %v10247_v1, 0.0 }
0x1626   : > { %v10251_v11 = vpop.eup %8142  ;;  %5803 = vadd.xlane.f32.xlu1 %v5802_v34 }
0x1627   : > { %v5805_v39 = vsel %vm3241_vm5, %v10251_v11, 0.0 }
0x1628   : > { %v10255_v5 = vpop.eup %8144  ;;  %5806 = vadd.xlane.f32.xlu0 %v5805_v39 }
0x1629   : > { %v5808_v27 = vsel %vm3241_vm5, %v10255_v5, 0.0 }
0x162a   : > { %5809 = vadd.xlane.f32.xlu1 %v5808_v27 }
0x1689   : > { %v5430_v32 = vpop.xlane.xlu0 %5429 }
0x168a   : > { %8146 = vrcp.f32 %v5430_v32 }
0x168b   : > { %v5433_v63 = vpop.xlane.xlu1 %5432 }
0x168c   : > { %8148 = vrcp.f32 %v5433_v63 }
0x168d   : > { %v5436_v9 = vpop.xlane.xlu0 %5435 }
0x168e   : > { %8150 = vrcp.f32 %v5436_v9  ;;  %v10804_v9 = vmov 0  }
0x168f   : > { %v5439_v51 = vpop.xlane.xlu1 %5438 }
0x1690   : > { %8152 = vrcp.f32 %v5439_v51 }
0x1691   : > { %v5442_v35 = vpop.xlane.xlu0 %5441 }
0x1692   : > { %8154 = vrcp.f32 %v5442_v35 }
0x1693   : > { %v5445_v14 = vpop.xlane.xlu1 %5444 }
0x1694   : > { %v8147_v42 = vpop.eup %8146  ;;  %8156 = vrcp.f32 %v5445_v14 }
0x1695   : > { %v5448_v12 = vpop.xlane.xlu0 %5447  ;;  %v5460_v43 = vmul.f32 %v8147_v42, %v10157_v7 }
0x1696   : > { %v8149_v56 = vpop.eup %8148  ;;  %8158 = vrcp.f32 %v5448_v12  ;;  %v7803_v12 = vld [vmem:[%s10532_s8 + $0x1c8] sm:$0xff]  }
0x1697   : > { %v5451_v60 = vpop.xlane.xlu1 %5450  ;;  %v5461_v58 = vmul.f32 %v8149_v56, %v10165_v40 }
0x1698   : > { %v8151_v61 = vpop.eup %8150  ;;  %8160 = vrcp.f32 %v5451_v60 }
0x1699   : > { %v5468_v10 = vpack.c.bf16 %v5461_v58, %v5460_v43  ;;  %v5462_v28 = vmul.f32 %v8151_v61, %v10169_v47  ;;  %v7804_v43 = vld [vmem:[%s10532_s8 + $0x1d0] sm:$0xff]  }
0x169a   : > { %v8153_v55 = vpop.eup %8152 }
0x169b   : > { %v5463_v41 = vmul.f32 %v8153_v55, %v10176_v45  ;;  %7540 = vmatprep.mubr.msk.bf16.mxu0 %vm3241_vm5, %v5468_v10  ;;  %v7796_v45 = vld [vmem:[%s10532_s8 + $0x190] sm:$0xff]  }
0x169c   : > { %v8155_v46 = vpop.eup %8154 }
0x169d   : > { %v5469_v21 = vpack.c.bf16 %v5463_v41, %v5462_v28  ;;  %v5464_v7 = vmul.f32 %v8155_v46, %v10180_v16  ;;  %v7797_v16 = vld [vmem:[%s10532_s8 + $0x198] sm:$0xff]   ;;  %v7806_v41 = vld [vmem:[%s10532_s8 + $0x1e0] sm:$0xff]   ;;  %v7807_v46 = vld [vmem:[%s10532_s8 + $0x1e8] sm:$0xff]  }
0x169e   : > { %v8157_v36 = vpop.eup %8156  ;;  %v7805_v28 = vld [vmem:[%s10532_s8 + $0x1d8] sm:$0xff]  }
0x169f   : > { %7541 = vmatmul.mubr.msk.bf16.vlgmr.msra.gmra.mrb[164].mxu0 %vm3241_vm5, %v5469_v21  ;;  %v5465_v40 = vmul.f32 %v8157_v36, %v10187_v20  ;;  %v7808_v21 = vld [vmem:[%s10532_s8 + $0x1f0] sm:$0xff]  }
0x16a0   : > { %v8159_v23 = vpop.eup %8158  ;;  %7549 = vmatpush3.bf16.msra.mxu0 %v7794_v2 }
0x16a1   : > { %v5470_v47 = vpack.c.bf16 %v5465_v40, %v5464_v7  ;;  %7550 = vmatprep.subr.bf16.mxu0 %v7795_v26  ;;  %v5466_v33 = vmul.f32 %v8159_v23, %v10191_v53 }
0x16a2   : > { %v8161_v62 = vpop.eup %8160 }
0x16a3   : > { %7544 = vmatprep.mubr.msk.bf16.mxu0 %vm3241_vm5, %v5470_v47  ;;  %v5467_v30 = vmul.f32 %v8161_v62, %v10198_v22 }
0x16a4   : > { %7551 = vmatpush3.bf16.msra.mxu0 %v7795_v26  ;;  %v7809_v26 = vld [vmem:[%s10532_s8 + $0x1f8] sm:$0xff]  }
0x16a5   : > { %v5471_v19 = vpack.c.bf16 %v5467_v30, %v5466_v33  ;;  %7552 = vmatprep.subr.bf16.mxu0 %v7796_v45 }
0x16a7   : > { %7545 = vmatmul.mubr.msk.bf16.gmra.mrb[168].mxu0 %vm3241_vm5, %v5471_v19 }
0x16a8   : > { %7553 = vmatpush3.bf16.msra.mxu0 %v7796_v45 }
0x16a9   : > { %v5789_v20 = vpop.xlane.xlu0 %5788  ;;  %7554 = vmatprep.subr.bf16.mxu0 %v7797_v16 }
0x16aa   : > { %8162 = vrcp.f32 %v5789_v20 }
0x16ab   : > { %v5792_v53 = vpop.xlane.xlu1 %5791 }
0x16ac   : > { %8164 = vrcp.f32 %v5792_v53  ;;  %7555 = vmatpush3.bf16.msra.mxu0 %v7797_v16 }
0x16ad   : > { %v5795_v22 = vpop.xlane.xlu0 %5794  ;;  %7556 = vmatprep.subr.bf16.mxu0 %v7798_v8 }
0x16ae   : > { %8166 = vrcp.f32 %v5795_v22  ;;  %v10805_v22 = vld [vmem:[#allocation2_spill] sm:$0xff] }
0x16af   : > { %v5798_v24 = vpop.xlane.xlu1 %5797 }
0x16b0   : > { %8168 = vrcp.f32 %v5798_v24  ;;  %7557 = vmatpush3.bf16.msra.mxu0 %v7798_v8  ;;  %v10335_v8 = vld [vmem:[%s10535_s11 + $0x8] sm:$0xf] }
0x16b1   : > { %v5801_v48 = vpop.xlane.xlu0 %5800  ;;  %7558 = vmatprep.subr.bf16.mxu0 %v7799_v49 }
0x16b2   : > { %8170 = vrcp.f32 %v5801_v48  ;;  %v10806_v48 = vld [vmem:[#allocation6_spill] sm:$0xff] }
0x16b3   : > { %v5804_v44 = vpop.xlane.xlu1 %5803 }
0x16b4   : > { %v8163_v57 = vpop.eup %8162  ;;  %8172 = vrcp.f32 %v5804_v44  ;;  %7559 = vmatpush3.bf16.msra.mxu0 %v7799_v49  ;;  %v6044_v49 = vrot.slane %v10335_v8, %v10805_v22  ;;  %v10807_v44 = vld [vmem:[#allocation12_spill] sm:$0xff] }
0x16b5   : > { %v5807_v29 = vpop.xlane.xlu0 %5806  ;;  %7560 = vmatprep.subr.bf16.mxu0 %v7800_v59  ;;  %v5819_v17 = vmul.f32 %v8163_v57, %v10224_v6 }
0x16b6   : > { %v8165_v0 = vpop.eup %8164  ;;  %8174 = vrcp.f32 %v5807_v29 }
0x16b7   : > { %v5810_v25 = vpop.xlane.xlu1 %5809  ;;  %v5820_v3 = vmul.f32 %v8165_v0, %v10230_v52 }
0x16b8   : > { %v8167_v54 = vpop.eup %8166  ;;  %8176 = vrcp.f32 %v5810_v25  ;;  %7561 = vmatpush3.bf16.msra.mxu0 %v7800_v59 }
0x16b9   : > { %v5827_v50 = vpack.c.bf16 %v5820_v3, %v5819_v17  ;;  %v5821_v13 = vmul.f32 %v8167_v54, %v10235_v4  ;;  %v10808_v17 = vld [vmem:[#allocation7_spill] sm:$0xff]  ;;  %v10809_v54 = vld [vmem:[#allocation13_spill] sm:$0xff] }
0x16ba   : > { %v8169_v38 = vpop.eup %8168 }
0x16bb   : > { %v5822_v18 = vmul.f32 %v8169_v38, %v10239_v37  ;;  %7596 = vmatprep.mubr.msk.bf16.mxu1 %vm3241_vm5, %v5827_v50 }
0x16bc   : > { %v8171_v15 = vpop.eup %8170 }
0x16bd   : > { %v5828_v34 = vpack.c.bf16 %v5822_v18, %v5821_v13  ;;  %v5823_v6 = vmul.f32 %v8171_v15, %v10243_v31  ;;  %v7801_v31 = vld [vmem:[%s10532_s8 + $0x1b8] sm:$0xff]  }
0x16be   : > { %v8173_v39 = vpop.eup %8172  ;;  %7562 = vmatprep.subr.bf16.mxu0 %v7801_v31 }
0x16bf   : > { %7597 = vmatmul.mubr.msk.bf16.vlgmr.msra.gmra.mrb[208].mxu1 %vm3241_vm5, %v5828_v34  ;;  %v5824_v52 = vmul.f32 %v8173_v39, %v10247_v1  ;;  %7563 = vmatpush3.bf16.msra.mxu0 %v7801_v31  ;;  %v7802_v1 = vld [vmem:[%s10532_s8 + $0x1c0] sm:$0xff]  }
0x16c0   : > { %v8175_v27 = vpop.eup %8174  ;;  %7604 = vmatprep.subr.bf16.mxu0 %v7802_v1 }
0x16c1   : > { %v5829_v2 = vpack.c.bf16 %v5824_v52, %v5823_v6  ;;  %v5825_v4 = vmul.f32 %v8175_v27, %v10251_v11  ;;  %v10810_v52 = vld [vmem:[#allocation9_spill] sm:$0xff] }
0x16c2   : > { %v8177_v32 = vpop.eup %8176 }
0x16c3   : > { %7600 = vmatprep.mubr.msk.bf16.mxu1 %vm3241_vm5, %v5829_v2  ;;  %v5826_v37 = vmul.f32 %v8177_v32, %v10255_v5  ;;  %v10811_v2 = vld [vmem:[#allocation8_spill] sm:$0xff] }
0x16c5   : > { %v5830_v63 = vpack.c.bf16 %v5826_v37, %v5825_v4 }
0x16c7   : > { %7601 = vmatmul.mubr.msk.bf16.gmra.mrb[212].mxu1 %vm3241_vm5, %v5830_v63 }
0x16c8   : > { %6287 = vmatprep.mubr.bf16.mxu1 %v10804_v9 }
0x1772   : > { %v7542_v51 = vpop.f32.mrb[164].mxu0 }
0x1773   : > { %v5518_v11 = vpop.f32.mrb[165].mxu0 }
0x1774   : > { %v7543_v35 = vpop.f32.mrb[166].mxu0 }
0x1775   : > { %v5550_v5 = vpack.c.bf16 %v7543_v35, %v7542_v51  ;;  %v5521_v14 = vpop.f32.mrb[167].mxu0 }
0x1776   : > { %v5549_v42 = vpack.c.bf16 %v5521_v14, %v5518_v11  ;;  %v10813_v11 = vld [vmem:[#allocation10_spill] sm:$0xff] }
0x1778   : > { %7564 = vmatprep.mubr.bf16.mxu0 %v5549_v42 }
0x1779   : > { %7565 = vmatmul.mubr.bf16.vlgmr.msra.gmra.mrb[148].mxu0 %v5550_v5 }
0x177a   : > { %v7546_v56 = vpop.f32.mrb[168].mxu0  ;;  %7605 = vmatpush3.bf16.msra.mxu0 %v7802_v1  ;;  %v10812_v1 = vld [vmem:[#allocation11_spill] sm:$0xff] }
0x177b   : > { %v5534_v60 = vpop.f32.mrb[169].mxu0  ;;  %7606 = vmatprep.subr.bf16.mxu0 %v7803_v12 }
0x177c   : > { %v7547_v58 = vpop.f32.mrb[170].mxu0 }
0x177d   : > { %v5552_v61 = vpack.c.bf16 %v7547_v58, %v7546_v56  ;;  %v5537_v10 = vpop.f32.mrb[171].mxu0 }
0x177e   : > { %v5551_v55 = vpack.c.bf16 %v5537_v10, %v5534_v60  ;;  %7607 = vmatpush3.bf16.msra.mxu0 %v7803_v12 }
0x177f   : > { %7608 = vmatprep.subr.bf16.mxu0 %v7804_v43 }
0x1780   : > { %7568 = vmatprep.mubr.bf16.mxu0 %v5551_v55 }
0x1781   : > { %7569 = vmatmul.mubr.bf16.gmra.mrb[152].mxu0 %v5552_v61 }
0x1782   : > { %7609 = vmatpush3.bf16.msra.mxu0 %v7804_v43 }
0x1783   : > { %7610 = vmatprep.subr.bf16.mxu0 %v7805_v28 }
0x1786   : > { %7611 = vmatpush3.bf16.msra.mxu0 %v7805_v28 }
0x1787   : > { %7612 = vmatprep.subr.bf16.mxu0 %v7806_v41 }
0x178a   : > { %7613 = vmatpush3.bf16.msra.mxu0 %v7806_v41 }
0x178b   : > { %7614 = vmatprep.subr.bf16.mxu0 %v7807_v46 }
0x178e   : > { %7615 = vmatpush3.bf16.msra.mxu0 %v7807_v46 }
0x178f   : > { %7616 = vmatprep.subr.bf16.mxu0 %v7808_v21 }
0x1792   : > { %v7598_v36 = vpop.f32.mrb[208].mxu1  ;;  %7617 = vmatpush3.bf16.msra.mxu0 %v7808_v21 }
0x1793   : > { %v5877_v7 = vpop.f32.mrb[209].mxu1  ;;  %7618 = vmatprep.subr.bf16.mxu0 %v7809_v26 }
0x1794   : > { %v7599_v40 = vpop.f32.mrb[210].mxu1 }
0x1795   : > { %v5909_v23 = vpack.c.bf16 %v7599_v40, %v7598_v36  ;;  %v5880_v47 = vpop.f32.mrb[211].mxu1 }
0x1796   : > { %v5908_v45 = vpack.c.bf16 %v5880_v47, %v5877_v7  ;;  %7619 = vmatpush3.bf16.msra.mxu0 %v7809_v26 }
0x1798   : > { %7620 = vmatprep.mubr.bf16.mxu0 %v5908_v45 }
0x1799   : > { %7621 = vmatmul.mubr.bf16.vlgmr.msra.gmra.mrb[148].mxu0 %v5909_v23 }
0x179a   : > { %v7602_v62 = vpop.f32.mrb[212].mxu1 }
0x179b   : > { %v5893_v33 = vpop.f32.mrb[213].mxu1 }
0x179c   : > { %v7603_v30 = vpop.f32.mrb[214].mxu1 }
0x179d   : > { %v5911_v19 = vpack.c.bf16 %v7603_v30, %v7602_v62  ;;  %v5896_v16 = vpop.f32.mrb[215].mxu1 }
0x179e   : > { %v5910_v20 = vpack.c.bf16 %v5896_v16, %v5893_v33 }
0x17a0   : > { %7624 = vmatprep.mubr.bf16.mxu0 %v5910_v20 }
0x17a1   : > { %7625 = vmatmul.mubr.bf16.gmra.mrb[152].mxu0 %v5911_v19 }
0x186c   : > { %v7622_v53 = vpop.f32.mrb[148].mxu0 }
0x186d   : > { %v5994_v24 = vpop.f32.mrb[149].mxu0  ;;  %v6035_v59 = vadd.f32 %v7622_v53, %v10806_v48 }
0x186e   : > { %v6033_v57 = vadd.f32 %v5994_v24, %v10807_v44  ;;  %v7623_v29 = vpop.f32.mrb[150].mxu0 }
0x186f   : > { %v5997_v0 = vpop.f32.mrb[151].mxu0  ;;  %v6036_v3 = vadd.f32 %v7623_v29, %v10808_v17  ;;  %v10345_v38 = vadd.f32 %v6044_v49, %v6035_v59 }
0x1870   : > { %v10341_v25 = vadd.f32 %v6044_v49, %v6033_v57  ;;  %v6034_v50 = vadd.f32 %v5997_v0, %v10809_v54 }
0x1871   : > { %v10351_v15 = vadd.f32 %v6044_v49, %v6036_v3  ;;  %v6079_v37 = vsel %vm479_vm0, %v10345_v38, 0.0 }
0x1872   : > { %v10347_v13 = vadd.f32 %v6044_v49, %v6034_v50  ;;  %v6073_v18 = vsel %vm479_vm0, %v10341_v25, 0.0 }
0x1873   : > { %6074 = vadd.xlane.f32.xlu0 %v6073_v18  ;;  %v6082_v5 = vsel %vm479_vm0, %v10351_v15, 0.0 }
0x1874   : > { %v7626_v34 = vpop.f32.mrb[152].mxu0  ;;  %v6076_v39 = vsel %vm479_vm0, %v10347_v13, 0.0 }
0x1875   : > { %6077 = vadd.xlane.f32.xlu1 %v6076_v39  ;;  %v6010_v6 = vpop.f32.mrb[153].mxu0  ;;  %v6039_v27 = vadd.f32 %v7626_v34, %v10810_v52 }
0x1876   : > { %v6037_v32 = vadd.f32 %v6010_v6, %v10811_v2  ;;  %v7627_v4 = vpop.f32.mrb[154].mxu0  ;;  %v7812_v2 = vld [vmem:[%s10533_s9 + $0x4] ss:$8 sps:$4 sm:$0xff]  }
0x1877   : > { %6080 = vadd.xlane.f32.xlu0 %v6079_v37  ;;  %v6013_v63 = vpop.f32.mrb[155].mxu0  ;;  %v6040_v51 = vadd.f32 %v7627_v4, %v10812_v1  ;;  %v10365_v14 = vadd.f32 %v6044_v49, %v6039_v27  ;;  %6255 = vmatprep.subr.bf16.mxu1 %v7812_v2  ;;  %v7815_v4 = vld [vmem:[%s10533_s9 + $0x14] ss:$8 sps:$4 sm:$0xff]   ;;  %v7813_v37 = vld [vmem:[%s10533_s9 + $0x10] ss:$8 sps:$4 sm:$0xff]  }
0x1878   : > { %v10359_v31 = vadd.f32 %v6044_v49, %v6037_v32  ;;  %v6038_v35 = vadd.f32 %v6013_v63, %v10813_v11  ;;  %v7810_v32 = vld [vmem:[%s10533_s9] ss:$8 sps:$4 sm:$0xff]  }
0x1879   : > { %6083 = vadd.xlane.f32.xlu1 %v6082_v5  ;;  %v10371_v56 = vadd.f32 %v6044_v49, %v6040_v51  ;;  %v6091_v43 = vsel %vm479_vm0, %v10365_v14, 0.0  ;;  %6256 = vmatpush1.bf16.msra.mxu1 %v7810_v32 }
0x187a   : > { %v10367_v42 = vadd.f32 %v6044_v49, %v6038_v35  ;;  %v6085_v12 = vsel %vm479_vm0, %v10359_v31, 0.0  ;;  %6257 = vmatprep.subr.bf16.mxu1 %v7815_v4 }
0x187b   : > { %6086 = vadd.xlane.f32.xlu0 %v6085_v12  ;;  %v6094_v58 = vsel %vm479_vm0, %v10371_v56, 0.0 }
0x187c   : > { %v6088_v60 = vsel %vm479_vm0, %v10367_v42, 0.0 }
0x187d   : > { %6089 = vadd.xlane.f32.xlu1 %v6088_v60  ;;  %6258 = vmatpush1.bf16.msra.mxu1 %v7813_v37 }
0x187f   : > { %6092 = vadd.xlane.f32.xlu0 %v6091_v43 }
0x1881   : > { %6095 = vadd.xlane.f32.xlu1 %v6094_v58 }
0x1900   : > { %v6075_v61 = vpop.xlane.xlu0 %6074 }
0x1901   : > { %v6097_v10 = vmul.f32 0.03125, %v6075_v61 }
0x1902   : > { %v6078_v55 = vpop.xlane.xlu1 %6077 }
0x1903   : > { %v10380_v28 = vsub.f32 %v10341_v25, %v6097_v10  ;;  %v6098_v41 = vmul.f32 0.03125, %v6078_v55 }
0x1904   : > { %v6081_v46 = vpop.xlane.xlu0 %6080 }
0x1905   : > { %v10383_v21 = vsub.f32 %v10347_v13, %v6098_v41  ;;  %v6099_v26 = vmul.f32 0.03125, %v6081_v46  ;;  %v6113_v36 = vmul.f32 %v10380_v28, %v10380_v28 }
0x1906   : > { %v6084_v7 = vpop.xlane.xlu1 %6083 }
0x1907   : > { %v10388_v40 = vsub.f32 %v10345_v38, %v6099_v26  ;;  %v6100_v23 = vmul.f32 0.03125, %v6084_v7  ;;  %v6121_v47 = vsel %vm479_vm0, %v6113_v36, 0.0  ;;  %v6114_v45 = vmul.f32 %v10383_v21, %v10383_v21 }
0x1908   : > { %6122 = vadd.xlane.f32.xlu0 %v6121_v47  ;;  %v6087_v62 = vpop.xlane.xlu0 %6086 }
0x1909   : > { %v10394_v33 = vsub.f32 %v10351_v15, %v6100_v23  ;;  %v6101_v30 = vmul.f32 0.03125, %v6087_v62  ;;  %v6124_v19 = vsel %vm479_vm0, %v6114_v45, 0.0  ;;  %v6115_v16 = vmul.f32 %v10388_v40, %v10388_v40  ;;  %v10814_v23 = vld [vmem:[#allocation3_spill] sm:$0xff] }
0x190a   : > { %6125 = vadd.xlane.f32.xlu1 %v6124_v19  ;;  %v6090_v20 = vpop.xlane.xlu1 %6089  ;;  %v6180_v47 = vrot.slane %v10335_v8, %v10814_v23 }
0x190b   : > { %v10400_v53 = vsub.f32 %v10359_v31, %v6101_v30  ;;  %v6102_v22 = vmul.f32 0.03125, %v6090_v20  ;;  %v6127_v49 = vsel %vm479_vm0, %v6115_v16, 0.0  ;;  %v6116_v24 = vmul.f32 %v10394_v33, %v10394_v33 }
0x190c   : > { %6128 = vadd.xlane.f32.xlu0 %v6127_v49  ;;  %v6093_v48 = vpop.xlane.xlu0 %6092  ;;  %v10815_v49 = vld [vmem:[#allocation4_spill] sm:$0xff] }
0x190d   : > { %v10406_v59 = vsub.f32 %v10367_v42, %v6102_v22  ;;  %v6103_v44 = vmul.f32 0.03125, %v6093_v48  ;;  %v6130_v57 = vsel %vm479_vm0, %v6116_v24, 0.0  ;;  %v6117_v29 = vmul.f32 %v10400_v53, %v10400_v53 }
0x190e   : > { %6131 = vadd.xlane.f32.xlu1 %v6130_v57  ;;  %v6096_v0 = vpop.xlane.xlu1 %6095  ;;  %v6192_v24 = vrot.slane %v10335_v8, %v10815_v49 }
0x190f   : > { %v10412_v17 = vsub.f32 %v10365_v14, %v6103_v44  ;;  %v6104_v3 = vmul.f32 0.03125, %v6096_v0  ;;  %v6133_v54 = vsel %vm479_vm0, %v6117_v29, 0.0  ;;  %v6118_v50 = vmul.f32 %v10406_v59, %v10406_v59 }
0x1910   : > { %6134 = vadd.xlane.f32.xlu0 %v6133_v54 }
0x1911   : > { %v10418_v18 = vsub.f32 %v10371_v56, %v6104_v3  ;;  %v6136_v34 = vsel %vm479_vm0, %v6118_v50, 0.0  ;;  %v6119_v39 = vmul.f32 %v10412_v17, %v10412_v17 }
0x1912   : > { %6137 = vadd.xlane.f32.xlu1 %v6136_v34 }
0x1913   : > { %v6139_v6 = vsel %vm479_vm0, %v6119_v39, 0.0  ;;  %v6120_v52 = vmul.f32 %v10418_v18, %v10418_v18 }
0x1914   : > { %6140 = vadd.xlane.f32.xlu0 %v6139_v6 }
0x1915   : > { %v6142_v27 = vsel %vm479_vm0, %v6120_v52, 0.0 }
0x1916   : > { %6143 = vadd.xlane.f32.xlu1 %v6142_v27 }
0x1995   : > { %v6123_v63 = vpop.xlane.xlu0 %6122 }
0x1996   : > { %v6145_v1 = vmul.f32 0.03125, %v6123_v63 }
0x1997   : > { %v6126_v51 = vpop.xlane.xlu1 %6125 }
0x1998   : > { %v6153_v11 = vadd.f32 1e-05, %v6145_v1  ;;  %v6146_v35 = vmul.f32 0.03125, %v6126_v51 }
0x1999   : > { %v6129_v5 = vpop.xlane.xlu0 %6128 }
0x199a   : > { %8178 = vrsqrt.f32 %v6153_v11  ;;  %v6154_v12 = vadd.f32 1e-05, %v6146_v35  ;;  %v6147_v60 = vmul.f32 0.03125, %v6129_v5 }
0x199b   : > { %v6132_v43 = vpop.xlane.xlu1 %6131 }
0x199c   : > { %8180 = vrsqrt.f32 %v6154_v12  ;;  %v6155_v58 = vadd.f32 1e-05, %v6147_v60  ;;  %v6148_v61 = vmul.f32 0.03125, %v6132_v43 }
0x199d   : > { %v6135_v10 = vpop.xlane.xlu0 %6134 }
0x199e   : > { %8182 = vrsqrt.f32 %v6155_v58  ;;  %v6156_v55 = vadd.f32 1e-05, %v6148_v61  ;;  %v6149_v41 = vmul.f32 0.03125, %v6135_v10 }
0x199f   : > { %v6138_v46 = vpop.xlane.xlu1 %6137 }
0x19a0   : > { %8184 = vrsqrt.f32 %v6156_v55  ;;  %v6150_v26 = vmul.f32 0.03125, %v6138_v46  ;;  %v6157_v36 = vadd.f32 1e-05, %v6149_v41  ;;  %v7819_v55 = vld [vmem:[%s10534_s10 + $0x18] sm:$0xff]   ;;  %v7820_v41 = vld [vmem:[%s10534_s10 + $0x20] sm:$0xff]   ;;  %v7821_v46 = vld [vmem:[%s10534_s10 + $0x28] sm:$0xff]  }
0x19a1   : > { %v6141_v45 = vpop.xlane.xlu0 %6140 }
0x19a2   : > { %v6158_v7 = vadd.f32 1e-05, %v6150_v26  ;;  %v6151_v22 = vmul.f32 0.03125, %v6141_v45  ;;  %v7822_v26 = vld [vmem:[%s10534_s10 + $0x30] sm:$0xff]  }
0x19a3   : > { %v6144_v62 = vpop.xlane.xlu1 %6143 }
0x19a4   : > { %v8179_v30 = vpop.eup %8178  ;;  %8186 = vrsqrt.f32 %v6158_v7  ;;  %v6152_v19 = vmul.f32 0.03125, %v6144_v62  ;;  %v6159_v54 = vadd.f32 1e-05, %v6151_v22  ;;  %v8219_v7 = vld [vmem:[%s10537_s13] sm:$0xf] }
0x19a5   : > { %v6169_v16 = vmul.f32 %v8179_v30, %v10380_v28  ;;  %8188 = vrsqrt.f32 %v6157_v36  ;;  %v7823_v36 = vld [vmem:[%s10534_s10 + $0x38] sm:$0xff]  }
0x19a6   : > { %v8181_v20 = vpop.eup %8180  ;;  %v6160_v29 = vadd.f32 1e-05, %v6152_v19 }
0x19a7   : > { %v6181_v48 = vmul.f32 %v6180_v47, %v6169_v16  ;;  %v6170_v44 = vmul.f32 %v8181_v20, %v10383_v21 }
0x19a8   : > { %v8183_v57 = vpop.eup %8182  ;;  %8190 = vrsqrt.f32 %v6160_v29 }
0x19a9   : > { %v6182_v0 = vmul.f32 %v6180_v47, %v6170_v44  ;;  %v6193_v50 = vadd.f32 %v6192_v24, %v6181_v48  ;;  %v6171_v39 = vmul.f32 %v8183_v57, %v10388_v40  ;;  %8192 = vrsqrt.f32 %v6159_v54 }
0x19aa   : > { %v8185_v3 = vpop.eup %8184 }
0x19ab   : > { %v6194_v34 = vadd.f32 %v6192_v24, %v6182_v0  ;;  %v6172_v28 = vmul.f32 %v8185_v3, %v10394_v33  ;;  %v6183_v2 = vmul.f32 %v6180_v47, %v6171_v39  ;;  %v6208_v3 = vrot.slane %v8219_v7, %v10814_v23 }
0x19ad   : > { %v6201_v6 = vpack.c.bf16 %v6194_v34, %v6193_v50  ;;  %v6184_v52 = vmul.f32 %v6180_v47, %v6172_v28  ;;  %v6195_v63 = vadd.f32 %v6192_v24, %v6183_v2  ;;  %v10489_v28 = vrot.slane %v6208_v3, %v10814_v23 }
0x19ae   : > { %v8187_v27 = vpop.eup %8186 }
0x19af   : > { %6809 = vmatmul.mubr.msk.bf16.vlgmr.msra.gmra.mrb[216].mxu1 %vm479_vm0, %v6201_v6  ;;  %v8189_v21 = vpop.eup %8188  ;;  %v6174_v32 = vmul.f32 %v8187_v27, %v10406_v59  ;;  %v6196_v4 = vadd.f32 %v6192_v24, %v6184_v52 }
0x19b0   : > { %6297 = vmatprep.mubr.bf16.mxu1 %v10804_v9  ;;  %v6173_v37 = vmul.f32 %v8189_v21, %v10400_v53 }
0x19b1   : > { %v6202_v40 = vpack.c.bf16 %v6196_v4, %v6195_v63  ;;  %v6186_v1 = vmul.f32 %v6180_v47, %v6174_v32 }
0x19b2   : > { %v8191_v33 = vpop.eup %8190  ;;  %v6185_v51 = vmul.f32 %v6180_v47, %v6173_v37 }
0x19b3   : > { %v8193_v11 = vpop.eup %8192  ;;  %v6176_v35 = vmul.f32 %v8191_v33, %v10418_v18  ;;  %v6198_v5 = vadd.f32 %v6192_v24, %v6186_v1  ;;  %v7816_v18 = vld [vmem:[%s10534_s10] sm:$0xff]  }
0x19b4   : > { %v6175_v12 = vmul.f32 %v8193_v11, %v10412_v17  ;;  %v6197_v60 = vadd.f32 %v6192_v24, %v6185_v51  ;;  %7628 = vmatprep.subr.bf16.mxu1 %v7816_v18  ;;  %v7817_v17 = vld [vmem:[%s10534_s10 + $0x8] sm:$0xff]  }
0x19b5   : > { %v6188_v43 = vmul.f32 %v6180_v47, %v6176_v35  ;;  %7629 = vmatpush3.bf16.msra.mxu1 %v7816_v18 }
0x19b6   : > { %v6203_v59 = vpack.c.bf16 %v6198_v5, %v6197_v60  ;;  %v6187_v53 = vmul.f32 %v6180_v47, %v6175_v12  ;;  %7630 = vmatprep.subr.bf16.mxu1 %v7817_v17  ;;  %v10816_v47 = vld [vmem:[#allocation5_spill] sm:$0xff] }
0x19b7   : > { %6810 = vmatmul.mubr.msk.bf16.gmra.mrb[220].mxu1 %vm479_vm0, %v6202_v40  ;;  %v6200_v58 = vadd.f32 %v6192_v24, %v6188_v43  ;;  %v6212_v45 = vrot.slane %v8219_v7, %v10816_v47 }
0x19b8   : > { %6307 = vmatprep.mubr.bf16.mxu1 %v10804_v9  ;;  %v6199_v61 = vadd.f32 %v6192_v24, %v6187_v53 }
0x19b9   : > { %7631 = vmatpush3.bf16.msra.mxu1 %v7817_v17  ;;  %v6222_v62 = vrot.slane %v6212_v45, %v10814_v23 }
0x19ba   : > { %v6204_v10 = vpack.c.bf16 %v6200_v58, %v6199_v61 }
0x19bf   : > { %6811 = vmatmul.mubr.msk.bf16.gmra.mrb[224].mxu1 %vm479_vm0, %v6203_v59 }
0x19c0   : > { %6317 = vmatprep.mubr.bf16.mxu1 %v10804_v9  ;;  %v7818_v9 = vld [vmem:[%s10534_s10 + $0x10] sm:$0xff]  }
0x19c1   : > { %7632 = vmatprep.subr.bf16.mxu1 %v7818_v9 }
0x19c2   : > { %7633 = vmatpush3.bf16.msra.mxu1 %v7818_v9 }
0x19c3   : > { %7634 = vmatprep.subr.bf16.mxu1 %v7819_v55 }
0x19c6   : > { %7635 = vmatpush3.bf16.msra.mxu1 %v7819_v55 }
0x19c7   : > { %6812 = vmatmul.mubr.msk.bf16.gmra.mrb[228].mxu1 %vm479_vm0, %v6204_v10  ;;  %7636 = vmatprep.subr.bf16.mxu1 %v7820_v41 }
0x19ca   : > { %7637 = vmatpush3.bf16.msra.mxu1 %v7820_v41 }
0x19cb   : > { %7638 = vmatprep.subr.bf16.mxu1 %v7821_v46 }
0x19ce   : > { %7639 = vmatpush3.bf16.msra.mxu1 %v7821_v46 }
0x19cf   : > { %7640 = vmatprep.subr.bf16.mxu1 %v7822_v26 }
0x19d2   : > { %7641 = vmatpush3.bf16.msra.mxu1 %v7822_v26 }
0x19d3   : > { %7642 = vmatprep.subr.bf16.mxu1 %v7823_v36 }
0x19d6   : > { %7643 = vmatpush3.bf16.msra.mxu1 %v7823_v36 }
0x1a82   : > { %v6289_v30 = vpop.f32.mrb[216].mxu1 }
0x1a83   : > { %v6291_v19 = vpop.f32.mrb[217].mxu1  ;;  %v6290_v63 = vadd.f32 %v6289_v30, %v10489_v28 }
0x1a84   : > { %v6292_v16 = vadd.f32 %v6291_v19, %v6222_v62  ;;  %v6293_v20 = vpop.f32.mrb[218].mxu1 }
0x1a85   : > { %v6295_v22 = vpop.f32.mrb[219].mxu1  ;;  %v6294_v23 = vadd.f32 %v6293_v20, %v10489_v28 }
0x1a86   : > { %v6336_v49 = vmul.f32 0.70710677, %v6292_v16  ;;  %v6296_v24 = vadd.f32 %v6295_v22, %v6222_v62  ;;  %v6328_v27 = vmul.f32 0.5, %v6292_v16 }
0x1a88   : > { %8194 = verf.f32 %v6336_v49  ;;  %v6337_v48 = vmul.f32 0.70710677, %v6296_v24  ;;  %v6329_v1 = vmul.f32 0.5, %v6296_v24 }
0x1a8a   : > { %8196 = verf.f32 %v6337_v48  ;;  %v6299_v44 = vpop.f32.mrb[220].mxu1 }
0x1a8b   : > { %v6301_v57 = vpop.f32.mrb[221].mxu1  ;;  %v6300_v41 = vadd.f32 %v6299_v44, %v10489_v28 }
0x1a8c   : > { %v6302_v29 = vadd.f32 %v6301_v57, %v6222_v62  ;;  %v6303_v0 = vpop.f32.mrb[222].mxu1 }
0x1a8d   : > { %v6305_v54 = vpop.f32.mrb[223].mxu1  ;;  %v6304_v16 = vadd.f32 %v6303_v0, %v10489_v28 }
0x1a8e   : > { %v6338_v50 = vmul.f32 0.70710677, %v6302_v29  ;;  %v6306_v34 = vadd.f32 %v6305_v54, %v6222_v62  ;;  %v6330_v58 = vmul.f32 0.5, %v6302_v29 }
0x1a90   : > { %8198 = verf.f32 %v6338_v50  ;;  %v6339_v39 = vmul.f32 0.70710677, %v6306_v34  ;;  %v6331_v26 = vmul.f32 0.5, %v6306_v34 }
0x1a92   : > { %v8195_v6 = vpop.eup %8194  ;;  %8200 = verf.f32 %v6339_v39  ;;  %v6309_v52 = vpop.f32.mrb[224].mxu1 }
0x1a93   : > { %v6352_v2 = vadd.f32 1.0, %v8195_v6  ;;  %v6311_v21 = vpop.f32.mrb[225].mxu1  ;;  %v6310_v3 = vadd.f32 %v6309_v52, %v10489_v28 }
0x1a94   : > { %v8197_v32 = vpop.eup %8196  ;;  %v6312_v4 = vadd.f32 %v6311_v21, %v6222_v62  ;;  %v6313_v37 = vpop.f32.mrb[226].mxu1 }
0x1a95   : > { %v6360_v40 = vmul.f32 %v6352_v2, %v6328_v27  ;;  %v6353_v33 = vadd.f32 1.0, %v8197_v32  ;;  %v6315_v51 = vpop.f32.mrb[227].mxu1 }
0x1a96   : > { %v6340_v11 = vmul.f32 0.70710677, %v6312_v4  ;;  %v6316_v35 = vadd.f32 %v6315_v51, %v6222_v62  ;;  %v6332_v57 = vmul.f32 0.5, %v6312_v4 }
0x1a97   : > { %v6361_v5 = vmul.f32 %v6353_v33, %v6329_v1  ;;  %v6368_v12 = vmul.f32 %v6360_v40, %v6290_v63 }
0x1a98   : > { %8202 = verf.f32 %v6340_v11  ;;  %v6341_v60 = vmul.f32 0.70710677, %v6316_v35  ;;  %v6333_v50 = vmul.f32 0.5, %v6316_v35 }
0x1a99   : > { %v6369_v59 = vmul.f32 %v6361_v5, %v6294_v23  ;;  %v6383_v23 = vrot.slane %v10335_v8, %v10816_v47 }
0x1a9a   : > { %v8199_v43 = vpop.eup %8198  ;;  %8204 = verf.f32 %v6341_v60  ;;  %v6319_v53 = vpop.f32.mrb[228].mxu1 }
0x1a9b   : > { %v6354_v61 = vadd.f32 1.0, %v8199_v43  ;;  %v6321_v10 = vpop.f32.mrb[229].mxu1  ;;  %v6376_v18 = vpack.c.bf16 %v6369_v59, %v6368_v12  ;;  %v6320_v4 = vadd.f32 %v6319_v53, %v10489_v28 }
0x1a9c   : > { %v8201_v17 = vpop.eup %8200  ;;  %v6322_v9 = vadd.f32 %v6321_v10, %v6222_v62  ;;  %v6323_v55 = vpop.f32.mrb[230].mxu1 }
0x1a9d   : > { %v6362_v46 = vmul.f32 %v6354_v61, %v6330_v58  ;;  %v6355_v36 = vadd.f32 1.0, %v8201_v17  ;;  %v6325_v7 = vpop.f32.mrb[231].mxu1  ;;  %7644 = vmatprep.mubr.bf16.mxu1 %v6376_v18  ;;  %v6324_v33 = vadd.f32 %v6323_v55, %v10489_v28 }
0x1a9e   : > { %v6342_v45 = vmul.f32 0.70710677, %v6322_v9  ;;  %v6326_v30 = vadd.f32 %v6325_v7, %v6222_v62  ;;  %v6314_v62 = vadd.f32 %v6313_v37, %v10489_v28  ;;  %v6334_v2 = vmul.f32 0.5, %v6322_v9 }
0x1a9f   : > { %v6370_v19 = vmul.f32 %v6362_v46, %v6300_v41  ;;  %v6363_v20 = vmul.f32 %v6355_v36, %v6331_v26 }
0x1aa0   : > { %8206 = verf.f32 %v6342_v45  ;;  %v6343_v22 = vmul.f32 0.70710677, %v6326_v30  ;;  %v6335_v1 = vmul.f32 0.5, %v6326_v30 }
0x1aa1   : > { %v6371_v49 = vmul.f32 %v6363_v20, %v6304_v16 }
0x1aa2   : > { %v8203_v24 = vpop.eup %8202  ;;  %8208 = verf.f32 %v6343_v22 }
0x1aa3   : > { %v6377_v48 = vpack.c.bf16 %v6371_v49, %v6370_v19  ;;  %v6356_v29 = vadd.f32 1.0, %v8203_v24 }
0x1aa4   : > { %v8205_v44 = vpop.eup %8204 }
0x1aa5   : > { %v6364_v54 = vmul.f32 %v6356_v29, %v6332_v57  ;;  %v6357_v34 = vadd.f32 1.0, %v8205_v44  ;;  %7645 = vmatmul.mubr.bf16.vlgmr.msra.gmra.mrb[232].mxu1 %v6377_v48 }
0x1aa7   : > { %v6365_v39 = vmul.f32 %v6357_v34, %v6333_v50  ;;  %v6372_v0 = vmul.f32 %v6364_v54, %v6310_v3 }
0x1aa9   : > { %v6373_v6 = vmul.f32 %v6365_v39, %v6314_v62 }
0x1aaa   : > { %v8207_v27 = vpop.eup %8206 }
0x1aab   : > { %v6358_v21 = vadd.f32 1.0, %v8207_v27  ;;  %v6378_v32 = vpack.c.bf16 %v6373_v6, %v6372_v0 }
0x1aac   : > { %v8209_v63 = vpop.eup %8208 }
0x1aad   : > { %v6366_v40 = vmul.f32 %v6358_v21, %v6334_v2  ;;  %v6359_v52 = vadd.f32 1.0, %v8209_v63  ;;  %7648 = vmatprep.mubr.bf16.mxu1 %v6378_v32 }
0x1aaf   : > { %v6367_v51 = vmul.f32 %v6359_v52, %v6335_v1  ;;  %v6374_v11 = vmul.f32 %v6366_v40, %v6320_v4 }
0x1ab1   : > { %v6375_v37 = vmul.f32 %v6367_v51, %v6324_v33 }
0x1ab3   : > { %v6379_v35 = vpack.c.bf16 %v6375_v37, %v6374_v11 }
0x1ab5   : > { %7649 = vmatmul.mubr.bf16.gmra.mrb[236].mxu1 %v6379_v35 }
0x1b78   : > { %v7646_v5 = vpop.f32.mrb[232].mxu1 }
0x1b79   : > { %v6475_v12 = vadd.f32 %v7646_v5, %v6383_v23  ;;  %v6466_v60 = vpop.f32.mrb[233].mxu1 }
0x1b7a   : > { %v6467_v59 = vadd.f32 %v6466_v60, %v6383_v23  ;;  %v7647_v43 = vpop.f32.mrb[234].mxu1 }
0x1b7b   : > { %v6499_v28 = vadd.f32 %v6475_v12, %v10345_v38  ;;  %v6478_v53 = vadd.f32 %v7647_v43, %v6383_v23  ;;  %v6469_v58 = vpop.f32.mrb[235].mxu1 }
0x1b7c   : > { %v6497_v61 = vadd.f32 %v6467_v59, %v10341_v25  ;;  %v6470_v10 = vadd.f32 %v6469_v58, %v6383_v23 }
0x1b7d   : > { %6507 = vst.msk [vmem:[%s464_s24 + $0x10] sm:$0xff] %vm479_vm0, %v6499_v28  ;;  %v6500_v8 = vadd.f32 %v6478_v53, %v10351_v15 }
0x1b7e   : > { %6505 = vst.msk [vmem:[%s464_s24] sm:$0xff] %vm479_vm0, %v6497_v61  ;;  %v6498_v47 = vadd.f32 %v6470_v10, %v10347_v13 }
0x1b7f   : > { %6508 = vst.msk [vmem:[%s464_s24 + $0x18] sm:$0xff] %vm479_vm0, %v6500_v8 }
0x1b80   : > { %6506 = vst.msk [vmem:[%s464_s24 + $0x8] sm:$0xff] %vm479_vm0, %v6498_v47 }
0x1b88   : > { %v7650_v18 = vpop.f32.mrb[236].mxu1 }
0x1b89   : > { %v6491_v17 = vadd.f32 %v7650_v18, %v6383_v23  ;;  %v6482_v38 = vpop.f32.mrb[237].mxu1 }
0x1b8a   : > { %v6483_v9 = vadd.f32 %v6482_v38, %v6383_v23  ;;  %v7651_v55 = vpop.f32.mrb[238].mxu1 }
0x1b8b   : > { %v6503_v25 = vadd.f32 %v6491_v17, %v10365_v14  ;;  %v6494_v41 = vadd.f32 %v7651_v55, %v6383_v23  ;;  %v6485_v46 = vpop.f32.mrb[239].mxu1 }
0x1b8c   : > { %v6501_v26 = vadd.f32 %v6483_v9, %v10359_v31  ;;  %v6486_v15 = vadd.f32 %v6485_v46, %v6383_v23 }
0x1b8d   : > { %6511 = vst.msk [vmem:[%s464_s24 + $0x30] sm:$0xff] %vm479_vm0, %v6503_v25  ;;  %v6504_v13 = vadd.f32 %v6494_v41, %v10371_v56 }
0x1b8e   : > { %6509 = vst.msk [vmem:[%s464_s24 + $0x20] sm:$0xff] %vm479_vm0, %v6501_v26  ;;  %v6502_v36 = vadd.f32 %v6486_v15, %v10367_v42 }
0x1b8f   : > { %6512 = vst.msk [vmem:[%s464_s24 + $0x38] sm:$0xff] %vm479_vm0, %v6504_v13 }
0x1b90   : > { %6510 = vst.msk [vmem:[%s464_s24 + $0x28] sm:$0xff] %vm479_vm0, %v6502_v36 }
0x1b91 PF: > { %s24_s29 = sadd.s32 1, %s8226_s29  }
0x1b92   : > { %p21_p4 = scmp.ge.s32.totalorder %s24_s29, 4  }
0x1b94   :  { %23 = sbr.rel (!%p21_p4) target bundleno = 1 (0x1), region = 106 }

</bundles_post_ra>
